<compile_context>
chip_gen: v7x
topology: tpu7x:2x2x1
jax: 0.10.0
libtpu: 0.0.40
codegen_flags: <defaults>
</compile_context>

<pallas_src>
import functools

import jax
import jax.numpy as jnp
from jax.experimental import pallas as pl
from jax.experimental.pallas import tpu as pltpu

BN_EPS = 1e-5
VMEM_LIMIT_BYTES = 48 * 1024 * 1024   # sized against v7x's 64 MiB/TC VMEM


# ---------------------------------------------------------------------------
# Kernels
# ---------------------------------------------------------------------------
def _conv_stats_kernel(*refs, spatial_hw, fuse_in_bn_relu):
    """3x3 conv (stride 1, pad 1) for one sample + per-sample BN partials.

    If `fuse_in_bn_relu`, a folded BN affine + ReLU is applied to the input
    first (stage-1's BN+ReLU fused into stage-2's conv, so the activation
    never round-trips HBM).  Zero padding happens after that affine, matching
    how PyTorch pads conv2's (post-activation) input.
    """
    H, W = spatial_hw
    if fuse_in_bn_relu:
        x_ref, scale_ref, shift_ref, w_ref, c_ref, stats_ref, xpad_ref = refs
    else:
        x_ref, w_ref, c_ref, stats_ref, xpad_ref = refs
        scale_ref = shift_ref = None

    Cin = xpad_ref.shape[2]

    if fuse_in_bn_relu:
        x = x_ref[0].astype(jnp.float32)                       # (H*W, Cin)
        x = jnp.maximum(x * scale_ref[...] + shift_ref[...], 0.0)
        x = x.astype(jnp.bfloat16).reshape(H, W, Cin)
    else:
        x = x_ref[0]                                           # (H, W, Cin) bf16

    # Refresh only the halo ring (interior rows are fully overwritten below).
    # A program_id==0 one-shot init is not safe: the "parallel" grid axis may
    # be split across TensorCores (v7x), each with its own scratch.
    zrow = jnp.zeros((1, W + 2, Cin), xpad_ref.dtype)
    xpad_ref[0:1, :, :] = zrow
    xpad_ref[H + 1:H + 2, :, :] = zrow
    zcol = jnp.zeros((H, 1, Cin), xpad_ref.dtype)
    # Full-width, outer-aligned store of the horizontally padded interior rows.
    xpad_ref[1:H + 1, :, :] = jnp.concatenate([zcol, x, zcol], axis=1)

    # im2col-lite: fold the 9 taps into the contraction dim -> one MXU matmul
    # with K = 9*Cin (bf16 operands, f32 accumulation).
    cols = [xpad_ref[kh:kh + H, kw:kw + W, :]
            for kh in range(3) for kw in range(3)]
    lhs = jnp.concatenate(cols, axis=-1).reshape(H * W, 9 * Cin)   # bf16
    acc = jnp.dot(lhs, w_ref[...], preferred_element_type=jnp.float32)
    # Conv bias intentionally omitted: under training-mode BN it only shifts
    # the batch mean, which BN removes exactly (zero effect on the output).

    c_ref[0] = acc.astype(c_ref.dtype)                         # (H*W, Cout) bf16
    # Per-sample partial sums for the global (N,H,W) batch statistics, taken
    # from the f32 accumulator (not the bf16-rounded HBM tensor).
    s = jnp.sum(acc, axis=0, keepdims=True)                    # (1, Cout)
    ss = jnp.sum(acc * acc, axis=0, keepdims=True)             # (1, Cout)
    stats_ref[0] = jnp.concatenate([s, ss], axis=0)            # (2, Cout)


def _bn_act_kernel(c_ref, scale_ref, shift_ref, o_ref):
    """Folded BN affine (residual doubling pre-folded into scale/shift) + ReLU,
    operating on a lane-dense (rows, lanes) view of the activation."""
    y = c_ref[...].astype(jnp.float32) * scale_ref[...] + shift_ref[...]
    o_ref[...] = jnp.maximum(y, 0.0).astype(o_ref.dtype)


# ---------------------------------------------------------------------------
# Pallas-call wrappers
# ---------------------------------------------------------------------------
def _fold_weight(w_oihw):
    """(Cout, Cin, 3, 3) -> (9*Cin, Cout) bf16, tap-major (kh, kw, cin)."""
    cout, cin = w_oihw.shape[0], w_oihw.shape[1]
    return (jnp.transpose(w_oihw, (2, 3, 1, 0))
            .reshape(9 * cin, cout).astype(jnp.bfloat16))


def _conv3x3_stats(x, w_folded, *, spatial, in_scale=None, in_shift=None):
    """Per-sample-tiled conv3x3 (+optional fused input BN+ReLU) + BN partials.

    Stage 1: x is (N, H, W, Cin) bf16.
    Stage 2: x is (N, H*W, Cin) bf16 (previous conv output) and in_scale /
             in_shift carry the folded BN1 affine.
    Returns c (N, H*W, Cout) bf16 and stats (N, 2, Cout) f32.
    """
    H, W = spatial
    fuse = in_scale is not None
    N = x.shape[0]
    Cin = x.shape[-1]
    Cout = w_folded.shape[1]

    kern = functools.partial(_conv_stats_kernel, spatial_hw=(H, W),
                             fuse_in_bn_relu=fuse)

    in_arrays = [x]
    if fuse:
        in_specs = [pl.BlockSpec((1, H * W, Cin), lambda n: (n, 0, 0))]
        in_arrays += [in_scale, in_shift]
        in_specs += [pl.BlockSpec((1, Cin), lambda n: (0, 0)),
                     pl.BlockSpec((1, Cin), lambda n: (0, 0))]
    else:
        in_specs = [pl.BlockSpec((1, H, W, Cin), lambda n: (n, 0, 0, 0))]
    in_arrays += [w_folded]
    in_specs += [pl.BlockSpec((9 * Cin, Cout), lambda n: (0, 0))]

    c, stats = pl.pallas_call(
        kern,
        grid=(N,),
        in_specs=in_specs,
        out_specs=[pl.BlockSpec((1, H * W, Cout), lambda n: (n, 0, 0)),
                   pl.BlockSpec((1, 2, Cout), lambda n: (n, 0, 0))],
        out_shape=[jax.ShapeDtypeStruct((N, H * W, Cout), jnp.bfloat16),
                   jax.ShapeDtypeStruct((N, 2, Cout), jnp.float32)],
        scratch_shapes=[pltpu.VMEM((H + 2, W + 2, Cin), jnp.bfloat16)],
        compiler_params=pltpu.CompilerParams(
            dimension_semantics=("parallel",),
            vmem_limit_bytes=VMEM_LIMIT_BYTES),
    )(*in_arrays)
    return c, stats


def _bn_scale_shift(stats, gamma, beta, count):
    """Reduce per-sample (sum, sum^2) partials -> folded BN scale/shift, (C,)."""
    total = jnp.sum(stats, axis=0)                     # (2, C)
    mean = total[0] / count
    var = jnp.maximum(total[1] / count - mean * mean, 0.0)
    scale = gamma * jax.lax.rsqrt(var + BN_EPS)
    shift = beta - mean * scale
    return scale.astype(jnp.float32), shift.astype(jnp.float32)


def _bn_act(c, scale, shift, *, spatial):
    """BN affine + ReLU on a lane-dense view of c = (N, H*W, C)."""
    H, W = spatial
    N, _, C = c.shape
    if (H * W * C) % 128 == 0 and 128 % C == 0:
        lanes = 128                 # unmasked vld/vst even when C < 128
    else:
        lanes = C                   # fallback: per-channel lane layout
    rows = (H * W * C) // lanes
    reps = lanes // C

    cv = c.reshape(N, rows, lanes)                      # free contiguous reshape
    scale_l = jnp.tile(scale, reps).reshape(1, lanes)
    shift_l = jnp.tile(shift, reps).reshape(1, lanes)

    out = pl.pallas_call(
        _bn_act_kernel,
        grid=(N,),
        in_specs=[pl.BlockSpec((1, rows, lanes), lambda n: (n, 0, 0)),
                  pl.BlockSpec((1, lanes), lambda n: (0, 0)),
                  pl.BlockSpec((1, lanes), lambda n: (0, 0))],
        out_specs=pl.BlockSpec((1, rows, lanes), lambda n: (n, 0, 0)),
        out_shape=jax.ShapeDtypeStruct((N, rows, lanes), jnp.float32),
        compiler_params=pltpu.CompilerParams(
            dimension_semantics=("parallel",),
            vmem_limit_bytes=VMEM_LIMIT_BYTES),
    )(cv, scale_l, shift_l)
    return out.reshape(N, H, W, C)


def resnet_basic_block_forward(x_nchw, params):
    """ResNet18or34BasicBlock.forward (stride=1, inchannel==outchannel)."""
    # TODO(synk): the stride!=1 / inchannel!=outchannel downsample shortcut
    # (1x1 conv + BN applied to the left-branch output) is not implemented;
    # only the identity-shortcut configuration is supported here.
    # TODO(synk): fuse this layout pass + bf16 cast into the stage-1 kernel.
    x = jnp.transpose(x_nchw, (0, 2, 3, 1)).astype(jnp.bfloat16)   # NCHW->NHWC
    N, H, W, C = x.shape
    count = N * H * W

    w1 = _fold_weight(params["w1"])
    w2 = _fold_weight(params["w2"])

    # Stage 1: conv1 + batch-stat partials; BN1+ReLU is fused into stage 2.
    c1, st1 = _conv3x3_stats(x, w1, spatial=(H, W))
    s1, t1 = _bn_scale_shift(st1, params["gamma1"], params["beta1"], count)

    # Stage 2: (BN1+ReLU fused on the input) -> conv2 + batch-stat partials.
    c2, st2 = _conv3x3_stats(c1, w2, spatial=(H, W),
                             in_scale=s1.reshape(1, C),
                             in_shift=t1.reshape(1, C))
    s2, t2 = _bn_scale_shift(st2, params["gamma2"], params["beta2"], count)

    # Identity residual ("x += shortcut(x)" with identity shortcut => 2*x)
    # folded into the BN2 affine, then ReLU.
    out = _bn_act(c2, 2.0 * s2, 2.0 * t2, spatial=(H, W))

    # TODO(synk): fuse this back-transpose into the BN2 kernel's out_spec.
    return jnp.transpose(out, (0, 3, 1, 2))                         # NHWC->NCHW


# ---------------------------------------------------------------------------
# Reference (pure JAX/XLA, precision-matched to the kernel's bf16 path)
# ---------------------------------------------------------------------------
def _reference_forward(x_nchw, params):
    """Independent lax.conv reference with the same precision choices as the
    kernel: bf16 MXU operands, f32 accumulation, bf16 conv intermediates in
    HBM, batch statistics taken from the f32 accumulator (training-mode BN).
    Conv bias is omitted in both paths (exact no-op under training-mode BN)."""
    def conv3x3(x, w):
        return jax.lax.conv_general_dilated(
            x.astype(jnp.bfloat16), w.astype(jnp.bfloat16),
            window_strides=(1, 1), padding=((1, 1), (1, 1)),
            dimension_numbers=("NCHW", "OIHW", "NCHW"),
            preferred_element_type=jnp.float32)

    def bn(y_acc, g, b):
        mean = jnp.mean(y_acc, axis=(0, 2, 3), keepdims=True)
        var = jnp.mean((y_acc - mean) ** 2, axis=(0, 2, 3), keepdims=True)
        scale = g[None, :, None, None] * jax.lax.rsqrt(var + BN_EPS)
        shift = b[None, :, None, None] - mean * scale
        y_hbm = y_acc.astype(jnp.bfloat16).astype(jnp.float32)   # bf16 round-trip
        return y_hbm * scale + shift

    y1 = jnp.maximum(bn(conv3x3(x_nchw, params["w1"]),
                        params["gamma1"], params["beta1"]), 0.0)
    y2 = bn(conv3x3(y1, params["w2"]), params["gamma2"], params["beta2"])
    y2 = y2 + y2                 # identity shortcut of the left-branch output
    return jnp.maximum(y2, 0.0)


if __name__ == "__main__":
    N, C, H, W = 2, 4, 16, 16          # batch, channels (in == out), spatial
    key = jax.random.PRNGKey(0)
    ks = jax.random.split(key, 7)
    x = jax.random.normal(ks[0], (N, C, H, W), jnp.float32)
    params = {
        "w1": 0.2 * jax.random.normal(ks[1], (C, C, 3, 3), jnp.float32),
        "gamma1": 1.0 + 0.1 * jax.random.normal(ks[2], (C,), jnp.float32),
        "beta1": 0.1 * jax.random.normal(ks[3], (C,), jnp.float32),
        "w2": 0.2 * jax.random.normal(ks[4], (C, C, 3, 3), jnp.float32),
        "gamma2": 1.0 + 0.1 * jax.random.normal(ks[5], (C,), jnp.float32),
        "beta2": 0.1 * jax.random.normal(ks[6], (C,), jnp.float32),
    }
    # Conv biases exist in the PyTorch module but are an exact no-op on the
    # output under training-mode BatchNorm, so they are neither generated nor
    # consumed here (same omission in kernel and reference).

    out = jax.jit(resnet_basic_block_forward)(x, params)
    out = jax.block_until_ready(out)

    ref = _reference_forward(x, params)
    assert out.shape == (N, C, H, W), out.shape
    max_err = float(jnp.max(jnp.abs(out - ref)))
    # Tolerance covers bf16 rounding-boundary disagreements between the
    # lax.conv reference and the im2col MXU path (both f32-accumulated).
    assert jnp.allclose(out, ref, atol=2e-2, rtol=2e-2), max_err

    print("KERNEL_OK")
</pallas_src>

<mosaic_0001>
module attributes {stable_mosaic.version = 11 : i64} {
  func.func @_conv_stats_kernel(%arg0: i32, %arg1: memref<1x16x16x4xbf16, #tpu.memory_space<vmem>>, %arg2: memref<36x4xbf16, #tpu.memory_space<vmem>>, %arg3: memref<1x256x4xbf16, #tpu.memory_space<vmem>>, %arg4: memref<1x2x4xf32, #tpu.memory_space<vmem>>, %arg5: memref<18x18x4xbf16, #tpu.memory_space<vmem>>) attributes {dimension_semantics = [#tpu.dimension_semantics<parallel>], iteration_bounds = array<i64: 2>, scalar_prefetch = 0 : i64, scratch_operands = 1 : i64, tpu.core_type = #tpu.core_type<tc>, window_params = [{transform_indices = @transform_0, window_bounds = array<i64: 1, 16, 16, 4>}, {pipeline_mode = #tpu.pipeline_mode<synchronous>, transform_indices = @transform_1, window_bounds = array<i64: 36, 4>}, {transform_indices = @transform_2, window_bounds = array<i64: 1, 256, 4>}, {transform_indices = @transform_3, window_bounds = array<i64: 1, 2, 4>}]} {
    %c0 = arith.constant 0 : index
    %c0_0 = arith.constant 0 : index
    %c0_1 = arith.constant 0 : index
    %c0_2 = arith.constant 0 : index
    %0 = vector.load %arg1[%c0, %c0_0, %c0_1, %c0_2] : memref<1x16x16x4xbf16, #tpu.memory_space<vmem>>, vector<1x16x16x4xbf16>
    %1 = vector.shape_cast %0 : vector<1x16x16x4xbf16> to vector<16x16x4xbf16>
    %cst = arith.constant 0.000000e+00 : bf16
    %2 = vector.broadcast %cst : bf16 to vector<1x18x4xbf16>
    %c0_3 = arith.constant 0 : index
    %c0_4 = arith.constant 0 : index
    %c0_5 = arith.constant 0 : index
    %3 = vector.load %arg5[%c0_3, %c0_4, %c0_5] : memref<18x18x4xbf16, #tpu.memory_space<vmem>>, vector<1x18x4xbf16>
    tpu.vector_store %arg5[%c0_3, %c0_4, %c0_5], %2 {strides = array<i32>} : memref<18x18x4xbf16, #tpu.memory_space<vmem>>, vector<1x18x4xbf16>,
    %c17 = arith.constant 17 : index
    %c0_6 = arith.constant 0 : index
    %c0_7 = arith.constant 0 : index
    %4 = vector.load %arg5[%c17, %c0_6, %c0_7] : memref<18x18x4xbf16, #tpu.memory_space<vmem>>, vector<1x18x4xbf16>
    tpu.vector_store %arg5[%c17, %c0_6, %c0_7], %2 {strides = array<i32>} : memref<18x18x4xbf16, #tpu.memory_space<vmem>>, vector<1x18x4xbf16>,
    %cst_8 = arith.constant 0.000000e+00 : bf16
    %5 = vector.broadcast %cst_8 : bf16 to vector<16x1x4xbf16>
    %6 = tpu.concatenate %5, %1, %5 in 1 : vector<16x1x4xbf16>, vector<16x16x4xbf16>, vector<16x1x4xbf16> -> vector<16x18x4xbf16>
    %c1 = arith.constant 1 : index
    %c0_9 = arith.constant 0 : index
    %c0_10 = arith.constant 0 : index
    %7 = vector.load %arg5[%c1, %c0_9, %c0_10] : memref<18x18x4xbf16, #tpu.memory_space<vmem>>, vector<16x18x4xbf16>
    tpu.vector_store %arg5[%c1, %c0_9, %c0_10], %6 {strides = array<i32>} : memref<18x18x4xbf16, #tpu.memory_space<vmem>>, vector<16x18x4xbf16>,
    %c0_11 = arith.constant 0 : index
    %c0_12 = arith.constant 0 : index
    %c0_13 = arith.constant 0 : index
    %8 = vector.load %arg5[%c0_11, %c0_12, %c0_13] : memref<18x18x4xbf16, #tpu.memory_space<vmem>>, vector<16x16x4xbf16>
    %c0_14 = arith.constant 0 : index
    %c1_15 = arith.constant 1 : index
    %c0_16 = arith.constant 0 : index
    %9 = vector.load %arg5[%c0_14, %c1_15, %c0_16] : memref<18x18x4xbf16, #tpu.memory_space<vmem>>, vector<16x16x4xbf16>
    %c0_17 = arith.constant 0 : index
    %c2 = arith.constant 2 : index
    %c0_18 = arith.constant 0 : index
    %10 = vector.load %arg5[%c0_17, %c2, %c0_18] : memref<18x18x4xbf16, #tpu.memory_space<vmem>>, vector<16x16x4xbf16>
    %c1_19 = arith.constant 1 : index
    %c0_20 = arith.constant 0 : index
    %c0_21 = arith.constant 0 : index
    %11 = vector.load %arg5[%c1_19, %c0_20, %c0_21] : memref<18x18x4xbf16, #tpu.memory_space<vmem>>, vector<16x16x4xbf16>
    %c1_22 = arith.constant 1 : index
    %c1_23 = arith.constant 1 : index
    %c0_24 = arith.constant 0 : index
    %12 = vector.load %arg5[%c1_22, %c1_23, %c0_24] : memref<18x18x4xbf16, #tpu.memory_space<vmem>>, vector<16x16x4xbf16>
    %c1_25 = arith.constant 1 : index
    %c2_26 = arith.constant 2 : index
    %c0_27 = arith.constant 0 : index
    %13 = vector.load %arg5[%c1_25, %c2_26, %c0_27] : memref<18x18x4xbf16, #tpu.memory_space<vmem>>, vector<16x16x4xbf16>
    %c2_28 = arith.constant 2 : index
    %c0_29 = arith.constant 0 : index
    %c0_30 = arith.constant 0 : index
    %14 = vector.load %arg5[%c2_28, %c0_29, %c0_30] : memref<18x18x4xbf16, #tpu.memory_space<vmem>>, vector<16x16x4xbf16>
    %c2_31 = arith.constant 2 : index
    %c1_32 = arith.constant 1 : index
    %c0_33 = arith.constant 0 : index
    %15 = vector.load %arg5[%c2_31, %c1_32, %c0_33] : memref<18x18x4xbf16, #tpu.memory_space<vmem>>, vector<16x16x4xbf16>
    %c2_34 = arith.constant 2 : index
    %c2_35 = arith.constant 2 : index
    %c0_36 = arith.constant 0 : index
    %16 = vector.load %arg5[%c2_34, %c2_35, %c0_36] : memref<18x18x4xbf16, #tpu.memory_space<vmem>>, vector<16x16x4xbf16>
    %17 = tpu.concatenate %8, %9, %10, %11, %12, %13, %14, %15, %16 in 2 : vector<16x16x4xbf16>, vector<16x16x4xbf16>, vector<16x16x4xbf16>, vector<16x16x4xbf16>, vector<16x16x4xbf16>, vector<16x16x4xbf16>, vector<16x16x4xbf16>, vector<16x16x4xbf16>, vector<16x16x4xbf16> -> vector<16x16x36xbf16>
    %18 = vector.shape_cast %17 : vector<16x16x36xbf16> to vector<256x36xbf16>
    %c0_37 = arith.constant 0 : index
    %c0_38 = arith.constant 0 : index
    %19 = vector.load %arg2[%c0_37, %c0_38] : memref<36x4xbf16, #tpu.memory_space<vmem>>, vector<36x4xbf16>
    %cst_39 = arith.constant dense<0.000000e+00> : vector<256x4xf32>
    %20 = tpu.matmul %18, %19, %cst_39 {dimension_numbers = #tpu.dot_dimension_numbers<[1], [0], [0], [1], [0, 0, 1, 1], [], []>} : vector<256x36xbf16>, vector<36x4xbf16>, vector<256x4xf32> -> vector<256x4xf32>
    %21 = arith.truncf %20 : vector<256x4xf32> to vector<256x4xbf16>
    %c0_40 = arith.constant 0 : index
    %c0_41 = arith.constant 0 : index
    %c0_42 = arith.constant 0 : index
    %22 = vector.load %arg3[%c0_40, %c0_41, %c0_42] : memref<1x256x4xbf16, #tpu.memory_space<vmem>>, vector<1x256x4xbf16>
    %23 = vector.shape_cast %22 : vector<1x256x4xbf16> to vector<256x4xbf16>
    %24 = vector.shape_cast %21 : vector<256x4xbf16> to vector<1x256x4xbf16>
    tpu.vector_store %arg3[%c0_40, %c0_41, %c0_42], %24 {strides = array<i32>} : memref<1x256x4xbf16, #tpu.memory_space<vmem>>, vector<1x256x4xbf16>,
    %cst_43 = arith.constant dense<0.000000e+00> : vector<4xf32>
    %25 = vector.multi_reduction <add>, %20, %cst_43 [0] : vector<256x4xf32> to vector<4xf32>
    %26 = vector.shape_cast %25 : vector<4xf32> to vector<1x4xf32>
    %27 = arith.mulf %20, %20 : vector<256x4xf32>
    %cst_44 = arith.constant dense<0.000000e+00> : vector<4xf32>
    %28 = vector.multi_reduction <add>, %27, %cst_44 [0] : vector<256x4xf32> to vector<4xf32>
    %29 = vector.shape_cast %28 : vector<4xf32> to vector<1x4xf32>
    %30 = tpu.concatenate %26, %29 in 0 : vector<1x4xf32>, vector<1x4xf32> -> vector<2x4xf32>
    %c0_45 = arith.constant 0 : index
    %c0_46 = arith.constant 0 : index
    %c0_47 = arith.constant 0 : index
    %31 = vector.load %arg4[%c0_45, %c0_46, %c0_47] : memref<1x2x4xf32, #tpu.memory_space<vmem>>, vector<1x2x4xf32>
    %32 = vector.shape_cast %31 : vector<1x2x4xf32> to vector<2x4xf32>
    %33 = vector.shape_cast %30 : vector<2x4xf32> to vector<1x2x4xf32>
    tpu.vector_store %arg4[%c0_45, %c0_46, %c0_47], %33 {strides = array<i32>} : memref<1x2x4xf32, #tpu.memory_space<vmem>>, vector<1x2x4xf32>,
    return
  }
  func.func @transform_0(%arg0: i32) -> (i32, i32, i32, i32) {
    %c0_i32 = arith.constant 0 : i32
    %c0_i32_0 = arith.constant 0 : i32
    %c0_i32_1 = arith.constant 0 : i32
    %c0_i32_2 = arith.constant 0 : i32
    return %arg0, %c0_i32, %c0_i32_0, %c0_i32_1 : i32, i32, i32, i32
  }
  func.func @transform_1(%arg0: i32) -> (i32, i32) {
    %c0_i32 = arith.constant 0 : i32
    %c0_i32_0 = arith.constant 0 : i32
    %c0_i32_1 = arith.constant 0 : i32
    return %c0_i32, %c0_i32_0 : i32, i32
  }
  func.func @transform_2(%arg0: i32) -> (i32, i32, i32) {
    %c0_i32 = arith.constant 0 : i32
    %c0_i32_0 = arith.constant 0 : i32
    %c0_i32_1 = arith.constant 0 : i32
    return %arg0, %c0_i32, %c0_i32_0 : i32, i32, i32
  }
  func.func @transform_3(%arg0: i32) -> (i32, i32, i32) {
    %c0_i32 = arith.constant 0 : i32
    %c0_i32_0 = arith.constant 0 : i32
    %c0_i32_1 = arith.constant 0 : i32
    return %arg0, %c0_i32, %c0_i32_0 : i32, i32, i32
  }
}

module attributes {stable_mosaic.version = 11 : i64} {
  func.func @_conv_stats_kernel(%arg0: i32, %arg1: memref<1x256x4xbf16, #tpu.memory_space<vmem>>, %arg2: memref<1x4xf32, #tpu.memory_space<vmem>>, %arg3: memref<1x4xf32, #tpu.memory_space<vmem>>, %arg4: memref<36x4xbf16, #tpu.memory_space<vmem>>, %arg5: memref<1x256x4xbf16, #tpu.memory_space<vmem>>, %arg6: memref<1x2x4xf32, #tpu.memory_space<vmem>>, %arg7: memref<18x18x4xbf16, #tpu.memory_space<vmem>>) attributes {dimension_semantics = [#tpu.dimension_semantics<parallel>], iteration_bounds = array<i64: 2>, scalar_prefetch = 0 : i64, scratch_operands = 1 : i64, tpu.core_type = #tpu.core_type<tc>, window_params = [{transform_indices = @transform_0, window_bounds = array<i64: 1, 256, 4>}, {pipeline_mode = #tpu.pipeline_mode<synchronous>, transform_indices = @transform_1, window_bounds = array<i64: 1, 4>}, {pipeline_mode = #tpu.pipeline_mode<synchronous>, transform_indices = @transform_2, window_bounds = array<i64: 1, 4>}, {pipeline_mode = #tpu.pipeline_mode<synchronous>, transform_indices = @transform_3, window_bounds = array<i64: 36, 4>}, {transform_indices = @transform_4, window_bounds = array<i64: 1, 256, 4>}, {transform_indices = @transform_5, window_bounds = array<i64: 1, 2, 4>}]} {
    %c0 = arith.constant 0 : index
    %c0_0 = arith.constant 0 : index
    %c0_1 = arith.constant 0 : index
    %0 = vector.load %arg1[%c0, %c0_0, %c0_1] : memref<1x256x4xbf16, #tpu.memory_space<vmem>>, vector<1x256x4xbf16>
    %1 = vector.shape_cast %0 : vector<1x256x4xbf16> to vector<256x4xbf16>
    %2 = arith.extf %1 : vector<256x4xbf16> to vector<256x4xf32>
    %c0_2 = arith.constant 0 : index
    %c0_3 = arith.constant 0 : index
    %3 = vector.load %arg2[%c0_2, %c0_3] : memref<1x4xf32, #tpu.memory_space<vmem>>, vector<1x4xf32>
    %4 = vector.broadcast %3 : vector<1x4xf32> to vector<256x4xf32>
    %5 = arith.mulf %2, %4 : vector<256x4xf32>
    %c0_4 = arith.constant 0 : index
    %c0_5 = arith.constant 0 : index
    %6 = vector.load %arg3[%c0_4, %c0_5] : memref<1x4xf32, #tpu.memory_space<vmem>>, vector<1x4xf32>
    %7 = vector.broadcast %6 : vector<1x4xf32> to vector<256x4xf32>
    %8 = arith.addf %5, %7 : vector<256x4xf32>
    %cst = arith.constant 0.000000e+00 : f32
    %9 = vector.broadcast %cst : f32 to vector<256x4xf32>
    %10 = arith.maximumf %8, %9 : vector<256x4xf32>
    %11 = arith.truncf %10 : vector<256x4xf32> to vector<256x4xbf16>
    %12 = vector.shape_cast %11 : vector<256x4xbf16> to vector<16x16x4xbf16>
    %cst_6 = arith.constant 0.000000e+00 : bf16
    %13 = vector.broadcast %cst_6 : bf16 to vector<1x18x4xbf16>
    %c0_7 = arith.constant 0 : index
    %c0_8 = arith.constant 0 : index
    %c0_9 = arith.constant 0 : index
    %14 = vector.load %arg7[%c0_7, %c0_8, %c0_9] : memref<18x18x4xbf16, #tpu.memory_space<vmem>>, vector<1x18x4xbf16>
    tpu.vector_store %arg7[%c0_7, %c0_8, %c0_9], %13 {strides = array<i32>} : memref<18x18x4xbf16, #tpu.memory_space<vmem>>, vector<1x18x4xbf16>,
    %c17 = arith.constant 17 : index
    %c0_10 = arith.constant 0 : index
    %c0_11 = arith.constant 0 : index
    %15 = vector.load %arg7[%c17, %c0_10, %c0_11] : memref<18x18x4xbf16, #tpu.memory_space<vmem>>, vector<1x18x4xbf16>
    tpu.vector_store %arg7[%c17, %c0_10, %c0_11], %13 {strides = array<i32>} : memref<18x18x4xbf16, #tpu.memory_space<vmem>>, vector<1x18x4xbf16>,
    %cst_12 = arith.constant 0.000000e+00 : bf16
    %16 = vector.broadcast %cst_12 : bf16 to vector<16x1x4xbf16>
    %17 = tpu.concatenate %16, %12, %16 in 1 : vector<16x1x4xbf16>, vector<16x16x4xbf16>, vector<16x1x4xbf16> -> vector<16x18x4xbf16>
    %c1 = arith.constant 1 : index
    %c0_13 = arith.constant 0 : index
    %c0_14 = arith.constant 0 : index
    %18 = vector.load %arg7[%c1, %c0_13, %c0_14] : memref<18x18x4xbf16, #tpu.memory_space<vmem>>, vector<16x18x4xbf16>
    tpu.vector_store %arg7[%c1, %c0_13, %c0_14], %17 {strides = array<i32>} : memref<18x18x4xbf16, #tpu.memory_space<vmem>>, vector<16x18x4xbf16>,
    %c0_15 = arith.constant 0 : index
    %c0_16 = arith.constant 0 : index
    %c0_17 = arith.constant 0 : index
    %19 = vector.load %arg7[%c0_15, %c0_16, %c0_17] : memref<18x18x4xbf16, #tpu.memory_space<vmem>>, vector<16x16x4xbf16>
    %c0_18 = arith.constant 0 : index
    %c1_19 = arith.constant 1 : index
    %c0_20 = arith.constant 0 : index
    %20 = vector.load %arg7[%c0_18, %c1_19, %c0_20] : memref<18x18x4xbf16, #tpu.memory_space<vmem>>, vector<16x16x4xbf16>
    %c0_21 = arith.constant 0 : index
    %c2 = arith.constant 2 : index
    %c0_22 = arith.constant 0 : index
    %21 = vector.load %arg7[%c0_21, %c2, %c0_22] : memref<18x18x4xbf16, #tpu.memory_space<vmem>>, vector<16x16x4xbf16>
    %c1_23 = arith.constant 1 : index
    %c0_24 = arith.constant 0 : index
    %c0_25 = arith.constant 0 : index
    %22 = vector.load %arg7[%c1_23, %c0_24, %c0_25] : memref<18x18x4xbf16, #tpu.memory_space<vmem>>, vector<16x16x4xbf16>
    %c1_26 = arith.constant 1 : index
    %c1_27 = arith.constant 1 : index
    %c0_28 = arith.constant 0 : index
    %23 = vector.load %arg7[%c1_26, %c1_27, %c0_28] : memref<18x18x4xbf16, #tpu.memory_space<vmem>>, vector<16x16x4xbf16>
    %c1_29 = arith.constant 1 : index
    %c2_30 = arith.constant 2 : index
    %c0_31 = arith.constant 0 : index
    %24 = vector.load %arg7[%c1_29, %c2_30, %c0_31] : memref<18x18x4xbf16, #tpu.memory_space<vmem>>, vector<16x16x4xbf16>
    %c2_32 = arith.constant 2 : index
    %c0_33 = arith.constant 0 : index
    %c0_34 = arith.constant 0 : index
    %25 = vector.load %arg7[%c2_32, %c0_33, %c0_34] : memref<18x18x4xbf16, #tpu.memory_space<vmem>>, vector<16x16x4xbf16>
    %c2_35 = arith.constant 2 : index
    %c1_36 = arith.constant 1 : index
    %c0_37 = arith.constant 0 : index
    %26 = vector.load %arg7[%c2_35, %c1_36, %c0_37] : memref<18x18x4xbf16, #tpu.memory_space<vmem>>, vector<16x16x4xbf16>
    %c2_38 = arith.constant 2 : index
    %c2_39 = arith.constant 2 : index
    %c0_40 = arith.constant 0 : index
    %27 = vector.load %arg7[%c2_38, %c2_39, %c0_40] : memref<18x18x4xbf16, #tpu.memory_space<vmem>>, vector<16x16x4xbf16>
    %28 = tpu.concatenate %19, %20, %21, %22, %23, %24, %25, %26, %27 in 2 : vector<16x16x4xbf16>, vector<16x16x4xbf16>, vector<16x16x4xbf16>, vector<16x16x4xbf16>, vector<16x16x4xbf16>, vector<16x16x4xbf16>, vector<16x16x4xbf16>, vector<16x16x4xbf16>, vector<16x16x4xbf16> -> vector<16x16x36xbf16>
    %29 = vector.shape_cast %28 : vector<16x16x36xbf16> to vector<256x36xbf16>
    %c0_41 = arith.constant 0 : index
    %c0_42 = arith.constant 0 : index
    %30 = vector.load %arg4[%c0_41, %c0_42] : memref<36x4xbf16, #tpu.memory_space<vmem>>, vector<36x4xbf16>
    %cst_43 = arith.constant dense<0.000000e+00> : vector<256x4xf32>
    %31 = tpu.matmul %29, %30, %cst_43 {dimension_numbers = #tpu.dot_dimension_numbers<[1], [0], [0], [1], [0, 0, 1, 1], [], []>} : vector<256x36xbf16>, vector<36x4xbf16>, vector<256x4xf32> -> vector<256x4xf32>
    %32 = arith.truncf %31 : vector<256x4xf32> to vector<256x4xbf16>
    %c0_44 = arith.constant 0 : index
    %c0_45 = arith.constant 0 : index
    %c0_46 = arith.constant 0 : index
    %33 = vector.load %arg5[%c0_44, %c0_45, %c0_46] : memref<1x256x4xbf16, #tpu.memory_space<vmem>>, vector<1x256x4xbf16>
    %34 = vector.shape_cast %33 : vector<1x256x4xbf16> to vector<256x4xbf16>
    %35 = vector.shape_cast %32 : vector<256x4xbf16> to vector<1x256x4xbf16>
    tpu.vector_store %arg5[%c0_44, %c0_45, %c0_46], %35 {strides = array<i32>} : memref<1x256x4xbf16, #tpu.memory_space<vmem>>, vector<1x256x4xbf16>,
    %cst_47 = arith.constant dense<0.000000e+00> : vector<4xf32>
    %36 = vector.multi_reduction <add>, %31, %cst_47 [0] : vector<256x4xf32> to vector<4xf32>
    %37 = vector.shape_cast %36 : vector<4xf32> to vector<1x4xf32>
    %38 = arith.mulf %31, %31 : vector<256x4xf32>
    %cst_48 = arith.constant dense<0.000000e+00> : vector<4xf32>
    %39 = vector.multi_reduction <add>, %38, %cst_48 [0] : vector<256x4xf32> to vector<4xf32>
    %40 = vector.shape_cast %39 : vector<4xf32> to vector<1x4xf32>
    %41 = tpu.concatenate %37, %40 in 0 : vector<1x4xf32>, vector<1x4xf32> -> vector<2x4xf32>
    %c0_49 = arith.constant 0 : index
    %c0_50 = arith.constant 0 : index
    %c0_51 = arith.constant 0 : index
    %42 = vector.load %arg6[%c0_49, %c0_50, %c0_51] : memref<1x2x4xf32, #tpu.memory_space<vmem>>, vector<1x2x4xf32>
    %43 = vector.shape_cast %42 : vector<1x2x4xf32> to vector<2x4xf32>
    %44 = vector.shape_cast %41 : vector<2x4xf32> to vector<1x2x4xf32>
    tpu.vector_store %arg6[%c0_49, %c0_50, %c0_51], %44 {strides = array<i32>} : memref<1x2x4xf32, #tpu.memory_space<vmem>>, vector<1x2x4xf32>,
    return
  }
  func.func @transform_0(%arg0: i32) -> (i32, i32, i32) {
    %c0_i32 = arith.constant 0 : i32
    %c0_i32_0 = arith.constant 0 : i32
    %c0_i32_1 = arith.constant 0 : i32
    return %arg0, %c0_i32, %c0_i32_0 : i32, i32, i32
  }
  func.func @transform_1(%arg0: i32) -> (i32, i32) {
    %c0_i32 = arith.constant 0 : i32
    %c0_i32_0 = arith.constant 0 : i32
    %c0_i32_1 = arith.constant 0 : i32
    return %c0_i32, %c0_i32_0 : i32, i32
  }
  func.func @transform_2(%arg0: i32) -> (i32, i32) {
    %c0_i32 = arith.constant 0 : i32
    %c0_i32_0 = arith.constant 0 : i32
    %c0_i32_1 = arith.constant 0 : i32
    return %c0_i32, %c0_i32_0 : i32, i32
  }
  func.func @transform_3(%arg0: i32) -> (i32, i32) {
    %c0_i32 = arith.constant 0 : i32
    %c0_i32_0 = arith.constant 0 : i32
    %c0_i32_1 = arith.constant 0 : i32
    return %c0_i32, %c0_i32_0 : i32, i32
  }
  func.func @transform_4(%arg0: i32) -> (i32, i32, i32) {
    %c0_i32 = arith.constant 0 : i32
    %c0_i32_0 = arith.constant 0 : i32
    %c0_i32_1 = arith.constant 0 : i32
    return %arg0, %c0_i32, %c0_i32_0 : i32, i32, i32
  }
  func.func @transform_5(%arg0: i32) -> (i32, i32, i32) {
    %c0_i32 = arith.constant 0 : i32
    %c0_i32_0 = arith.constant 0 : i32
    %c0_i32_1 = arith.constant 0 : i32
    return %arg0, %c0_i32, %c0_i32_0 : i32, i32, i32
  }
}

module attributes {stable_mosaic.version = 11 : i64} {
  func.func @_bn_act_kernel(%arg0: i32, %arg1: memref<1x8x128xbf16, #tpu.memory_space<vmem>>, %arg2: memref<1x128xf32, #tpu.memory_space<vmem>>, %arg3: memref<1x128xf32, #tpu.memory_space<vmem>>, %arg4: memref<1x8x128xf32, #tpu.memory_space<vmem>>) attributes {dimension_semantics = [#tpu.dimension_semantics<parallel>], iteration_bounds = array<i64: 2>, scalar_prefetch = 0 : i64, scratch_operands = 0 : i64, tpu.core_type = #tpu.core_type<tc>, window_params = [{transform_indices = @transform_0, window_bounds = array<i64: 1, 8, 128>}, {pipeline_mode = #tpu.pipeline_mode<synchronous>, transform_indices = @transform_1, window_bounds = array<i64: 1, 128>}, {pipeline_mode = #tpu.pipeline_mode<synchronous>, transform_indices = @transform_2, window_bounds = array<i64: 1, 128>}, {transform_indices = @transform_3, window_bounds = array<i64: 1, 8, 128>}]} {
    %c0 = arith.constant 0 : index
    %c0_0 = arith.constant 0 : index
    %c0_1 = arith.constant 0 : index
    %0 = vector.load %arg1[%c0, %c0_0, %c0_1] : memref<1x8x128xbf16, #tpu.memory_space<vmem>>, vector<1x8x128xbf16>
    %1 = arith.extf %0 : vector<1x8x128xbf16> to vector<1x8x128xf32>
    %c0_2 = arith.constant 0 : index
    %c0_3 = arith.constant 0 : index
    %2 = vector.load %arg2[%c0_2, %c0_3] : memref<1x128xf32, #tpu.memory_space<vmem>>, vector<1x128xf32>
    %3 = vector.shape_cast %2 : vector<1x128xf32> to vector<1x1x128xf32>
    %4 = vector.broadcast %3 : vector<1x1x128xf32> to vector<1x8x128xf32>
    %5 = arith.mulf %1, %4 : vector<1x8x128xf32>
    %c0_4 = arith.constant 0 : index
    %c0_5 = arith.constant 0 : index
    %6 = vector.load %arg3[%c0_4, %c0_5] : memref<1x128xf32, #tpu.memory_space<vmem>>, vector<1x128xf32>
    %7 = vector.shape_cast %6 : vector<1x128xf32> to vector<1x1x128xf32>
    %8 = vector.broadcast %7 : vector<1x1x128xf32> to vector<1x8x128xf32>
    %9 = arith.addf %5, %8 : vector<1x8x128xf32>
    %cst = arith.constant 0.000000e+00 : f32
    %10 = vector.broadcast %cst : f32 to vector<1x8x128xf32>
    %11 = arith.maximumf %9, %10 : vector<1x8x128xf32>
    %c0_6 = arith.constant 0 : index
    %c0_7 = arith.constant 0 : index
    %c0_8 = arith.constant 0 : index
    %12 = vector.load %arg4[%c0_6, %c0_7, %c0_8] : memref<1x8x128xf32, #tpu.memory_space<vmem>>, vector<1x8x128xf32>
    tpu.vector_store %arg4[%c0_6, %c0_7, %c0_8], %11 {strides = array<i32>} : memref<1x8x128xf32, #tpu.memory_space<vmem>>, vector<1x8x128xf32>,
    return
  }
  func.func @transform_0(%arg0: i32) -> (i32, i32, i32) {
    %c0_i32 = arith.constant 0 : i32
    %c0_i32_0 = arith.constant 0 : i32
    %c0_i32_1 = arith.constant 0 : i32
    return %arg0, %c0_i32, %c0_i32_0 : i32, i32, i32
  }
  func.func @transform_1(%arg0: i32) -> (i32, i32) {
    %c0_i32 = arith.constant 0 : i32
    %c0_i32_0 = arith.constant 0 : i32
    %c0_i32_1 = arith.constant 0 : i32
    return %c0_i32, %c0_i32_0 : i32, i32
  }
  func.func @transform_2(%arg0: i32) -> (i32, i32) {
    %c0_i32 = arith.constant 0 : i32
    %c0_i32_0 = arith.constant 0 : i32
    %c0_i32_1 = arith.constant 0 : i32
    return %c0_i32, %c0_i32_0 : i32, i32
  }
  func.func @transform_3(%arg0: i32) -> (i32, i32, i32) {
    %c0_i32 = arith.constant 0 : i32
    %c0_i32_0 = arith.constant 0 : i32
    %c0_i32_1 = arith.constant 0 : i32
    return %arg0, %c0_i32, %c0_i32_0 : i32, i32, i32
  }
}

</mosaic_0001>

<bundles_post_ra>
// kernel: tile.13
= control target key start
LH: loop header
LB: loop body
LE: loop exit
PB: predicated region body
PF: predicated region fallthrough
CT: control target
= control target key end

     0   :  { %s40_s0 = inlined_call_operand.vmem [shape: f32[4], index: 0, kind: input, shape index: {}]   ;;  %s41_s1 = inlined_call_operand.vmem [shape: f32[32,4], index: 1, kind: output, shape index: {}]  }
   0x1   :  { %v4_v0 = vld [vmem:[%s40_s0] ss:$0 sm:$0xff] }
   0x2   :  { %5 = vst [vmem:[%s41_s1] sm:$0xff] %v4_v0  ;;  %12 = vst [vmem:[%s41_s1 + $0x8] sm:$0xff] %v4_v0 }
   0x3   :  { %13 = vst [vmem:[%s41_s1 + $0x10] sm:$0xff] %v4_v0  ;;  %14 = vst [vmem:[%s41_s1 + $0x18] sm:$0xff] %v4_v0 }

// kernel: tile.14
= control target key start
LH: loop header
LB: loop body
LE: loop exit
PB: predicated region body
PF: predicated region fallthrough
CT: control target
= control target key end

     0   :  { %s259_s10 = smov 124   ;;  %s260_s11 = smov 116   ;;  %vm3_vm0 = vcmask 31744   ;;  %vm9_vm1 = vcmask 1048544   ;;  %vm15_vm2 = vcmask 1015744   ;;  %vm21_vm3 = vcmask 982944   ;;  %s399_s0 = inlined_call_operand.vmem [shape: f32[32,4], index: 0, kind: input, shape index: {}]   ;;  %s400_s1 = inlined_call_operand.vmem [shape: f32[1,128], index: 1, kind: output, shape index: {}]  }
   0x1   :  { %v197_v0 = vld [vmem:[%s399_s0 + $0x1f] sm:$0x1]   ;;  %v199_v1 = vld [vmem:[%s399_s0 + $0x1d] sm:$0x1]   ;;  %v198_v2 = vld [vmem:[%s399_s0 + $0x1e] sm:$0x1]  }
   0x2   :  { %7 = vrot.lane.b32.xlu0 %v197_v0, %s259_s10  ;;  %19 = vrot.lane.b32.xlu1 %v199_v1, %s260_s11  ;;  %v200_v3 = vld [vmem:[%s399_s0 + $0x1c] sm:$0x1]   ;;  %s261_s16 = smov 120   ;;  %s262_s17 = smov 112   ;;  %v201_v4 = vld [vmem:[%s399_s0 + $0x1b] sm:$0x1]  }
   0x3   :  { %v202_v5 = vld [vmem:[%s399_s0 + $0x1a] sm:$0x1]   ;;  %s263_s22 = smov 108   ;;  %s264_s23 = smov 104   ;;  %v203_v6 = vld [vmem:[%s399_s0 + $0x19] sm:$0x1]  }
   0x4   :  { %v204_v7 = vld [vmem:[%s399_s0 + $0x18] sm:$0x1]   ;;  %s265_s28 = smov 100   ;;  %s266_s29 = smov 96   ;;  %v205_v8 = vld [vmem:[%s399_s0 + $0x17] sm:$0x1]  }
   0x5   :  { %v206_v9 = vld [vmem:[%s399_s0 + $0x16] sm:$0x1]   ;;  %v2_v10 = vld [vmem:[%s399_s0] sm:$0x1]   ;;  %s267_s7 = smov 92   ;;  %s268_s8 = smov 88  }
   0x6   :  { %13 = vrot.lane.b32.xlu0 %v198_v2, %s261_s16  ;;  %25 = vrot.lane.b32.xlu1 %v200_v3, %s262_s17  ;;  %4 = vst.msk [vmem:[#allocation0] sm:$0x1] %vm3_vm0, %v2_v10   ;;  %v207_v11 = vld [vmem:[%s399_s0 + $0x15] sm:$0x1]   ;;  %v208_v12 = vld [vmem:[%s399_s0 + $0x14] sm:$0x1]  }
   0x7   :  { %s269_s13 = smov 84   ;;  %s270_s14 = smov 80   ;;  %v209_v13 = vld [vmem:[%s399_s0 + $0x13] sm:$0x1]   ;;  %v210_v14 = vld [vmem:[%s399_s0 + $0x12] sm:$0x1]  }
   0x8   :  { %s271_s19 = smov 76   ;;  %s272_s20 = smov 72   ;;  %v211_v15 = vld [vmem:[%s399_s0 + $0x11] sm:$0x1]   ;;  %v212_v16 = vld [vmem:[%s399_s0 + $0x10] sm:$0x1]  }
   0x9   :  { %s273_s25 = smov 68   ;;  %s274_s26 = smov 64   ;;  %v213_v17 = vld [vmem:[%s399_s0 + $0xf] sm:$0x1]   ;;  %v214_v18 = vld [vmem:[%s399_s0 + $0xe] sm:$0x1]  }
   0xa   :  { %31 = vrot.lane.b32.xlu0 %v201_v4, %s263_s22  ;;  %37 = vrot.lane.b32.xlu1 %v202_v5, %s264_s23  ;;  %s275_s2 = smov 60   ;;  %s276_s3 = smov 56   ;;  %v215_v19 = vld [vmem:[%s399_s0 + $0xd] sm:$0x1]   ;;  %v216_v20 = vld [vmem:[%s399_s0 + $0xc] sm:$0x1]  }
   0xb   :  { %s278_s9 = smov 48   ;;  %v217_v21 = vld [vmem:[%s399_s0 + $0xb] sm:$0x1]   ;;  %v218_v22 = vld [vmem:[%s399_s0 + $0xa] sm:$0x1]   ;;  %s280_s15 = smov 40  }
   0xc   :  { %v219_v23 = vld [vmem:[%s399_s0 + $0x9] sm:$0x1]   ;;  %v220_v24 = vld [vmem:[%s399_s0 + $0x8] sm:$0x1]   ;;  %s282_s21 = smov 32   ;;  %s284_s27 = smov 24  }
   0xd   :  { %v221_v25 = vld [vmem:[%s399_s0 + $0x7] sm:$0x1]   ;;  %v222_v26 = vld [vmem:[%s399_s0 + $0x6] sm:$0x1]   ;;  %v223_v27 = vld [vmem:[%s399_s0 + $0x5] sm:$0x1]  }
   0xe   :  { %43 = vrot.lane.b32.xlu0 %v203_v6, %s265_s28  ;;  %49 = vrot.lane.b32.xlu1 %v204_v7, %s266_s29  ;;  %v224_v28 = vld [vmem:[%s399_s0 + $0x4] sm:$0x1]   ;;  %s286_s4 = smov 16   ;;  %v225_v29 = vld [vmem:[%s399_s0 + $0x3] sm:$0x1]   ;;  %s288_s10 = smov 8  }
   0xf   :  { %v226_v30 = vld [vmem:[%s399_s0 + $0x2] sm:$0x1]   ;;  %v227_v31 = vld [vmem:[%s399_s0 + $0x1] sm:$0x1]   ;;  %s289_s0 = smov 4   ;;  %vm27_vm4 = vcmask 950144  }
  0x10   :  { %vm33_vm5 = vcmask 917344   ;;  %vm39_vm6 = vcmask 884544   ;;  %vm45_vm7 = vcmask 851744   ;;  %vm51_vm8 = vcmask 818944  }
  0x11   :  { %vm57_vm9 = vcmask 786144   ;;  %vm63_vm10 = vcmask 753344   ;;  %vm69_vm11 = vcmask 720544   ;;  %vm75_vm12 = vcmask 687744  }
  0x12   :  { %55 = vrot.lane.b32.xlu0 %v205_v8, %s267_s7  ;;  %61 = vrot.lane.b32.xlu1 %v206_v9, %s268_s8  ;;  %s277_s8 = smov 52   ;;  %vm81_vm13 = vcmask 654944   ;;  %vm87_vm14 = vcmask 622144   ;;  %vm93_vm15 = vcmask 589344   ;;  %vm99_vm0 = vcmask 556544  }
  0x16   :  { %67 = vrot.lane.b32.xlu0 %v207_v11, %s269_s13  ;;  %73 = vrot.lane.b32.xlu1 %v208_v12, %s270_s14  ;;  %s279_s14 = smov 44  }
  0x1a   :  { %79 = vrot.lane.b32.xlu0 %v209_v13, %s271_s19  ;;  %85 = vrot.lane.b32.xlu1 %v210_v14, %s272_s20  ;;  %s281_s20 = smov 36  }
  0x1e   :  { %91 = vrot.lane.b32.xlu0 %v211_v15, %s273_s25  ;;  %97 = vrot.lane.b32.xlu1 %v212_v16, %s274_s26  ;;  %s283_s26 = smov 28  }
  0x22   :  { %103 = vrot.lane.b32.xlu0 %v213_v17, %s275_s2  ;;  %109 = vrot.lane.b32.xlu1 %v214_v18, %s276_s3  ;;  %s285_s3 = smov 20  }
  0x26   :  { %115 = vrot.lane.b32.xlu0 %v215_v19, %s277_s8  ;;  %121 = vrot.lane.b32.xlu1 %v216_v20, %s278_s9  ;;  %s287_s9 = smov 12  }
  0x2a   :  { %127 = vrot.lane.b32.xlu0 %v217_v21, %s279_s14  ;;  %133 = vrot.lane.b32.xlu1 %v218_v22, %s280_s15 }
  0x2e   :  { %139 = vrot.lane.b32.xlu0 %v219_v23, %s281_s20  ;;  %145 = vrot.lane.b32.xlu1 %v220_v24, %s282_s21 }
  0x32   :  { %151 = vrot.lane.b32.xlu0 %v221_v25, %s283_s26  ;;  %157 = vrot.lane.b32.xlu1 %v222_v26, %s284_s27 }
  0x36   :  { %163 = vrot.lane.b32.xlu0 %v223_v27, %s285_s3  ;;  %169 = vrot.lane.b32.xlu1 %v224_v28, %s286_s4 }
  0x3a   :  { %175 = vrot.lane.b32.xlu0 %v225_v29, %s287_s9  ;;  %181 = vrot.lane.b32.xlu1 %v226_v30, %s288_s10 }
  0x3e   :  { %187 = vrot.lane.b32.xlu0 %v227_v31, %s289_s0 }
  0x74   :  { %v8_v32 = vpop.permute.xlu0 %7   ;;  %v20_v33 = vpop.permute.xlu1 %19  }
  0x75   :  { %10 = vst.msk [vmem:[#allocation0] sm:$0x1] %vm9_vm1, %v8_v32   ;;  %vm105_vm1 = vcmask 523744  }
  0x78   :  { %v14_v34 = vpop.permute.xlu0 %13   ;;  %v26_v35 = vpop.permute.xlu1 %25  }
  0x79   :  { %16 = vst.msk [vmem:[#allocation0] sm:$0x1] %vm15_vm2, %v14_v34   ;;  %vm111_vm2 = vcmask 490944  }
  0x7a   :  { %22 = vst.msk [vmem:[#allocation0] sm:$0x1] %vm21_vm3, %v20_v33   ;;  %vm117_vm3 = vcmask 458144  }
  0x7b   :  { %28 = vst.msk [vmem:[#allocation0] sm:$0x1] %vm27_vm4, %v26_v35   ;;  %vm123_vm4 = vcmask 425344  }
  0x7c   :  { %v32_v36 = vpop.permute.xlu0 %31   ;;  %v38_v37 = vpop.permute.xlu1 %37  }
  0x7d   :  { %34 = vst.msk [vmem:[#allocation0] sm:$0x1] %vm33_vm5, %v32_v36   ;;  %vm129_vm5 = vcmask 392544  }
  0x7e   :  { %40 = vst.msk [vmem:[#allocation0] sm:$0x1] %vm39_vm6, %v38_v37   ;;  %vm135_vm6 = vcmask 359744  }
  0x80   :  { %v44_v38 = vpop.permute.xlu0 %43   ;;  %v50_v39 = vpop.permute.xlu1 %49  }
  0x81   :  { %46 = vst.msk [vmem:[#allocation0] sm:$0x1] %vm45_vm7, %v44_v38   ;;  %vm141_vm7 = vcmask 326944  }
  0x82   :  { %52 = vst.msk [vmem:[#allocation0] sm:$0x1] %vm51_vm8, %v50_v39   ;;  %vm147_vm8 = vcmask 294144  }
  0x84   :  { %v56_v40 = vpop.permute.xlu0 %55   ;;  %v62_v41 = vpop.permute.xlu1 %61  }
  0x85   :  { %58 = vst.msk [vmem:[#allocation0] sm:$0x1] %vm57_vm9, %v56_v40   ;;  %vm153_vm9 = vcmask 261344  }
  0x86   :  { %64 = vst.msk [vmem:[#allocation0] sm:$0x1] %vm63_vm10, %v62_v41   ;;  %vm159_vm10 = vcmask 228544  }
  0x88   :  { %v68_v42 = vpop.permute.xlu0 %67   ;;  %v74_v43 = vpop.permute.xlu1 %73  }
  0x89   :  { %70 = vst.msk [vmem:[#allocation0] sm:$0x1] %vm69_vm11, %v68_v42   ;;  %vm165_vm11 = vcmask 195744  }
  0x8a   :  { %76 = vst.msk [vmem:[#allocation0] sm:$0x1] %vm75_vm12, %v74_v43   ;;  %vm171_vm12 = vcmask 162944  }
  0x8c   :  { %v80_v44 = vpop.permute.xlu0 %79   ;;  %v86_v45 = vpop.permute.xlu1 %85  }
  0x8d   :  { %82 = vst.msk [vmem:[#allocation0] sm:$0x1] %vm81_vm13, %v80_v44   ;;  %vm177_vm13 = vcmask 130144  }
  0x8e   :  { %88 = vst.msk [vmem:[#allocation0] sm:$0x1] %vm87_vm14, %v86_v45   ;;  %vm183_vm14 = vcmask 97344  }
  0x90   :  { %v92_v46 = vpop.permute.xlu0 %91   ;;  %v98_v47 = vpop.permute.xlu1 %97  }
  0x91   :  { %94 = vst.msk [vmem:[#allocation0] sm:$0x1] %vm93_vm15, %v92_v46   ;;  %vm189_vm15 = vcmask 64544  }
  0x92   :  { %100 = vst.msk [vmem:[#allocation0] sm:$0x1] %vm99_vm0, %v98_v47  }
  0x94   :  { %v104_v48 = vpop.permute.xlu0 %103   ;;  %v110_v49 = vpop.permute.xlu1 %109  }
  0x95   :  { %106 = vst.msk [vmem:[#allocation0] sm:$0x1] %vm105_vm1, %v104_v48  }
  0x96   :  { %112 = vst.msk [vmem:[#allocation0] sm:$0x1] %vm111_vm2, %v110_v49  }
  0x98   :  { %v116_v50 = vpop.permute.xlu0 %115   ;;  %v122_v51 = vpop.permute.xlu1 %121  }
  0x99   :  { %118 = vst.msk [vmem:[#allocation0] sm:$0x1] %vm117_vm3, %v116_v50  }
  0x9a   :  { %124 = vst.msk [vmem:[#allocation0] sm:$0x1] %vm123_vm4, %v122_v51  }
  0x9c   :  { %v128_v52 = vpop.permute.xlu0 %127   ;;  %v134_v53 = vpop.permute.xlu1 %133  }
  0x9d   :  { %130 = vst.msk [vmem:[#allocation0] sm:$0x1] %vm129_vm5, %v128_v52  }
  0x9e   :  { %136 = vst.msk [vmem:[#allocation0] sm:$0x1] %vm135_vm6, %v134_v53  }
  0xa0   :  { %v140_v54 = vpop.permute.xlu0 %139   ;;  %v146_v55 = vpop.permute.xlu1 %145  }
  0xa1   :  { %142 = vst.msk [vmem:[#allocation0] sm:$0x1] %vm141_vm7, %v140_v54  }
  0xa2   :  { %148 = vst.msk [vmem:[#allocation0] sm:$0x1] %vm147_vm8, %v146_v55  }
  0xa4   :  { %v152_v56 = vpop.permute.xlu0 %151   ;;  %v158_v57 = vpop.permute.xlu1 %157  }
  0xa5   :  { %154 = vst.msk [vmem:[#allocation0] sm:$0x1] %vm153_vm9, %v152_v56  }
  0xa6   :  { %160 = vst.msk [vmem:[#allocation0] sm:$0x1] %vm159_vm10, %v158_v57  }
  0xa8   :  { %v164_v58 = vpop.permute.xlu0 %163   ;;  %v170_v59 = vpop.permute.xlu1 %169  }
  0xa9   :  { %166 = vst.msk [vmem:[#allocation0] sm:$0x1] %vm165_vm11, %v164_v58  }
  0xaa   :  { %172 = vst.msk [vmem:[#allocation0] sm:$0x1] %vm171_vm12, %v170_v59  }
  0xac   :  { %v176_v60 = vpop.permute.xlu0 %175   ;;  %v182_v61 = vpop.permute.xlu1 %181  }
  0xad   :  { %178 = vst.msk [vmem:[#allocation0] sm:$0x1] %vm177_vm13, %v176_v60  }
  0xae   :  { %184 = vst.msk [vmem:[#allocation0] sm:$0x1] %vm183_vm14, %v182_v61  }
  0xb0   :  { %v188_v62 = vpop.permute.xlu0 %187  }
  0xb1   :  { %190 = vst.msk [vmem:[#allocation0] sm:$0x1] %vm189_vm15, %v188_v62  }
  0xb8   :  { %v194_v63 = vld [vmem:[#allocation0] sm:$0x1] }
  0xb9   :  { %196 = vst [vmem:[%s400_s1] sm:$0x1] %v194_v63 }

// kernel: resnet_basic_block_forward.5
= control target key start
LH: loop header
LB: loop body
LE: loop exit
PB: predicated region body
PF: predicated region fallthrough
CT: control target
= control target key end

     0   :  { %s262_s12 = smov 0   ;;  %s298_s0 = inlined_call_operand.vmem [shape: bf16[2,8,128], index: 0, kind: input, shape index: {}]   ;;  %s299_s1 = inlined_call_operand.vmem [shape: f32[1,128], index: 1, kind: input, shape index: {}]   ;;  %s300_s2 = inlined_call_operand.vmem [shape: f32[1,128], index: 2, kind: input, shape index: {}]   ;;  %s301_s3 = inlined_call_operand.vmem [shape: f32[2,8,128], index: 3, kind: output, shape index: {}]  }
   0x1 LB: > { %s239_s13 = sadd.s32 4294967295, %s264_s12   ;;  %p243_p0 = scmp.ge.s32.totalorder %s264_s12, 1  ;;  %s264_s12 = sphi %s262_s12, %s13_s12  }
   0x2   : > { %p136_p1 = scmp.lt.s32.totalorder %s264_s12, 3 }
   0x4   : > { %p137_p2 = pnand %p243_p0, %p136_p1 }
   0x5   : > { %p158_p3 = scmp.lt.s32.totalorder (!%p137_p2), %s239_s13, 1  ;;  %v246_v1 = vld [vmem:[%s299_s1] ss:$0 sm:$0xff] (!%p137_p2) }
   0x6   : > { %140 = sbr.rel (%p137_p2) target bundleno = 26 (0x1a), region = 32  ;;  %v247_v3 = vld [vmem:[%s300_s2] ss:$0 sm:$0xff] (!%p137_p2) }
   0xd   : > { %s303_s13 = smov (!%p158_p3, %s239_s13), 1 }
   0xe   : > { %s244_s14 = sshll.u32 %s303_s13, 2  ;;  %s245_s22 = sshll.u32 %s303_s13, 3 }
   0xf   : > { %s161_s17 = scalar_lea.vmem %s298_s0, %s244_s14  ;;  %s165_s25 = scalar_lea.vmem %s301_s3, %s245_s22 }
  0x10   : > { %v166_v0 = vld [vmem:[%s161_s17] sm:$0xf] }
  0x11   : > { %v167_v2 = vunpack.c.l.bf16 %v166_v0 }
  0x13   : > { %v175_v4 = vmul.f32 %v246_v1, %v167_v2 }
  0x15   : > { %v183_v5 = vadd.f32 %v247_v3, %v175_v4 }
  0x17   : > { %v184_v6 = vmax.f32 %v183_v5, 0.0 }
  0x19   : > { %185 = vst [vmem:[%s165_s25] sm:$0xff] %v184_v6 }
  0x1a PF: > { %s13_s12 = sadd.s32 1, %s264_s12  }
  0x1b   : > { %p10_p4 = scmp.ge.s32.totalorder %s13_s12, 4  }
  0x1d   :  { %12 = sbr.rel (!%p10_p4) target bundleno = 1 (0x1), region = 62 }

// kernel: resnet_basic_block_forward.3
= control target key start
LH: loop header
LB: loop body
LE: loop exit
PB: predicated region body
PF: predicated region fallthrough
CT: control target
= control target key end

     0   :  { %s3890_s12 = smov 0   ;;  %s5220_s0 = inlined_call_operand.vmem [shape: bf16[2,16,16,4], index: 0, kind: input, shape index: {}]   ;;  %s5221_s1 = inlined_call_operand.vmem [shape: bf16[36,4], index: 1, kind: input, shape index: {}]   ;;  %s5222_s2 = inlined_call_operand.vmem [shape: bf16[2,256,4], index: 2, kind: output, shape index: {0}]   ;;  %s5223_s3 = inlined_call_operand.vmem [shape: f32[2,2,4], index: 3, kind: output, shape index: {1}]  }
   0x1 LB: > { %s3309_s13 = sadd.s32 4294967295, %s3859_s12   ;;  %p3313_p0 = scmp.ge.s32.totalorder %s3859_s12, 1  ;;  %s3859_s12 = sphi %s3890_s12, %s14_s12  }
   0x2   : > { %p140_p1 = scmp.lt.s32.totalorder %s3859_s12, 3 }
   0x4   : > { %p141_p2 = pnand %p3313_p0, %p140_p1 }
   0x5   : > { %vm215_vm0 = vcmask (!%p141_p2), 27648   ;;  %vm218_vm1 = vcmask (!%p141_p2), 24576   ;;  %v3861_v0 = vmov (!%p141_p2), 0   ;;  %p168_p3 = scmp.lt.s32.totalorder (!%p141_p2), %s3309_s13, 1  ;;  %vm1302_vm2 = vcmask (!%p141_p2), 1046528   ;;  %s3862_s18 = smov (!%p141_p2), 8  }
   0x6   : > { %144 = sbr.rel (%p141_p2) target bundleno = 641 (0x281), region = 28  ;;  %216 = vst.msk [vmem:[#allocation2] sm:$0xf] (!%p141_p2), %vm215_vm0, %v3861_v0  ;;  %217 = vst.msk [vmem:[#allocation2 + $0x4] sm:$0xf] (!%p141_p2), %vm215_vm0, %v3861_v0  ;;  %vm448_vm5 = vcmask (!%p141_p2), 1040384  }
   0x7   : > { %219 = vst.msk [vmem:[#allocation2 + $0x8] sm:$0x1] (!%p141_p2), %vm218_vm1, %v3861_v0  ;;  %223 = vst.msk [vmem:[#allocation2 + $0xd4] sm:$0x1] (!%p141_p2), %vm218_vm1, %v3861_v0  ;;  %vm449_vm3 = vsmask.f32 (!%p141_p2), 256 }
   0x8   : > { %221 = vst.msk [vmem:[#allocation2 + $0xcc] sm:$0xf] (!%p141_p2), %vm215_vm0, %v3861_v0  ;;  %222 = vst.msk [vmem:[#allocation2 + $0xd0] sm:$0xf] (!%p141_p2), %vm215_vm0, %v3861_v0  ;;  %vm1029_vm4 = vsmask.f32 (!%p141_p2), 7424 }
   0x9   : > { %vm3922_vm6 = vmand (!%p141_p2), %vm448_vm5, %vm449_vm3  ;;  %s3863_s19 = smov (!%p141_p2), 4   ;;  %s3864_s20 = smov (!%p141_p2), 12   ;;  %vm2724_vm7 = vcmask (!%p141_p2), 1041408   ;;  %vm2407_vm8 = vcmask (!%p141_p2), 31744   ;;  %vm2440_vm9 = vcmask (!%p141_p2), 64512   ;;  %vm2473_vm10 = vcmask (!%p141_p2), 97280  }
   0xa   : > { %s3865_s21 = smov (!%p141_p2), 24   ;;  %s3866_s24 = smov (!%p141_p2), 20   ;;  %vm2506_vm11 = vcmask (!%p141_p2), 130048   ;;  %vm2539_vm12 = vcmask (!%p141_p2), 162816   ;;  %vm2572_vm13 = vcmask (!%p141_p2), 195584   ;;  %vm2605_vm14 = vcmask (!%p141_p2), 228352  }
   0xb   : > { %s3867_s27 = smov (!%p141_p2), 32   ;;  %s3868_s28 = smov (!%p141_p2), 16   ;;  %vm2638_vm15 = vcmask (!%p141_p2), 261120   ;;  %vm2691_vm3 = vcmask (!%p141_p2), 293888  }
   0xc   : > { %s3869_s29 = smov (!%p141_p2), 28  }
   0xd   : > { %s5227_s13 = smov (!%p168_p3, %s3309_s13), 1  ;;  %v709_v2 = vld [vmem:[#allocation2 + $0x4] sm:$0xf]  ;;  %v756_v3 = vld [vmem:[#allocation2] sm:$0xe] }
   0xe   : > { %s3580_s14 = sshll.u32 %s5227_s13, 7  ;;  %v3696_v4 = vld [vmem:[#allocation2 + $0x8] ss:$0 sps:$4 sm:$0x11]   ;;  %v3415_v5 = vcombine.low %v756_v3, %v709_v2  ;;  %v708_v6 = vld [vmem:[#allocation2] sm:$0xf] }
   0xf   : > { %s3912_s17 = scalar_lea.vmem %s5220_s0, %s3580_s14  ;;  %v3915_v8 = vcombine.low %v708_v6, %v709_v2  ;;  %v1304_v12 = vrot.slane %v3696_v4, 1  ;;  %v1038_v13 = vshll.u32 %v3696_v4, 16  ;;  %s5071_s7 = scalar_lea.vmem %s5222_s2, %s3580_s14 }
  0x10   : > { %v3699_v1 = vld [vmem:[%s3912_s17 + $0x8] sm:$0xff]   ;;  %v3702_v10 = vld [vmem:[%s3912_s17] sm:$0xff]   ;;  %v1303_v11 = vrot.slane %v3415_v5, 1  ;;  %v3705_v23 = vld [vmem:[%s3912_s17 + $0x10] sm:$0xff]   ;;  %s3318_s8 = sshll.u32 %s5227_s13, 1 }
  0x11   : > { %v312_v7 = vshrl.u32 %v3699_v1, 16  ;;  %v315_v9 = vshll.u32 %v3699_v1, 16  ;;  %v1031_v15 = vshrl.u32 %v3915_v8, 16  ;;  %v1033_v16 = vshll.u32 %v3915_v8, 16  ;;  %v3723_v25 = vld [vmem:[%s3912_s17 + $0x18] sm:$0xff]   ;;  %v3936_v37 = vld [vmem:[%s3912_s17 + $0x20] sm:$0xff]   ;;  %s181_s11 = scalar_lea.vmem %s5223_s3, %s3318_s8 }
  0x12   : > { %v305_v18 = vshrl.u32 %v3702_v10, 16  ;;  %v308_v19 = vshll.u32 %v3702_v10, 16  ;;  %v1305_v20 = vsel %vm1302_vm2, %v1303_v11, %v1304_v12  ;;  %v1040_v21 = vrot.slane %v1038_v13, 1 }
  0x13   : > { %v314_v14 = vrot.slane %v312_v7, 7  ;;  %1351 = vrot.lane.b32.xlu1 %v1305_v20, %s3862_s18  ;;  %v1035_v26 = vrot.slane %v1033_v16, 1  ;;  %v319_v30 = vshrl.u32 %v3705_v23, 16  ;;  %v322_v31 = vshll.u32 %v3705_v23, 16 }
  0x14   : > { %v307_v27 = vrot.slane %v305_v18, 7  ;;  %v326_v32 = vshrl.u32 %v3723_v25, 16  ;;  %v329_v41 = vshll.u32 %v3723_v25, 16  ;;  %v333_v45 = vshrl.u32 %v3936_v37, 16 }
  0x15   : > { %v317_v22 = vor.u32 %v315_v9, %v314_v14  ;;  %v468_v24 = vsel %vm3922_vm6, %v314_v14, 0  ;;  %v1036_v33 = vor.u32 %v1035_v26, %v1031_v15  ;;  %v321_v38 = vrot.slane %v319_v30, 7 }
  0x16   : > { %v3340_v28 = vcombine.low %v468_v24, %v468_v24  ;;  %v310_v36 = vor.u32 %v308_v19, %v307_v27  ;;  %v467_v39 = vsel %vm3922_vm6, %v307_v27, 0  ;;  %v328_v40 = vrot.slane %v326_v32, 7 }
  0x17   : > { %v452_v29 = vsel %vm3922_vm6, 0, %v317_v22  ;;  %v1041_v42 = vsel %vm1029_vm4, %v1036_v33, %v1040_v21  ;;  %v3337_v44 = vcombine.low %v467_v39, %v467_v39  ;;  %v324_v48 = vor.u32 %v322_v31, %v321_v38 }
  0x18   : > { %v3338_v34 = vcombine.low %v452_v29, %v452_v29  ;;  %v3339_v35 = vcombine.high %v452_v29, %v452_v29  ;;  %665 = vst.msk [vmem:[#allocation2 + $0x20] sm:$0x1] %vm218_vm1, %v3340_v28  ;;  %v451_v43 = vsel %vm3922_vm6, 0, %v310_v36  ;;  %1222 = vrot.lane.b32.xlu0 %v1041_v42, %s3863_s19  ;;  %v469_v49 = vsel %vm3922_vm6, %v321_v38, 0 }
  0x19   : > { %v3335_v46 = vcombine.low %v451_v43, %v451_v43  ;;  %v3336_v47 = vcombine.high %v451_v43, %v451_v43  ;;  %662 = vst.msk [vmem:[#allocation2 + $0x14] sm:$0x1] %vm218_vm1, %v3337_v44  ;;  %v3343_v50 = vcombine.low %v469_v49, %v469_v49  ;;  %v331_v51 = vor.u32 %v329_v41, %v328_v40 }
  0x1a   : > { %663 = vst.msk [vmem:[#allocation2 + $0x18] sm:$0xf] %vm215_vm0, %v3338_v34  ;;  %664 = vst.msk [vmem:[#allocation2 + $0x1c] sm:$0xf] %vm215_vm0, %v3339_v35  ;;  %v470_v52 = vsel %vm3922_vm6, %v328_v40, 0  ;;  %v3952_v53 = vrot.slane %v333_v45, 7 }
  0x1b   : > { %660 = vst.msk [vmem:[#allocation2 + $0xc] sm:$0xf] %vm215_vm0, %v3335_v46  ;;  %661 = vst.msk [vmem:[#allocation2 + $0x10] sm:$0xf] %vm215_vm0, %v3336_v47  ;;  %v453_v54 = vsel %vm3922_vm6, 0, %v324_v48  ;;  %v3346_v55 = vcombine.low %v470_v52, %v470_v52  ;;  %v454_v58 = vsel %vm3922_vm6, 0, %v331_v51 }
  0x1c   : > { %v3341_v56 = vcombine.low %v453_v54, %v453_v54  ;;  %v3342_v57 = vcombine.high %v453_v54, %v453_v54  ;;  %668 = vst.msk [vmem:[#allocation2 + $0x2c] sm:$0x1] %vm218_vm1, %v3343_v50  ;;  %v471_v59 = vsel %vm3922_vm6, %v3952_v53, 0  ;;  %v3344_v60 = vcombine.low %v454_v58, %v454_v58  ;;  %v3788_v45 = vld [vmem:[%s5221_s1] sm:$0xff]  }
  0x1d   : > { %v3345_v61 = vcombine.high %v454_v58, %v454_v58  ;;  %671 = vst.msk [vmem:[#allocation2 + $0x38] sm:$0x1] %vm218_vm1, %v3346_v55  ;;  %v3349_v62 = vcombine.low %v471_v59, %v471_v59  ;;  %3633 = vmatprep.subr.bf16.mxu0 %v3788_v45  ;;  %3671 = vmatprep.subr.bf16.mxu1 %v3788_v45 }
  0x1e   : > { %666 = vst.msk [vmem:[#allocation2 + $0x24] sm:$0xf] %vm215_vm0, %v3341_v56  ;;  %667 = vst.msk [vmem:[#allocation2 + $0x28] sm:$0xf] %vm215_vm0, %v3342_v57  ;;  %3634 = vmatpush3.bf16.msra.mxu0 %v3788_v45  ;;  %3674 = vmatpush3.bf16.msra.mxu1 %v3788_v45 }
  0x1f   : > { %669 = vst.msk [vmem:[#allocation2 + $0x30] sm:$0xf] %vm215_vm0, %v3344_v60  ;;  %670 = vst.msk [vmem:[#allocation2 + $0x34] sm:$0xf] %vm215_vm0, %v3345_v61 }
  0x20   : > { %674 = vst.msk [vmem:[#allocation2 + $0x44] sm:$0x1] %vm218_vm1, %v3349_v62  ;;  %v3970_v4 = vld [vmem:[#allocation2 + $0x14] ss:$0 sps:$4 sm:$0x11]  }
  0x21   : > { %v774_v63 = vld [vmem:[#allocation2 + $0x18] sm:$0xf]  ;;  %v775_v0 = vld [vmem:[#allocation2 + $0x1c] sm:$0xf]  ;;  %v1816_v19 = vrot.slane %v3970_v4, 1 }
  0x22   : > { %v821_v1 = vld [vmem:[#allocation2 + $0x18] sm:$0xe]  ;;  %v3432_v2 = vcombine.low %v774_v63, %v775_v0  ;;  %v3972_v5 = vld [vmem:[#allocation2 + $0x20] ss:$0 sps:$4 sm:$0x11]  }
  0x23   : > { %v837_v3 = vld [vmem:[#allocation2 + $0x18] sm:$0xf]  ;;  %v772_v6 = vld [vmem:[#allocation2 + $0xc] sm:$0xf]  ;;  %v773_v7 = vld [vmem:[#allocation2 + $0x10] sm:$0xf]  ;;  %v3464_v10 = vcombine.low %v821_v1, %v775_v0 }
  0x24   : > { %1465 = vrot.lane.b32.xlu1 %v3432_v2, %s3864_s20  ;;  %v838_v9 = vld [vmem:[#allocation2 + $0x1c] sm:$0xf]  ;;  %v820_v11 = vld [vmem:[#allocation2 + $0xc] sm:$0xe]  ;;  %v3975_v12 = vcombine.low %v772_v6, %v773_v7  ;;  %v885_v13 = vld [vmem:[#allocation2 + $0x18] sm:$0xe] }
  0x25   : > { %v711_v14 = vld [vmem:[#allocation2 + $0x10] sm:$0xf]  ;;  %v3715_v15 = vld [vmem:[#allocation2 + $0x20] ss:$0 sps:$4 sm:$0x11]   ;;  %v1558_v16 = vshll.u32 %v3432_v2, 16  ;;  %v3463_v18 = vcombine.low %v820_v11, %v773_v7  ;;  %v3980_v23 = vcombine.low %v837_v3, %v838_v9  ;;  %v3511_v28 = vcombine.low %v885_v13, %v838_v9 }
  0x26   : > { %v757_v20 = vld [vmem:[#allocation2 + $0xc] sm:$0xe]  ;;  %1463 = vrot.lane.b32.xlu0 %v3975_v12, %s3864_s20  ;;  %v839_v21 = vld [vmem:[#allocation2 + $0x24] sm:$0xf]  ;;  %v840_v22 = vld [vmem:[#allocation2 + $0x28] sm:$0xf] }
  0x27   : > { %v3416_v24 = vcombine.low %v757_v20, %v711_v14  ;;  %v710_v25 = vld [vmem:[#allocation2 + $0xc] sm:$0xf]  ;;  %v886_v26 = vld [vmem:[#allocation2 + $0x24] sm:$0xe]  ;;  %v3480_v27 = vcombine.low %v839_v21, %v840_v22  ;;  %v1815_v29 = vrot.slane %v3463_v18, 1  ;;  %v2328_v33 = vrot.slane %v3972_v5, 1 }
  0x28   : > { %v3711_v30 = vld [vmem:[#allocation2 + $0x14] ss:$0 sps:$4 sm:$0x11]   ;;  %v3512_v31 = vcombine.low %v886_v26, %v840_v22  ;;  %v1818_v34 = vrot.slane %v3464_v10, 1  ;;  %v3984_v38 = vcombine.low %v710_v25, %v711_v14  ;;  %v1556_v40 = vshrl.u32 %v3432_v2, 16 }
  0x29   : > { %v1306_v32 = vrot.slane %v3416_v24, 1  ;;  %v2070_v35 = vshll.u32 %v3480_v27, 16  ;;  %1977 = vrot.lane.b32.xlu1 %v3480_v27, %s3865_s21  ;;  %v1307_v36 = vrot.slane %v3711_v30, 1  ;;  %v3716_v39 = vld [vmem:[#allocation2 + $0x2c] ss:$0 sps:$4 sm:$0x11]   ;;  %v1817_v46 = vsel %vm1302_vm2, %v1815_v29, %v1816_v19 }
  0x2a   : > { %1975 = vrot.lane.b32.xlu0 %v3980_v23, %s3865_s21  ;;  %v1819_v41 = vrot.slane %v3715_v15, 1  ;;  %v1560_v42 = vrot.slane %v1558_v16, 1  ;;  %v1563_v43 = vshll.u32 %v3715_v15, 16  ;;  %v712_v44 = vld [vmem:[#allocation2 + $0x18] sm:$0xf]  ;;  %v2327_v48 = vrot.slane %v3511_v28, 1 }
  0x2b   : > { %v1308_v47 = vsel %vm1302_vm2, %v1306_v32, %v1307_v36  ;;  %v2330_v49 = vrot.slane %v3512_v31, 1  ;;  %v3993_v50 = vld [vmem:[#allocation2 + $0x1c] sm:$0xf]  ;;  %v2331_v51 = vrot.slane %v3716_v39, 1  ;;  %v2068_v54 = vshrl.u32 %v3480_v27, 16  ;;  %v3791_v19 = vld [vmem:[%s5221_s1 + $0x8] sm:$0xff]  }
  0x2c   : > { %v1561_v52 = vor.u32 %v1560_v42, %v1556_v40  ;;  %v2072_v55 = vrot.slane %v2070_v35, 1  ;;  %v3995_v56 = vld [vmem:[#allocation2 + $0x20] ss:$0 sps:$4 sm:$0x11]   ;;  %v1565_v57 = vrot.slane %v1563_v43, 1  ;;  %v2075_v58 = vshll.u32 %v3716_v39, 16  ;;  %3635 = vmatprep.subr.bf16.mxu0 %v3791_v19  ;;  %3672 = vmatprep.subr.bf16.mxu1 %v3791_v19 }
  0x2d   : > { %1353 = vrot.lane.b32.xlu1 %v1308_v47, %s3862_s18  ;;  %v1045_v59 = vshll.u32 %v3984_v38, 16  ;;  %v1050_v60 = vshll.u32 %v3711_v30, 16  ;;  %v1820_v61 = vsel %vm1302_vm2, %v1818_v34, %v1819_v41  ;;  %v4002_v62 = vcombine.low %v712_v44, %v3993_v50  ;;  %v714_v63 = vld [vmem:[#allocation2 + $0x24] sm:$0xf]  ;;  %v4004_v0 = vld [vmem:[#allocation2 + $0x28] sm:$0xf]  ;;  %3636 = vmatpush3.bf16.msra.mxu0 %v3791_v19 }
  0x2e   : > { %1863 = vrot.lane.b32.xlu0 %v1817_v46, %s3866_s24  ;;  %v1546_v1 = vshll.u32 %v3975_v12, 16  ;;  %v2329_v2 = vsel %vm1302_vm2, %v2327_v48, %v2328_v33  ;;  %v1043_v3 = vshrl.u32 %v3984_v38, 16  ;;  %v2058_v7 = vshll.u32 %v3980_v23, 16  ;;  %v4018_v18 = vld [vmem:[#allocation2 + $0x2c] ss:$0 sps:$4 sm:$0x11]   ;;  %3675 = vmatpush3.bf16.msra.mxu1 %v3791_v19 }
  0x2f   : > { %v1047_v6 = vrot.slane %v1045_v59, 1  ;;  %v2332_v9 = vsel %vm1302_vm2, %v2330_v49, %v2331_v51  ;;  %v1057_v10 = vshll.u32 %v4002_v62, 16  ;;  %v1062_v11 = vshll.u32 %v3995_v56, 16  ;;  %v778_v30 = vld [vmem:[#allocation2 + $0x30] sm:$0xf]  ;;  %v4040_v44 = vld [vmem:[%s3912_s17 + $0x28] sm:$0xff]  }
  0x30   : > { %v1566_v13 = vsel %vm1029_vm4, %v1561_v52, %v1565_v57  ;;  %v2073_v14 = vor.u32 %v2072_v55, %v2068_v54  ;;  %v2077_v15 = vrot.slane %v2075_v58, 1  ;;  %v4016_v16 = vcombine.low %v714_v63, %v4004_v0  ;;  %v759_v43 = vld [vmem:[#allocation2 + $0x24] sm:$0xe]  ;;  %v758_v45 = vld [vmem:[#allocation2 + $0x18] sm:$0xe] }
  0x31   : > { %1865 = vrot.lane.b32.xlu1 %v1820_v61, %s3866_s24  ;;  %v1052_v20 = vrot.slane %v1050_v60, 1  ;;  %v1055_v21 = vshrl.u32 %v4002_v62, 16  ;;  %v1059_v22 = vrot.slane %v1057_v10, 1  ;;  %v1544_v24 = vshrl.u32 %v3975_v12, 16  ;;  %v4042_v46 = vld [vmem:[#allocation2 + $0x28] sm:$0xf] }
  0x32   : > { %2375 = vrot.lane.b32.xlu0 %v2329_v2, %s3867_s27  ;;  %v1048_v25 = vor.u32 %v1047_v6, %v1043_v3  ;;  %v1548_v26 = vrot.slane %v1546_v1, 1  ;;  %v1551_v27 = vshll.u32 %v3970_v4, 16  ;;  %v1069_v28 = vshll.u32 %v4016_v16, 16  ;;  %v4061_v63 = vld [vmem:[#allocation2 + $0x38] ss:$0 sps:$4 sm:$0x11]  }
  0x33   : > { %v1064_v29 = vrot.slane %v1062_v11, 1  ;;  %v336_v31 = vshll.u32 %v3936_v37, 16  ;;  %v2078_v12 = vsel %vm1029_vm4, %v2073_v14, %v2077_v15  ;;  %v1074_v32 = vshll.u32 %v4018_v18, 16  ;;  %v4035_v37 = vld [vmem:[#allocation2 + $0x34] sm:$0xf] }
  0x34   : > { %v2056_v4 = vshrl.u32 %v3980_v23, 16  ;;  %v1060_v33 = vor.u32 %v1059_v22, %v1055_v21  ;;  %v1067_v34 = vshrl.u32 %v4016_v16, 16  ;;  %v1071_v35 = vrot.slane %v1069_v28, 1  ;;  %v776_v23 = vld [vmem:[#allocation2 + $0x24] sm:$0xf] }
  0x35   : > { %1737 = vrot.lane.b32.xlu1 %v1566_v13, %s3868_s28  ;;  %v2060_v36 = vrot.slane %v2058_v7, 1  ;;  %v1053_v39 = vsel %vm1029_vm4, %v1048_v25, %v1052_v20  ;;  %v1549_v40 = vor.u32 %v1548_v26, %v1544_v24  ;;  %v1553_v41 = vrot.slane %v1551_v27, 1  ;;  %v4067_v2 = vld [vmem:[#allocation2 + $0x2c] ss:$0 sps:$4 sm:$0x11]  }
  0x36   : > { %2377 = vrot.lane.b32.xlu0 %v2332_v9, %s3867_s27  ;;  %v2063_v42 = vshll.u32 %v3972_v5, 16  ;;  %v1076_v47 = vrot.slane %v1074_v32, 1  ;;  %v4046_v48 = vcombine.low %v778_v30, %v4035_v37  ;;  %v338_v49 = vor.u32 %v336_v31, %v3952_v53  ;;  %v823_v13 = vld [vmem:[#allocation2 + $0x30] sm:$0xe]  ;;  %v822_v14 = vld [vmem:[#allocation2 + $0x24] sm:$0xe] }
  0x37   : > { %v1065_v5 = vsel %vm1029_vm4, %v1060_v33, %v1064_v29  ;;  %v1072_v51 = vor.u32 %v1071_v35, %v1067_v34  ;;  %v2061_v52 = vor.u32 %v2060_v36, %v2056_v4  ;;  %v3418_v54 = vcombine.low %v759_v43, %v4004_v0  ;;  %v841_v21 = vld [vmem:[#allocation2 + $0x30] sm:$0xf]  ;;  %v4079_v22 = vld [vmem:[#allocation2 + $0x34] sm:$0xf] }
  0x38   : > { %v1554_v55 = vsel %vm1029_vm4, %v1549_v40, %v1553_v41  ;;  %v2065_v57 = vrot.slane %v2063_v42, 1  ;;  %v3417_v58 = vcombine.low %v758_v45, %v3993_v50  ;;  %v4055_v59 = vcombine.low %v776_v23, %v4042_v46  ;;  %v4092_v33 = vld [vmem:[#allocation2 + $0x34] sm:$0xf]  ;;  %v4100_v45 = vld [vmem:[#allocation2 + $0x44] ss:$0 sps:$4 sm:$0x11]  }
  0x39   : > { %2249 = vrot.lane.b32.xlu1 %v2078_v12, %s3869_s29  ;;  %v340_v60 = vshrl.u32 %v4040_v44, 16  ;;  %v1313_v53 = vrot.slane %v4018_v18, 1  ;;  %v1582_v61 = vshll.u32 %v4046_v48, 16  ;;  %v455_v0 = vsel %vm3922_vm6, 0, %v338_v49  ;;  %v716_v12 = vld [vmem:[#allocation2 + $0x30] sm:$0xf] }
  0x3a   : > { %1224 = vrot.lane.b32.xlu0 %v1053_v39, %s3863_s19  ;;  %v1077_v50 = vsel %vm1029_vm4, %v1072_v51, %v1076_v47  ;;  %v1312_v1 = vrot.slane %v3418_v54, 1  ;;  %v3347_v3 = vcombine.low %v455_v0, %v455_v0  ;;  %v3348_v6 = vcombine.high %v455_v0, %v455_v0  ;;  %v3750_v23 = vld [vmem:[%s3912_s17 + $0x30] sm:$0xff]  }
  0x3b   : > { %v2066_v7 = vsel %vm1029_vm4, %v2061_v52, %v2065_v57  ;;  %v1309_v9 = vrot.slane %v3417_v58, 1  ;;  %v1310_v10 = vrot.slane %v3995_v56, 1  ;;  %v1570_v11 = vshll.u32 %v4055_v59, 16  ;;  %v887_v0 = vld [vmem:[#allocation2 + $0x30] sm:$0xe] }
  0x3c   : > { %672 = vst.msk [vmem:[#allocation2 + $0x3c] sm:$0xf] %vm215_vm0, %v3347_v3  ;;  %673 = vst.msk [vmem:[#allocation2 + $0x40] sm:$0xf] %vm215_vm0, %v3348_v6  ;;  %v1580_v15 = vshrl.u32 %v4046_v48, 16  ;;  %v1584_v18 = vrot.slane %v1582_v61, 1  ;;  %v1314_v56 = vsel %vm1302_vm2, %v1312_v1, %v1313_v53  ;;  %v3466_v28 = vcombine.low %v823_v13, %v4035_v37 }
  0x3d   : > { %1226 = vrot.lane.b32.xlu1 %v1065_v5, %s3863_s19  ;;  %v1587_v19 = vshll.u32 %v4061_v63, 16  ;;  %v342_v20 = vrot.slane %v340_v60, 7  ;;  %v1311_v24 = vsel %vm1302_vm2, %v1309_v9, %v1310_v10  ;;  %v1568_v25 = vshrl.u32 %v4055_v59, 16  ;;  %v4107_v5 = vld [vmem:[#allocation2 + $0x38] ss:$0 sps:$4 sm:$0x11]  }
  0x3e   : > { %1735 = vrot.lane.b32.xlu0 %v1554_v55, %s3868_s28  ;;  %v1572_v26 = vrot.slane %v1570_v11, 1  ;;  %v1575_v27 = vshll.u32 %v4067_v2, 16  ;;  %v3465_v29 = vcombine.low %v822_v14, %v4042_v46  ;;  %v1585_v30 = vor.u32 %v1584_v18, %v1580_v15  ;;  %v4118_v55 = vld [vmem:[#allocation2 + $0x38] ss:$0 sps:$4 sm:$0x11]  }
  0x3f   : > { %v1589_v31 = vrot.slane %v1587_v19, 1  ;;  %v343_v32 = vshll.u32 %v4040_v44, 16  ;;  %v4090_v4 = vcombine.low %v841_v21, %v4079_v22  ;;  %v472_v34 = vsel %vm3922_vm6, %v342_v20, 0  ;;  %v4138_v19 = vld [vmem:[#allocation2 + $0x44] ss:$0 sps:$4 sm:$0x11]  }
  0x40   : > { %v1573_v35 = vor.u32 %v1572_v26, %v1568_v25  ;;  %v1577_v36 = vrot.slane %v1575_v27, 1  ;;  %v3352_v41 = vcombine.low %v472_v34, %v472_v34  ;;  %v1824_v42 = vrot.slane %v3466_v28, 1 }
  0x41   : > { %1228 = vrot.lane.b32.xlu1 %v1077_v50, %s3863_s19  ;;  %v345_v40 = vor.u32 %v343_v32, %v342_v20  ;;  %v1825_v43 = vrot.slane %v4061_v63, 1  ;;  %v1590_v46 = vsel %vm1029_vm4, %v1585_v30, %v1589_v31  ;;  %v1821_v47 = vrot.slane %v3465_v29, 1 }
  0x42   : > { %2247 = vrot.lane.b32.xlu0 %v2066_v7, %s3869_s29  ;;  %v1822_v49 = vrot.slane %v4067_v2, 1  ;;  %677 = vst.msk [vmem:[#allocation2 + $0x50] sm:$0x1] %vm218_vm1, %v3352_v41  ;;  %v2082_v54 = vshll.u32 %v4090_v4, 16  ;;  %v1578_v58 = vsel %vm1029_vm4, %v1573_v35, %v1577_v36  ;;  %v2099_v50 = vshll.u32 %v4100_v45, 16 }
  0x43   : > { %v843_v37 = vld [vmem:[#allocation2 + $0x3c] sm:$0xf]  ;;  %v4096_v39 = vld [vmem:[#allocation2 + $0x40] sm:$0xf]  ;;  %v456_v51 = vsel %vm3922_vm6, 0, %v345_v40  ;;  %v1826_v63 = vsel %vm1302_vm2, %v1824_v42, %v1825_v43  ;;  %v2087_v1 = vshll.u32 %v4107_v5, 16  ;;  %v3513_v15 = vcombine.low %v887_v0, %v4079_v22 }
  0x44   : > { %v3482_v44 = vcombine.low %v843_v37, %v4096_v39  ;;  %v3350_v57 = vcombine.low %v456_v51, %v456_v51  ;;  %v718_v60 = vld [vmem:[#allocation2 + $0x3c] sm:$0xf]  ;;  %v4121_v53 = vld [vmem:[#allocation2 + $0x40] sm:$0xf]  ;;  %v3351_v61 = vcombine.high %v456_v51, %v456_v51  ;;  %v347_v2 = vshrl.u32 %v3750_v23, 16 }
  0x45   : > { %1357 = vrot.lane.b32.xlu1 %v1314_v56, %s3862_s18  ;;  %v4133_v9 = vcombine.low %v718_v60, %v4121_v53  ;;  %v2080_v10 = vshrl.u32 %v4090_v4, 16  ;;  %v2084_v11 = vrot.slane %v2082_v54, 1  ;;  %v350_v14 = vshll.u32 %v3750_v23, 16  ;;  %v888_v31 = vld [vmem:[#allocation2 + $0x3c] sm:$0xe] }
  0x46   : > { %1355 = vrot.lane.b32.xlu0 %v1311_v24, %s3862_s18  ;;  %v2094_v52 = vshll.u32 %v3482_v44, 16  ;;  %675 = vst.msk [vmem:[#allocation2 + $0x48] sm:$0xf] %vm215_vm0, %v3350_v57  ;;  %676 = vst.msk [vmem:[#allocation2 + $0x4c] sm:$0xf] %vm215_vm0, %v3351_v61  ;;  %v2092_v3 = vshrl.u32 %v3482_v44, 16 }
  0x47   : > { %v349_v13 = vrot.slane %v347_v2, 7  ;;  %v1086_v18 = vshll.u32 %v4118_v55, 16  ;;  %v2101_v20 = vrot.slane %v2099_v50, 1  ;;  %v1093_v27 = vshll.u32 %v4133_v9, 16  ;;  %v761_v23 = vld [vmem:[#allocation2 + $0x3c] sm:$0xe] }
  0x48   : > { %v2096_v6 = vrot.slane %v2094_v52, 1  ;;  %v2085_v28 = vor.u32 %v2084_v11, %v2080_v10  ;;  %v2089_v29 = vrot.slane %v2087_v1, 1  ;;  %v2333_v35 = vrot.slane %v3513_v15, 1  ;;  %v760_v51 = vld [vmem:[#allocation2 + $0x30] sm:$0xe]  ;;  %v3763_v50 = vld [vmem:[%s3912_s17 + $0x38] sm:$0xff]  }
  0x49   : > { %1469 = vrot.lane.b32.xlu1 %v4046_v48, %s3864_s20  ;;  %v4116_v48 = vcombine.low %v716_v12, %v4092_v33  ;;  %v352_v21 = vor.u32 %v350_v14, %v349_v13  ;;  %v473_v24 = vsel %vm3922_vm6, %v349_v13, 0  ;;  %v1088_v34 = vrot.slane %v1086_v18, 1  ;;  %v4175_v1 = vld [vmem:[#allocation2 + $0x44] ss:$0 sps:$4 sm:$0x11]  }
  0x4a   : > { %1467 = vrot.lane.b32.xlu0 %v4055_v59, %s3864_s20  ;;  %v1823_v59 = vsel %vm1302_vm2, %v1821_v47, %v1822_v49  ;;  %v2097_v25 = vor.u32 %v2096_v6, %v2092_v3  ;;  %v3355_v22 = vcombine.low %v473_v24, %v473_v24  ;;  %v2334_v36 = vrot.slane %v4107_v5, 1  ;;  %v824_v3 = vld [vmem:[#allocation2 + $0x3c] sm:$0xe] }
  0x4b   : > { %v1081_v7 = vshll.u32 %v4116_v48, 16  ;;  %v1079_v56 = vshrl.u32 %v4116_v48, 16  ;;  %v457_v30 = vsel %vm3922_vm6, 0, %v352_v21  ;;  %v1098_v37 = vshll.u32 %v4138_v19, 16 }
  0x4c   : > { %v3353_v12 = vcombine.low %v457_v30, %v457_v30  ;;  %v3354_v32 = vcombine.high %v457_v30, %v457_v30  ;;  %680 = vst.msk [vmem:[#allocation2 + $0x5c] sm:$0x1] %vm218_vm1, %v3355_v22  ;;  %v2102_v40 = vsel %vm1029_vm4, %v2097_v25, %v2101_v20  ;;  %v1091_v42 = vshrl.u32 %v4133_v9, 16  ;;  %v3770_v30 = vld [vmem:[%s3912_s17 + $0x40] sm:$0xff]  }
  0x4d   : > { %1741 = vrot.lane.b32.xlu1 %v1590_v46, %s3868_s28  ;;  %v1083_v26 = vrot.slane %v1081_v7, 1  ;;  %v1095_v43 = vrot.slane %v1093_v27, 1  ;;  %v780_v46 = vld [vmem:[#allocation2 + $0x3c] sm:$0xf]  ;;  %v2090_v47 = vsel %vm1029_vm4, %v2085_v28, %v2089_v29  ;;  %v782_v49 = vld [vmem:[#allocation2 + $0x48] sm:$0xf]  ;;  %v3420_v54 = vcombine.low %v761_v23, %v4121_v53 }
  0x4e   : > { %1739 = vrot.lane.b32.xlu0 %v1578_v58, %s3868_s28  ;;  %678 = vst.msk [vmem:[#allocation2 + $0x54] sm:$0xf] %vm215_vm0, %v3353_v12  ;;  %679 = vst.msk [vmem:[#allocation2 + $0x58] sm:$0xf] %vm215_vm0, %v3354_v32  ;;  %v4160_v5 = vld [vmem:[#allocation2 + $0x4c] sm:$0xf]  ;;  %v2335_v61 = vsel %vm1302_vm2, %v2333_v35, %v2334_v36 }
  0x4f   : > { %v1084_v41 = vor.u32 %v1083_v26, %v1079_v56  ;;  %v1100_v52 = vrot.slane %v1098_v37, 1  ;;  %v1096_v58 = vor.u32 %v1095_v43, %v1091_v42  ;;  %v2337_v0 = vrot.slane %v4100_v45, 1  ;;  %v4183_v45 = vld [vmem:[#allocation2 + $0x50] ss:$0 sps:$4 sm:$0x11]  }
  0x50   : > { %v1318_v53 = vrot.slane %v3420_v54, 1  ;;  %v1319_v2 = vrot.slane %v4138_v19, 1  ;;  %v1316_v13 = vrot.slane %v4118_v55, 1  ;;  %v354_v14 = vshrl.u32 %v3763_v50, 16  ;;  %v825_v19 = vld [vmem:[#allocation2 + $0x48] sm:$0xe] }
  0x51   : > { %1869 = vrot.lane.b32.xlu1 %v1826_v63, %s3866_s24  ;;  %v1089_v57 = vsel %vm1029_vm4, %v1084_v41, %v1088_v34  ;;  %v1101_v6 = vsel %vm1029_vm4, %v1096_v58, %v1100_v52  ;;  %v1599_v15 = vshll.u32 %v4175_v1, 16  ;;  %v1611_v25 = vshll.u32 %v4183_v45, 16  ;;  %v845_v34 = vld [vmem:[#allocation2 + $0x48] sm:$0xf]  ;;  %v4200_v35 = vld [vmem:[#allocation2 + $0x4c] sm:$0xf] }
  0x52   : > { %1867 = vrot.lane.b32.xlu0 %v1823_v59, %s3866_s24  ;;  %v3419_v59 = vcombine.low %v760_v51, %v4092_v33  ;;  %v1320_v18 = vsel %vm1302_vm2, %v1318_v53, %v1319_v2  ;;  %v356_v28 = vrot.slane %v354_v14, 7  ;;  %v357_v29 = vshll.u32 %v3763_v50, 16  ;;  %v720_v37 = vld [vmem:[#allocation2 + $0x48] sm:$0xf] }
  0x53   : > { %v1601_v12 = vrot.slane %v1599_v15, 1  ;;  %v1828_v32 = vrot.slane %v4175_v1, 1  ;;  %v1613_v23 = vrot.slane %v1611_v25, 1  ;;  %v4218_v51 = vld [vmem:[%s3912_s17 + $0x48] sm:$0xff]  }
  0x54   : > { %v1315_v11 = vrot.slane %v3419_v59, 1  ;;  %v359_v41 = vor.u32 %v357_v29, %v356_v28  ;;  %v474_v42 = vsel %vm3922_vm6, %v356_v28, 0  ;;  %v4220_v54 = vld [vmem:[#allocation2 + $0x5c] ss:$0 sps:$4 sm:$0x11]  }
  0x55   : > { %1981 = vrot.lane.b32.xlu1 %v3482_v44, %s3865_s21  ;;  %v3514_v44 = vcombine.low %v888_v31, %v4096_v39  ;;  %v4167_v39 = vcombine.low %v782_v49, %v4160_v5  ;;  %v847_v27 = vld [vmem:[#allocation2 + $0x54] sm:$0xf]  ;;  %v4195_v22 = vld [vmem:[#allocation2 + $0x58] sm:$0xf]  ;;  %v3468_v31 = vcombine.low %v825_v19, %v4160_v5  ;;  %v1831_v49 = vrot.slane %v4183_v45, 1 }
  0x56   : > { %1979 = vrot.lane.b32.xlu0 %v4090_v4, %s3865_s21  ;;  %v781_v4 = vld [vmem:[#allocation2 + $0x40] sm:$0xf]  ;;  %v1317_v26 = vsel %vm1302_vm2, %v1315_v11, %v1316_v13  ;;  %v4213_v5 = vcombine.low %v845_v34, %v4200_v35  ;;  %v3792_v59 = vld [vmem:[%s5221_s1 + $0x10] ss:$0 sps:$4 sm:$0x33]   ;;  %v2123_v11 = vshll.u32 %v4220_v54, 16 }
  0x57   : > { %v4169_v60 = vcombine.low %v780_v46, %v781_v4  ;;  %v2336_v63 = vrot.slane %v3514_v44, 1  ;;  %v1606_v7 = vshll.u32 %v4167_v39, 16  ;;  %v3467_v20 = vcombine.low %v824_v3, %v781_v4  ;;  %v722_v2 = vld [vmem:[#allocation2 + $0x54] sm:$0xf]  ;;  %v4236_v3 = vld [vmem:[#allocation2 + $0x58] sm:$0xf]  ;;  %3677 = vmatprep.subr.msk.bf16.mxu0 %vm2724_vm7, %v3792_v59  ;;  %3678 = vmatprep.subr.msk.bf16.mxu1 %vm2724_vm7, %v3792_v59 }
  0x58   : > { %v1604_v21 = vshrl.u32 %v4167_v39, 16  ;;  %v4209_v46 = vcombine.low %v847_v27, %v4195_v22  ;;  %v3358_v44 = vcombine.low %v474_v42, %v474_v42  ;;  %v458_v4 = vsel %vm3922_vm6, 0, %v359_v41  ;;  %v4250_v15 = vld [vmem:[#allocation2 + $0x50] ss:$0 sps:$4 sm:$0x11]  }
  0x59   : > { %2253 = vrot.lane.b32.xlu1 %v2102_v40, %s3869_s29  ;;  %v1594_v10 = vshll.u32 %v4169_v60, 16  ;;  %v2338_v33 = vsel %vm1302_vm2, %v2336_v63, %v2337_v0  ;;  %v1592_v56 = vshrl.u32 %v4169_v60, 16  ;;  %v1608_v24 = vrot.slane %v1606_v7, 1  ;;  %v4203_v40 = vld [vmem:[#allocation2 + $0x4c] sm:$0xf] }
  0x5a   : > { %2251 = vrot.lane.b32.xlu0 %v2090_v47, %s3869_s29  ;;  %v1827_v36 = vrot.slane %v3467_v20, 1  ;;  %v1830_v52 = vrot.slane %v3468_v31, 1  ;;  %v3356_v58 = vcombine.low %v458_v4, %v458_v4  ;;  %683 = vst.msk [vmem:[#allocation2 + $0x68] sm:$0x1] %vm218_vm1, %v3358_v44  ;;  %v361_v63 = vshrl.u32 %v3770_v30, 16 }
  0x5b   : > { %v1596_v55 = vrot.slane %v1594_v10, 1  ;;  %v1609_v43 = vor.u32 %v1608_v24, %v1604_v21  ;;  %v364_v0 = vshll.u32 %v3770_v30, 16  ;;  %v2118_v53 = vshll.u32 %v4209_v46, 16  ;;  %v4242_v7 = vld [vmem:[#allocation2 + $0x50] ss:$0 sps:$4 sm:$0x11]  }
  0x5c   : > { %v1829_v1 = vsel %vm1302_vm2, %v1827_v36, %v1828_v32  ;;  %681 = vst.msk [vmem:[#allocation2 + $0x60] sm:$0xf] %vm215_vm0, %v3356_v58  ;;  %v368_v10 = vshrl.u32 %v4218_v51, 16  ;;  %v1832_v45 = vsel %vm1302_vm2, %v1830_v52, %v1831_v49  ;;  %v2116_v14 = vshrl.u32 %v4209_v46, 16 }
  0x5d   : > { %1230 = vrot.lane.b32.xlu1 %v1089_v57, %s3863_s19  ;;  %v1597_v47 = vor.u32 %v1596_v55, %v1592_v56  ;;  %v4223_v57 = vcombine.low %v720_v37, %v4203_v40  ;;  %v1614_v50 = vsel %vm1029_vm4, %v1609_v43, %v1613_v23  ;;  %v2120_v56 = vrot.slane %v2118_v53, 1  ;;  %v3760_v36 = vld [vmem:[#allocation2 + $0x5c] ss:$0 sps:$4 sm:$0x11]   ;;  %v4284_v53 = vld [vmem:[#allocation2 + $0x58] sm:$0xf] }
  0x5e   : > { %2379 = vrot.lane.b32.xlu0 %v2335_v61, %s3867_s27  ;;  %v3357_v61 = vcombine.high %v458_v4, %v458_v4  ;;  %v4258_v24 = vrot.slane %v368_v10, 7  ;;  %v2726_v25 = vsel %vm2724_vm7, %v3792_v59, 0  ;;  %v2104_v55 = vshrl.u32 %v4213_v5, 16 }
  0x5f   : > { %v1105_v13 = vshll.u32 %v4223_v57, 16  ;;  %v2111_v27 = vshll.u32 %v4242_v7, 16  ;;  %3638 = vmatpush3.bf16.msra.mxu0 %v2726_v25  ;;  %3676 = vmatpush3.bf16.msra.mxu1 %v2726_v25  ;;  %v1103_v32 = vshrl.u32 %v4223_v57, 16  ;;  %v1110_v34 = vshll.u32 %v4250_v15, 16 }
  0x60   : > { %682 = vst.msk [vmem:[#allocation2 + $0x64] sm:$0xf] %vm215_vm0, %v3357_v61  ;;  %v2121_v41 = vor.u32 %v2120_v56, %v2116_v14  ;;  %v2340_v4 = vrot.slane %v4242_v7, 1  ;;  %v1122_v58 = vshll.u32 %v3760_v36, 16  ;;  %v763_v61 = vld [vmem:[#allocation2 + $0x54] sm:$0xe] }
  0x61   : > { %1232 = vrot.lane.b32.xlu1 %v1101_v6, %s3863_s19  ;;  %v2106_v6 = vshll.u32 %v4213_v5, 16  ;;  %v1107_v42 = vrot.slane %v1105_v13, 1  ;;  %v2113_v44 = vrot.slane %v2111_v27, 1  ;;  %v1112_v52 = vrot.slane %v1110_v34, 1 }
  0x62   : > { %2381 = vrot.lane.b32.xlu0 %v2338_v33, %s3867_s27  ;;  %v889_v33 = vld [vmem:[#allocation2 + $0x48] sm:$0xe]  ;;  %v3422_v7 = vcombine.low %v763_v61, %v4236_v3  ;;  %v371_v10 = vshll.u32 %v4218_v51, 16  ;;  %v2343_v14 = vrot.slane %v4220_v54, 1  ;;  %v1325_v56 = vrot.slane %v3760_v36, 1 }
  0x63   : > { %v3515_v29 = vcombine.low %v889_v33, %v4200_v35  ;;  %v2125_v35 = vrot.slane %v2123_v11, 1  ;;  %v1124_v33 = vrot.slane %v1122_v58, 1  ;;  %v4306_v25 = vld [vmem:[#allocation2 + $0x68] ss:$0 sps:$4 sm:$0x11]  }
  0x65   : > { %1361 = vrot.lane.b32.xlu1 %v1320_v18, %s3862_s18  ;;  %v4253_v18 = vcombine.low %v722_v2, %v4236_v3  ;;  %v2339_v49 = vrot.slane %v3515_v29, 1  ;;  %v1322_v29 = vrot.slane %v4250_v15, 1 }
  0x66   : > { %1359 = vrot.lane.b32.xlu0 %v1317_v26, %s3862_s18  ;;  %v2108_v26 = vrot.slane %v2106_v6, 1 }
  0x67   : > { %v1117_v43 = vshll.u32 %v4253_v18, 16  ;;  %v1115_v59 = vshrl.u32 %v4253_v18, 16  ;;  %v4288_v6 = vld [vmem:[#allocation2 + $0x64] sm:$0xf]  ;;  %v2341_v13 = vsel %vm1302_vm2, %v2339_v49, %v2340_v4  ;;  %v849_v49 = vld [vmem:[#allocation2 + $0x60] sm:$0xf] }
  0x68   : > { %v2109_v23 = vor.u32 %v2108_v26, %v2104_v55  ;;  %v373_v55 = vor.u32 %v371_v10, %v4258_v24  ;;  %v3793_v26 = vld [vmem:[%s3912_s17 + $0x50] sm:$0xff]   ;;  %v4325_v4 = vld [vmem:[#allocation2 + $0x64] sm:$0xf]  ;;  %v4347_v10 = vld [vmem:[%s3912_s17 + $0x58] sm:$0xff]  }
  0x69   : > { %1473 = vrot.lane.b32.xlu1 %v4167_v39, %s3864_s20  ;;  %v1602_v39 = vsel %vm1029_vm4, %v1597_v47, %v1601_v12  ;;  %v476_v12 = vsel %vm3922_vm6, %v4258_v24, 0  ;;  %v890_v47 = vld [vmem:[#allocation2 + $0x54] sm:$0xe] }
  0x6a   : > { %1471 = vrot.lane.b32.xlu0 %v4169_v60, %s3864_s20  ;;  %v363_v60 = vrot.slane %v361_v63, 7  ;;  %v3364_v37 = vcombine.low %v476_v12, %v476_v12  ;;  %v2126_v63 = vsel %vm1029_vm4, %v2121_v41, %v2125_v35  ;;  %v3516_v2 = vcombine.low %v890_v47, %v4195_v22  ;;  %v826_v24 = vld [vmem:[#allocation2 + $0x54] sm:$0xe]  ;;  %v827_v41 = vld [vmem:[#allocation2 + $0x60] sm:$0xe] }
  0x6b   : > { %v460_v36 = vsel %vm3922_vm6, 0, %v373_v55  ;;  %v3470_v58 = vcombine.low %v827_v41, %v4288_v6  ;;  %v3469_v61 = vcombine.low %v826_v24, %v4284_v53 }
  0x6c   : > { %v366_v19 = vor.u32 %v364_v0, %v363_v60  ;;  %v475_v20 = vsel %vm3922_vm6, %v363_v60, 0  ;;  %689 = vst.msk [vmem:[#allocation2 + $0x80] sm:$0x1] %vm218_vm1, %v3364_v37  ;;  %v1108_v0 = vor.u32 %v1107_v42, %v1103_v32  ;;  %v762_v60 = vld [vmem:[#allocation2 + $0x48] sm:$0xe]  ;;  %v2342_v3 = vrot.slane %v3516_v2, 1 }
  0x6d   : > { %1745 = vrot.lane.b32.xlu1 %v1614_v50, %s3868_s28  ;;  %v3361_v21 = vcombine.low %v475_v20, %v475_v20  ;;  %v1119_v50 = vrot.slane %v1117_v43, 1  ;;  %v1324_v20 = vrot.slane %v3422_v7, 1  ;;  %v1635_v32 = vshll.u32 %v4306_v25, 16 }
  0x6e   : > { %1743 = vrot.lane.b32.xlu0 %v1602_v39, %s3868_s28  ;;  %v459_v28 = vsel %vm3922_vm6, 0, %v366_v19  ;;  %v2114_v39 = vsel %vm1029_vm4, %v2109_v23, %v2113_v44  ;;  %v1113_v22 = vsel %vm1029_vm4, %v1108_v0, %v1112_v52  ;;  %v3421_v19 = vcombine.low %v762_v60, %v4203_v40  ;;  %v4332_v0 = vld [vmem:[#allocation2 + $0x64] sm:$0xf] }
  0x6f   : > { %v3359_v30 = vcombine.low %v459_v28, %v459_v28  ;;  %v3360_v31 = vcombine.high %v459_v28, %v459_v28  ;;  %686 = vst.msk [vmem:[#allocation2 + $0x74] sm:$0x1] %vm218_vm1, %v3361_v21  ;;  %v4302_v21 = vld [vmem:[#allocation2 + $0x5c] ss:$0 sps:$4 sm:$0x11]   ;;  %v2344_v40 = vsel %vm1302_vm2, %v2342_v3, %v2343_v14  ;;  %v375_v37 = vshrl.u32 %v3793_v26, 16 }
  0x70   : > { %v1321_v28 = vrot.slane %v3421_v19, 1  ;;  %v1623_v12 = vshll.u32 %v4302_v21, 16  ;;  %v3362_v42 = vcombine.low %v460_v36, %v460_v36  ;;  %v3363_v43 = vcombine.high %v460_v36, %v460_v36 }
  0x71   : > { %1873 = vrot.lane.b32.xlu1 %v1832_v45, %s3866_s24  ;;  %684 = vst.msk [vmem:[#allocation2 + $0x6c] sm:$0xf] %vm215_vm0, %v3359_v30  ;;  %685 = vst.msk [vmem:[#allocation2 + $0x70] sm:$0xf] %vm215_vm0, %v3360_v31  ;;  %v1120_v45 = vor.u32 %v1119_v50, %v1115_v59  ;;  %v1326_v30 = vsel %vm1302_vm2, %v1324_v20, %v1325_v56  ;;  %v378_v52 = vshll.u32 %v3793_v26, 16  ;;  %v1637_v50 = vrot.slane %v1635_v32, 1 }
  0x72   : > { %1871 = vrot.lane.b32.xlu0 %v1829_v1, %s3866_s24  ;;  %v784_v1 = vld [vmem:[#allocation2 + $0x54] sm:$0xf]  ;;  %v1323_v23 = vsel %vm1302_vm2, %v1321_v28, %v1322_v29  ;;  %687 = vst.msk [vmem:[#allocation2 + $0x78] sm:$0xf] %vm215_vm0, %v3362_v42  ;;  %688 = vst.msk [vmem:[#allocation2 + $0x7c] sm:$0xf] %vm215_vm0, %v3363_v43  ;;  %v4339_v7 = vcombine.low %v849_v49, %v4325_v4 }
  0x73   : > { %v1125_v27 = vsel %vm1029_vm4, %v1120_v45, %v1124_v33  ;;  %v377_v2 = vrot.slane %v375_v37, 7  ;;  %v1837_v45 = vrot.slane %v4306_v25, 1  ;;  %v1833_v33 = vrot.slane %v3469_v61, 1  ;;  %v4358_v56 = vld [vmem:[#allocation2 + $0x68] ss:$0 sps:$4 sm:$0x11]  }
  0x74   : > { %v1834_v19 = vrot.slane %v4302_v21, 1  ;;  %v2130_v25 = vshll.u32 %v4339_v7, 16  ;;  %v2128_v36 = vshrl.u32 %v4339_v7, 16  ;;  %v2135_v41 = vshll.u32 %v4358_v56, 16 }
  0x75   : > { %1985 = vrot.lane.b32.xlu1 %v4209_v46, %s3865_s21  ;;  %v786_v46 = vld [vmem:[#allocation2 + $0x60] sm:$0xf]  ;;  %v477_v60 = vsel %vm3922_vm6, %v377_v2, 0 }
  0x76   : > { %1983 = vrot.lane.b32.xlu0 %v4213_v5, %s3865_s21  ;;  %v4293_v5 = vcombine.low %v784_v1, %v4284_v53  ;;  %v3438_v11 = vcombine.low %v786_v46, %v4288_v6  ;;  %v1625_v46 = vrot.slane %v1623_v12, 1  ;;  %v380_v53 = vor.u32 %v378_v52, %v377_v2  ;;  %v3780_v49 = vld [vmem:[#allocation2 + $0x74] ss:$0 sps:$4 sm:$0x11]  }
  0x77   : > { %v3367_v3 = vcombine.low %v477_v60, %v477_v60  ;;  %v382_v12 = vshrl.u32 %v4347_v10, 16  ;;  %v1835_v24 = vsel %vm1302_vm2, %v1833_v33, %v1834_v19  ;;  %v2132_v37 = vrot.slane %v2130_v25, 1 }
  0x78   : > { %v1618_v51 = vshll.u32 %v4293_v5, 16  ;;  %v1630_v54 = vshll.u32 %v3438_v11, 16  ;;  %v1616_v31 = vshrl.u32 %v4293_v5, 16  ;;  %v1628_v15 = vshrl.u32 %v3438_v11, 16  ;;  %v851_v44 = vld [vmem:[#allocation2 + $0x6c] sm:$0xf] }
  0x79   : > { %2257 = vrot.lane.b32.xlu1 %v2126_v63, %s3869_s29  ;;  %v4323_v47 = vld [vmem:[#allocation2 + $0x70] sm:$0xf]  ;;  %v724_v63 = vld [vmem:[#allocation2 + $0x60] sm:$0xf]  ;;  %v726_v55 = vld [vmem:[#allocation2 + $0x6c] sm:$0xf] }
  0x7a   : > { %2255 = vrot.lane.b32.xlu0 %v2114_v39, %s3869_s29  ;;  %v1620_v34 = vrot.slane %v1618_v51, 1  ;;  %v1632_v35 = vrot.slane %v1630_v54, 1  ;;  %v4336_v1 = vcombine.low %v851_v44, %v4323_v47  ;;  %v4342_v6 = vcombine.low %v724_v63, %v4332_v0  ;;  %v4364_v26 = vld [vmem:[#allocation2 + $0x70] sm:$0xf]  ;;  %692 = vst.msk [vmem:[#allocation2 + $0x8c] sm:$0x1] %vm218_vm1, %v3367_v3 }
  0x7b   : > { %v4367_v54 = vld [vmem:[#allocation2 + $0x68] ss:$0 sps:$4 sm:$0x11]   ;;  %v765_v52 = vld [vmem:[#allocation2 + $0x6c] sm:$0xe]  ;;  %v1146_v33 = vshll.u32 %v3780_v49, 16 }
  0x7c   : > { %v1633_v59 = vor.u32 %v1632_v35, %v1628_v15  ;;  %v1621_v39 = vor.u32 %v1620_v34, %v1616_v31  ;;  %v2142_v20 = vshll.u32 %v4336_v1, 16  ;;  %v1129_v21 = vshll.u32 %v4342_v6, 16  ;;  %v891_v34 = vld [vmem:[#allocation2 + $0x60] sm:$0xe]  ;;  %v892_v15 = vld [vmem:[#allocation2 + $0x6c] sm:$0xe] }
  0x7d   : > { %1234 = vrot.lane.b32.xlu1 %v1113_v22, %s3863_s19  ;;  %v1836_v22 = vrot.slane %v3470_v58, 1  ;;  %v2140_v29 = vshrl.u32 %v4336_v1, 16  ;;  %v4378_v31 = vcombine.low %v726_v55, %v4364_v26  ;;  %v1127_v35 = vshrl.u32 %v4342_v6, 16  ;;  %v790_v19 = vld [vmem:[#allocation2 + $0x78] sm:$0xf] }
  0x7e   : > { %2383 = vrot.lane.b32.xlu0 %v2341_v13, %s3867_s27  ;;  %v4351_v13 = vld [vmem:[#allocation2 + $0x74] ss:$0 sps:$4 sm:$0x11]   ;;  %v1638_v14 = vsel %vm1029_vm4, %v1633_v59, %v1637_v50  ;;  %v1626_v51 = vsel %vm1029_vm4, %v1621_v39, %v1625_v46  ;;  %v1131_v42 = vrot.slane %v1129_v21, 1  ;;  %v1134_v43 = vshll.u32 %v4367_v54, 16 }
  0x7f   : > { %v2147_v28 = vshll.u32 %v4351_v13, 16  ;;  %v1141_v63 = vshll.u32 %v4378_v31, 16  ;;  %v384_v59 = vrot.slane %v382_v12, 7  ;;  %v385_v50 = vshll.u32 %v4347_v10, 16  ;;  %v788_v55 = vld [vmem:[#allocation2 + $0x6c] sm:$0xf] }
  0x80   : > { %v3517_v2 = vcombine.low %v891_v34, %v4325_v4  ;;  %v2133_v39 = vor.u32 %v2132_v37, %v2128_v36  ;;  %v2137_v46 = vrot.slane %v2135_v41, 1  ;;  %v1132_v60 = vor.u32 %v1131_v42, %v1127_v35  ;;  %v828_v37 = vld [vmem:[#allocation2 + $0x6c] sm:$0xe]  ;;  %v3813_v35 = vld [vmem:[%s3912_s17 + $0x60] sm:$0xff]  }
  0x81   : > { %1236 = vrot.lane.b32.xlu1 %v1125_v27, %s3863_s19  ;;  %v2149_v44 = vrot.slane %v2147_v28, 1  ;;  %v3424_v3 = vcombine.low %v765_v52, %v4364_v26  ;;  %v1139_v10 = vshrl.u32 %v4378_v31, 16  ;;  %v2346_v25 = vrot.slane %v4358_v56, 1  ;;  %v4410_v26 = vld [vmem:[#allocation2 + $0x70] sm:$0xf]  ;;  %v3826_v42 = vld [vmem:[%s3912_s17 + $0x68] sm:$0xff]  }
  0x82   : > { %2385 = vrot.lane.b32.xlu0 %v2344_v40, %s3867_s27  ;;  %v1838_v40 = vsel %vm1302_vm2, %v1836_v22, %v1837_v45  ;;  %v1136_v22 = vrot.slane %v1134_v43, 1  ;;  %v1331_v21 = vrot.slane %v3780_v49, 1  ;;  %v1148_v12 = vrot.slane %v1146_v33, 1  ;;  %v3831_v52 = vld [vmem:[%s3912_s17 + $0x70] sm:$0xff]  }
  0x83   : > { %v478_v49 = vsel %vm3922_vm6, %v384_v59, 0 }
  0x85   : > { %1365 = vrot.lane.b32.xlu1 %v1326_v30, %s3862_s18  ;;  %v2144_v30 = vrot.slane %v2142_v20, 1  ;;  %v4382_v32 = vpop.permute.xlu1 %1351  ;;  %v4406_v20 = vld [vmem:[#allocation2 + $0x7c] sm:$0xf] }
  0x86   : > { %1363 = vrot.lane.b32.xlu0 %v1323_v23, %s3862_s18  ;;  %v764_v23 = vld [vmem:[#allocation2 + $0x60] sm:$0xe]  ;;  %v4419_v56 = vcombine.low %v790_v19, %v4406_v20 }
  0x87   : > { %v2145_v61 = vor.u32 %v2144_v30, %v2140_v29  ;;  %v1328_v29 = vrot.slane %v4367_v54, 1 }
  0x89   : > { %1477 = vrot.lane.b32.xlu1 %v3438_v11, %s3864_s20  ;;  %v461_v11 = vsel %vm3922_vm6, 0, %v380_v53  ;;  %v3518_v53 = vcombine.low %v892_v15, %v4323_v47  ;;  %v2150_v4 = vsel %vm1029_vm4, %v2145_v61, %v2149_v44  ;;  %v1143_v47 = vrot.slane %v1141_v63, 1  ;;  %v4437_v44 = vld [vmem:[#allocation2 + $0x74] ss:$0 sps:$4 sm:$0x11]  }
  0x8a   : > { %1475 = vrot.lane.b32.xlu0 %v4293_v5, %s3864_s20  ;;  %v3365_v27 = vcombine.low %v461_v11, %v461_v11  ;;  %v3366_v5 = vcombine.high %v461_v11, %v461_v11  ;;  %v4390_v58 = vpop.permute.xlu0 %1222  ;;  %v387_v11 = vor.u32 %v385_v50, %v384_v59  ;;  %v1654_v50 = vshll.u32 %v4419_v56, 16 }
  0x8b   : > { %v1144_v30 = vor.u32 %v1143_v47, %v1139_v10  ;;  %v1652_v47 = vshrl.u32 %v4419_v56, 16  ;;  %v1647_v19 = vshll.u32 %v4437_v44, 16 }
  0x8c   : > { %690 = vst.msk [vmem:[#allocation2 + $0x84] sm:$0xf] %vm215_vm0, %v3365_v27  ;;  %691 = vst.msk [vmem:[#allocation2 + $0x88] sm:$0xf] %vm215_vm0, %v3366_v5  ;;  %v2348_v27 = vrot.slane %v3518_v53, 1  ;;  %v2349_v5 = vrot.slane %v4351_v13, 1 }
  0x8d   : > { %1749 = vrot.lane.b32.xlu1 %v1638_v14, %s3868_s28  ;;  %v3423_v14 = vcombine.low %v764_v23, %v4332_v0  ;;  %v4425_v13 = vld [vmem:[#allocation2 + $0x80] ss:$0 sps:$4 sm:$0x11]   ;;  %v462_v34 = vsel %vm3922_vm6, 0, %v387_v11  ;;  %v853_v11 = vld [vmem:[#allocation2 + $0x78] sm:$0xf] }
  0x8e   : > { %1747 = vrot.lane.b32.xlu0 %v1626_v51, %s3868_s28  ;;  %v2345_v51 = vrot.slane %v3517_v2, 1  ;;  %v3368_v41 = vcombine.low %v462_v34, %v462_v34  ;;  %v3369_v15 = vcombine.high %v462_v34, %v462_v34  ;;  %v2350_v23 = vsel %vm1302_vm2, %v2348_v27, %v2349_v5 }
  0x8f   : > { %v1327_v28 = vrot.slane %v3423_v14, 1  ;;  %v3370_v2 = vcombine.low %v478_v49, %v478_v49  ;;  %v1659_v53 = vshll.u32 %v4425_v13, 16  ;;  %v392_v14 = vshll.u32 %v3813_v35, 16 }
  0x90   : > { %v2347_v54 = vsel %vm1302_vm2, %v2345_v51, %v2346_v25  ;;  %693 = vst.msk [vmem:[#allocation2 + $0x90] sm:$0xf] %vm215_vm0, %v3368_v41  ;;  %694 = vst.msk [vmem:[#allocation2 + $0x94] sm:$0xf] %vm215_vm0, %v3369_v15  ;;  %v403_v51 = vshrl.u32 %v3831_v52, 16  ;;  %v1656_v25 = vrot.slane %v1654_v50, 1 }
  0x91   : > { %1877 = vrot.lane.b32.xlu1 %v1838_v40, %s3866_s24  ;;  %v1330_v40 = vrot.slane %v3424_v3, 1  ;;  %v1329_v63 = vsel %vm1302_vm2, %v1327_v28, %v1328_v29  ;;  %695 = vst.msk [vmem:[#allocation2 + $0x98] sm:$0x1] %vm218_vm1, %v3370_v2  ;;  %v389_v3 = vshrl.u32 %v3813_v35, 16  ;;  %v406_v27 = vshll.u32 %v3831_v52, 16 }
  0x92   : > { %1875 = vrot.lane.b32.xlu0 %v1835_v24, %s3866_s24  ;;  %v4423_v24 = vcombine.low %v788_v55, %v4410_v26  ;;  %v4464_v55 = vld [vmem:[#allocation2 + $0x7c] sm:$0xf]  ;;  %v1661_v5 = vrot.slane %v1659_v53, 1  ;;  %v4467_v28 = vrot.slane %v403_v51, 7  ;;  %v1657_v52 = vor.u32 %v1656_v25, %v1652_v47 }
  0x93   : > { %v1332_v61 = vsel %vm1302_vm2, %v1330_v40, %v1331_v21  ;;  %v1840_v47 = vrot.slane %v4437_v44, 1  ;;  %v1843_v51 = vrot.slane %v4425_v13, 1  ;;  %v4504_v25 = vld [vmem:[#allocation2 + $0x80] ss:$0 sps:$4 sm:$0x11]   ;;  %v2409_v44 = vsel %vm2407_vm8, %v3915_v8, %v4390_v58 }
  0x94   : > { %v1642_v59 = vshll.u32 %v4423_v24, 16  ;;  %v1640_v33 = vshrl.u32 %v4423_v24, 16  ;;  %v1662_v8 = vsel %vm1029_vm4, %v1657_v52, %v1661_v5 }
  0x95   : > { %1989 = vrot.lane.b32.xlu1 %v4336_v1, %s3865_s21  ;;  %v2138_v1 = vsel %vm1029_vm4, %v2133_v39, %v2137_v46  ;;  %v1149_v39 = vsel %vm1029_vm4, %v1144_v30, %v1148_v12  ;;  %v3471_v46 = vcombine.low %v828_v37, %v4410_v26  ;;  %v391_v26 = vrot.slane %v389_v3, 7  ;;  %v855_v30 = vld [vmem:[#allocation2 + $0x84] sm:$0xf]  ;;  %v4471_v12 = vld [vmem:[#allocation2 + $0x88] sm:$0xf] }
  0x96   : > { %v4398_v45 = vpop.permute.xlu1 %1465  ;;  %1987 = vrot.lane.b32.xlu0 %v4339_v7, %s3865_s21  ;;  %v1137_v7 = vsel %vm1029_vm4, %v1132_v60, %v1136_v22  ;;  %v4455_v22 = vld [vmem:[#allocation2 + $0x78] sm:$0xe]  ;;  %v1644_v21 = vrot.slane %v1642_v59, 1 }
  0x97   : > { %v1839_v40 = vrot.slane %v3471_v46, 1  ;;  %v394_v34 = vor.u32 %v392_v14, %v391_v26  ;;  %v3472_v35 = vcombine.low %v4455_v22, %v4406_v20  ;;  %v4492_v20 = vcombine.low %v855_v30, %v4471_v12  ;;  %v728_v59 = vld [vmem:[#allocation2 + $0x78] sm:$0xf]  ;;  %v4494_v46 = vld [vmem:[#allocation2 + $0x7c] sm:$0xf] }
  0x98   : > { %v4412_v0 = vpop.permute.xlu0 %1463  ;;  %v1645_v14 = vor.u32 %v1644_v21, %v1640_v33  ;;  %v4517_v13 = vcombine.low %v728_v59, %v4494_v46 }
  0x99   : > { %2261 = vrot.lane.b32.xlu1 %v2150_v4, %s3869_s29  ;;  %v396_v4 = vshrl.u32 %v3826_v42, 16  ;;  %v463_v50 = vsel %vm3922_vm6, 0, %v394_v34  ;;  %v1842_v33 = vrot.slane %v3472_v35, 1  ;;  %v2166_v58 = vshll.u32 %v4492_v20, 16  ;;  %v730_v34 = vld [vmem:[#allocation2 + $0x84] sm:$0xf] }
  0x9a   : > { %2259 = vrot.lane.b32.xlu0 %v2138_v1, %s3869_s29  ;;  %v399_v1 = vshll.u32 %v3826_v42, 16  ;;  %v4482_v42 = vcombine.low %v853_v11, %v4464_v55  ;;  %v3372_v53 = vcombine.high %v463_v50, %v463_v50  ;;  %v1841_v30 = vsel %vm1302_vm2, %v1839_v40, %v1840_v47  ;;  %v893_v47 = vld [vmem:[#allocation2 + $0x78] sm:$0xe] }
  0x9b   : > { %v4429_v36 = vpop.permute.xlu1 %1977  ;;  %v1158_v35 = vshll.u32 %v4504_v25, 16  ;;  %v481_v40 = vsel %vm3922_vm6, %v4467_v28, 0  ;;  %v1153_v52 = vshll.u32 %v4517_v13, 16 }
  0x9c   : > { %v4434_v43 = vpop.permute.xlu0 %1975  ;;  %697 = vst.msk [vmem:[#allocation2 + $0xa0] sm:$0xf] %vm215_vm0, %v3372_v53 }
  0x9d   : > { %1238 = vrot.lane.b32.xlu1 %v1137_v7, %s3863_s19  ;;  %v398_v7 = vrot.slane %v396_v4, 7  ;;  %v1649_v4 = vrot.slane %v1647_v19, 1  ;;  %v4514_v19 = vld [vmem:[#allocation2 + $0x8c] ss:$0 sps:$4 sm:$0x11]  }
  0x9e   : > { %2387 = vrot.lane.b32.xlu0 %v2347_v54, %s3867_s27  ;;  %v479_v54 = vsel %vm3922_vm6, %v391_v26, 0 }
  0x9f   : > { %v4453_v60 = vpop.permute.xlu1 %1353  ;;  %v401_v37 = vor.u32 %v399_v1, %v398_v7  ;;  %v480_v41 = vsel %vm3922_vm6, %v398_v7, 0  ;;  %v1650_v21 = vsel %vm1029_vm4, %v1645_v14, %v1649_v4 }
  0xa0   : > { %v4459_v10 = vpop.permute.xlu0 %1863  ;;  %v3376_v49 = vcombine.low %v480_v41, %v480_v41  ;;  %v2442_v41 = vsel %vm2440_vm9, %v2409_v44, %v4382_v32  ;;  %v1844_v32 = vsel %vm1302_vm2, %v1842_v33, %v1843_v51 }
  0xa1   : > { %1240 = vrot.lane.b32.xlu1 %v1149_v39, %s3863_s19  ;;  %v464_v2 = vsel %vm3922_vm6, 0, %v401_v37  ;;  %v408_v39 = vor.u32 %v406_v27, %v4467_v28  ;;  %v2164_v28 = vshrl.u32 %v4492_v20, 16 }
  0xa2   : > { %2389 = vrot.lane.b32.xlu0 %v2350_v23, %s3867_s27  ;;  %v3373_v23 = vcombine.low %v479_v54, %v479_v54  ;;  %v3374_v22 = vcombine.low %v464_v2, %v464_v2  ;;  %701 = vst.msk [vmem:[#allocation2 + $0xb0] sm:$0x1] %vm218_vm1, %v3376_v49  ;;  %v3375_v11 = vcombine.high %v464_v2, %v464_v2  ;;  %v4529_v54 = vld [vmem:[#allocation2 + $0x88] sm:$0xf]  ;;  %v2171_v49 = vshll.u32 %v4514_v19, 16 }
  0xa3   : > { %v4469_v29 = vpop.permute.xlu1 %1865  ;;  %v465_v26 = vsel %vm3922_vm6, 0, %v408_v39  ;;  %v2168_v2 = vrot.slane %v2166_v58, 1 }
  0xa4   : > { %v4477_v15 = vpop.permute.xlu0 %2375  ;;  %698 = vst.msk [vmem:[#allocation2 + $0xa4] sm:$0x1] %vm218_vm1, %v3373_v23  ;;  %v3377_v7 = vcombine.low %v465_v26, %v465_v26  ;;  %v3378_v37 = vcombine.high %v465_v26, %v465_v26  ;;  %v2173_v33 = vrot.slane %v2171_v49, 1  ;;  %v1155_v26 = vrot.slane %v1153_v52, 1  ;;  %v4592_v49 = vld [vmem:[#allocation2 + $0x88] sm:$0xf] }
  0xa5   : > { %1369 = vrot.lane.b32.xlu1 %v1332_v61, %s3862_s18  ;;  %v3371_v61 = vcombine.low %v463_v50, %v463_v50  ;;  %699 = vst.msk [vmem:[#allocation2 + $0xa8] sm:$0xf] %vm215_vm0, %v3374_v22  ;;  %700 = vst.msk [vmem:[#allocation2 + $0xac] sm:$0xf] %vm215_vm0, %v3375_v11  ;;  %v3379_v22 = vcombine.low %v481_v40, %v481_v40  ;;  %v1151_v11 = vshrl.u32 %v4517_v13, 16 }
  0xa6   : > { %1367 = vrot.lane.b32.xlu0 %v1329_v63, %s3862_s18  ;;  %v4499_v63 = vld [vmem:[#allocation2 + $0x80] ss:$0 sps:$4 sm:$0x11]   ;;  %702 = vst.msk [vmem:[#allocation2 + $0xb4] sm:$0xf] %vm215_vm0, %v3377_v7  ;;  %v3519_v7 = vcombine.low %v893_v47, %v4464_v55 }
  0xa7   : > { %v1738_v3 = vpop.permute.xlu1 %1737  ;;  %696 = vst.msk [vmem:[#allocation2 + $0x9c] sm:$0xf] %vm215_vm0, %v3371_v61  ;;  %v2159_v5 = vshll.u32 %v4499_v63, 16  ;;  %703 = vst.msk [vmem:[#allocation2 + $0xb8] sm:$0xf] %vm215_vm0, %v3378_v37  ;;  %v2152_v61 = vshrl.u32 %v4482_v42, 16 }
  0xa8   : > { %v4501_v1 = vpop.permute.xlu0 %2377  ;;  %v2352_v51 = vrot.slane %v4499_v63, 1  ;;  %704 = vst.msk [vmem:[#allocation2 + $0xbc] sm:$0x1] %vm218_vm1, %v3379_v22  ;;  %v2169_v63 = vor.u32 %v2168_v2, %v2164_v28  ;;  %v4601_v28 = vld [vmem:[#allocation2 + $0x94] sm:$0xf] }
  0xa9   : > { %1481 = vrot.lane.b32.xlu1 %v4419_v56, %s3864_s20  ;;  %v2154_v56 = vshll.u32 %v4482_v42, 16 }
  0xaa   : > { %1479 = vrot.lane.b32.xlu0 %v4423_v24, %s3864_s20  ;;  %v2174_v55 = vsel %vm1029_vm4, %v2169_v63, %v2173_v33  ;;  %v830_v33 = vld [vmem:[#allocation2 + $0x84] sm:$0xe]  ;;  %v857_v63 = vld [vmem:[#allocation2 + $0x90] sm:$0xf] }
  0xab   : > { %v2250_v27 = vpop.permute.xlu1 %2249  ;;  %v2156_v53 = vrot.slane %v2154_v56, 1 }
  0xac   : > { %v1225_v24 = vpop.permute.xlu0 %1224 }
  0xad   : > { %v2411_v23 = vsel %vm2407_vm8, %v3984_v38, %v1225_v24  ;;  %1753 = vrot.lane.b32.xlu1 %v1662_v8, %s3868_s28  ;;  %v4551_v38 = vcombine.low %v730_v34, %v4529_v54  ;;  %v4567_v8 = vld [vmem:[#allocation2 + $0x8c] ss:$0 sps:$4 sm:$0x11]   ;;  %v2161_v34 = vrot.slane %v2159_v5, 1  ;;  %v1160_v24 = vrot.slane %v1158_v35, 1 }
  0xae   : > { %v2444_v50 = vsel %vm2440_vm9, %v2411_v23, %v4453_v60  ;;  %1751 = vrot.lane.b32.xlu0 %v1650_v21, %s3868_s28  ;;  %v2475_v60 = vsel %vm2473_vm10, %v2442_v41, %v4412_v0  ;;  %v2157_v21 = vor.u32 %v2156_v53, %v2152_v61  ;;  %v894_v41 = vld [vmem:[#allocation2 + $0x84] sm:$0xe]  ;;  %v1170_v40 = vshll.u32 %v4567_v8, 16 }
  0xaf   : > { %v2477_v39 = vsel %vm2473_vm10, %v2444_v50, %v4398_v45  ;;  %v4555_v59 = vpop.permute.xlu1 %1226  ;;  %v1165_v58 = vshll.u32 %v4551_v38, 16  ;;  %v767_v23 = vld [vmem:[#allocation2 + $0x84] sm:$0xe]  ;;  %v794_v50 = vld [vmem:[#allocation2 + $0x90] sm:$0xf] }
  0xb0   : > { %v2510_v14 = vsel %vm2506_vm11, %v2477_v39, %v1738_v3  ;;  %v1736_v4 = vpop.permute.xlu0 %1735  ;;  %v2162_v52 = vsel %vm1029_vm4, %v2157_v21, %v2161_v34  ;;  %v766_v39 = vld [vmem:[#allocation2 + $0x78] sm:$0xe]  ;;  %v1172_v22 = vrot.slane %v1170_v40, 1  ;;  %v1334_v21 = vrot.slane %v4504_v25, 1 }
  0xb1   : > { %v2508_v44 = vsel %vm2506_vm11, %v2475_v60, %v1736_v4  ;;  %1881 = vrot.lane.b32.xlu1 %v1844_v32, %s3866_s24  ;;  %v2543_v45 = vsel %vm2539_vm12, %v2510_v14, %v4469_v29  ;;  %v1167_v5 = vrot.slane %v1165_v58, 1  ;;  %v792_v32 = vld [vmem:[#allocation2 + $0x84] sm:$0xf]  ;;  %v4614_v60 = vcombine.low %v794_v50, %v4601_v28  ;;  %v4626_v58 = vld [vmem:[#allocation2 + $0x94] sm:$0xf] }
  0xb2   : > { %v2541_v0 = vsel %vm2539_vm12, %v2508_v44, %v4459_v10  ;;  %1879 = vrot.lane.b32.xlu0 %v1841_v30, %s3866_s24  ;;  %v2576_v3 = vsel %vm2572_vm13, %v2543_v45, %v4429_v36  ;;  %v1156_v36 = vor.u32 %v1155_v26, %v1151_v11  ;;  %v4609_v61 = vcombine.low %v792_v32, %v4592_v49  ;;  %v3812_v26 = vld [vmem:[#allocation2 + $0x8c] ss:$0 sps:$4 sm:$0x11]   ;;  %v859_v32 = vld [vmem:[#allocation2 + $0x9c] sm:$0xf] }
  0xb3   : > { %v4576_v56 = vpop.permute.xlu1 %1228  ;;  %v2574_v29 = vsel %vm2572_vm13, %v2541_v0, %v4434_v43  ;;  %v2609_v10 = vsel %vm2605_vm14, %v2576_v3, %v2250_v27  ;;  %v1163_v27 = vshrl.u32 %v4551_v38, 16  ;;  %v2355_v11 = vrot.slane %v4514_v19, 1 }
  0xb4   : > { %v2248_v37 = vpop.permute.xlu0 %2247  ;;  %v1337_v45 = vrot.slane %v4567_v8, 1  ;;  %v1666_v3 = vshll.u32 %v4609_v61, 16  ;;  %v1676_v25 = vshrl.u32 %v4614_v60, 16 }
  0xb5   : > { %v2607_v30 = vsel %vm2605_vm14, %v2574_v29, %v2248_v37  ;;  %1993 = vrot.lane.b32.xlu1 %v4492_v20, %s3865_s21  ;;  %v3520_v20 = vcombine.low %v894_v41, %v4471_v12  ;;  %v3426_v12 = vcombine.low %v767_v23, %v4529_v54  ;;  %v1168_v53 = vor.u32 %v1167_v5, %v1163_v27  ;;  %v831_v37 = vld [vmem:[#allocation2 + $0x90] sm:$0xe] }
  0xb6   : > { %1991 = vrot.lane.b32.xlu0 %v4482_v42, %s3865_s21  ;;  %v2640_v43 = vsel %vm2638_vm15, %v2607_v30, %v4477_v15  ;;  %v2642_v42 = vsel %vm2638_vm15, %v2609_v10, %v4501_v1  ;;  %v2351_v15 = vrot.slane %v3519_v7, 1  ;;  %v1161_v1 = vsel %vm1029_vm4, %v1156_v36, %v1160_v24 }
  0xb7   : > { %3639 = vmatprep.mubr.msk.bf16.mxu0 %vm2691_vm3, %v2640_v43  ;;  %v4596_v35 = vpop.permute.xlu1 %1357  ;;  %v2354_v47 = vrot.slane %v3520_v20, 1  ;;  %v3425_v54 = vcombine.low %v766_v39, %v4494_v46  ;;  %v1336_v0 = vrot.slane %v3426_v12, 1  ;;  %v1173_v19 = vsel %vm1029_vm4, %v1168_v53, %v1172_v22  ;;  %v3842_v53 = vld [vmem:[%s3912_s17 + $0x78] sm:$0xff]  }
  0xb8   : > { %3640 = vmatmul.mubr.msk.bf16.vlgmr.msra.gmra.mrb[0].mxu0 %vm2691_vm3, %v2642_v42  ;;  %v4604_v2 = vpop.permute.xlu0 %1355  ;;  %v2353_v4 = vsel %vm1302_vm2, %v2351_v15, %v2352_v51  ;;  %v1678_v46 = vshll.u32 %v4614_v60, 16  ;;  %v3811_v51 = vld [vmem:[#allocation2 + $0x98] ss:$0 sps:$4 sm:$0x11]   ;;  %v4638_v41 = vcombine.low %v857_v63, %v4626_v58  ;;  %v3473_v10 = vcombine.low %v830_v33, %v4592_v49  ;;  %v4650_v49 = vld [vmem:[#allocation2 + $0xa0] sm:$0xf] }
  0xb9   : > { %2265 = vrot.lane.b32.xlu1 %v2174_v55, %s3869_s29  ;;  %v2356_v8 = vsel %vm1302_vm2, %v2354_v47, %v2355_v11  ;;  %v1333_v7 = vrot.slane %v3425_v54, 1  ;;  %v1664_v30 = vshrl.u32 %v4609_v61, 16  ;;  %v1668_v36 = vrot.slane %v1666_v3, 1  ;;  %v4653_v15 = vld [vmem:[#allocation2 + $0x94] sm:$0xf] }
  0xba   : > { %2263 = vrot.lane.b32.xlu0 %v2162_v52, %s3869_s29  ;;  %v1671_v24 = vshll.u32 %v3812_v26, 16  ;;  %v1338_v40 = vsel %vm1302_vm2, %v1336_v0, %v1337_v45  ;;  %v1680_v23 = vrot.slane %v1678_v46, 1  ;;  %v1683_v43 = vshll.u32 %v3811_v51, 16  ;;  %v732_v52 = vld [vmem:[#allocation2 + $0x90] sm:$0xf] }
  0xbb   : > { %v4616_v14 = vpop.permute.xlu1 %1469  ;;  %v1335_v27 = vsel %vm1302_vm2, %v1333_v7, %v1334_v21  ;;  %v3474_v5 = vcombine.low %v831_v37, %v4601_v28  ;;  %v2178_v42 = vshll.u32 %v4638_v41, 16  ;;  %v1669_v50 = vor.u32 %v1668_v36, %v1664_v30  ;;  %v4663_v45 = vld [vmem:[#allocation2 + $0x90] sm:$0xe]  ;;  %v4668_v3 = vld [vmem:[#allocation2 + $0x98] ss:$0 sps:$4 sm:$0x11]  }
  0xbc   : > { %v4621_v44 = vpop.permute.xlu0 %1467  ;;  %v1673_v39 = vrot.slane %v1671_v24, 1  ;;  %v1845_v12 = vrot.slane %v3473_v10, 1  ;;  %v1681_v22 = vor.u32 %v1680_v23, %v1676_v25  ;;  %v1685_v28 = vrot.slane %v1683_v43, 1  ;;  %v4684_v10 = vld [vmem:[#allocation2 + $0x98] ss:$0 sps:$4 sm:$0x11]  }
  0xbd   : > { %1242 = vrot.lane.b32.xlu1 %v1161_v1, %s3863_s19  ;;  %v1846_v1 = vrot.slane %v3812_v26, 1  ;;  %v1848_v11 = vrot.slane %v3474_v5, 1  ;;  %v1849_v54 = vrot.slane %v3811_v51, 1  ;;  %v4666_v33 = vcombine.low %v732_v52, %v4653_v15 }
  0xbe   : > { %2391 = vrot.lane.b32.xlu0 %v2353_v4, %s3867_s27  ;;  %v4659_v4 = vcombine.low %v859_v32, %v4650_v49  ;;  %v2176_v26 = vshrl.u32 %v4638_v41, 16  ;;  %v2180_v63 = vrot.slane %v2178_v42, 1  ;;  %v410_v51 = vshrl.u32 %v3842_v53, 16 }
  0xbf   : > { %v4631_v29 = vpop.permute.xlu1 %1741  ;;  %v1847_v46 = vsel %vm1302_vm2, %v1845_v12, %v1846_v1  ;;  %v2413_v7 = vsel %vm2407_vm8, %v4002_v62, %v4555_v59  ;;  %v1686_v21 = vsel %vm1029_vm4, %v1681_v22, %v1685_v28  ;;  %v1850_v24 = vsel %vm1302_vm2, %v1848_v11, %v1849_v54  ;;  %v734_v59 = vld [vmem:[#allocation2 + $0x9c] sm:$0xf] }
  0xc0   : > { %v4635_v34 = vpop.permute.xlu0 %1739  ;;  %v2190_v37 = vshll.u32 %v4659_v4, 16  ;;  %v2446_v30 = vsel %vm2440_vm9, %v2413_v7, %v4604_v2  ;;  %v1177_v62 = vshll.u32 %v4666_v33, 16  ;;  %v2181_v43 = vor.u32 %v2180_v63, %v2176_v26  ;;  %v4730_v63 = vld [vmem:[#allocation2 + $0xa4] ss:$0 sps:$4 sm:$0x11]  }
  0xc1   : > { %1244 = vrot.lane.b32.xlu1 %v1173_v19, %s3863_s19  ;;  %v1674_v19 = vsel %vm1029_vm4, %v1669_v50, %v1673_v39  ;;  %v2479_v25 = vsel %vm2473_vm10, %v2446_v30, %v4621_v44  ;;  %v1175_v2 = vshrl.u32 %v4666_v33, 16  ;;  %v2415_v5 = vsel %vm2407_vm8, %v4016_v16, %v4576_v56  ;;  %v896_v30 = vld [vmem:[#allocation2 + $0x9c] sm:$0xe] }
  0xc2   : > { %2393 = vrot.lane.b32.xlu0 %v2356_v8, %s3867_s27  ;;  %v4675_v8 = vld [vmem:[#allocation2 + $0xa4] ss:$0 sps:$4 sm:$0x11]   ;;  %v2188_v32 = vshrl.u32 %v4659_v4, 16  ;;  %v2192_v52 = vrot.slane %v2190_v37, 1  ;;  %v412_v39 = vrot.slane %v410_v51, 7  ;;  %v2448_v16 = vsel %vm2440_vm9, %v2415_v5, %v4596_v35 }
  0xc3   : > { %v4646_v55 = vpop.permute.xlu1 %1869  ;;  %v2195_v42 = vshll.u32 %v4675_v8, 16  ;;  %v1179_v12 = vrot.slane %v1177_v62, 1  ;;  %v1182_v1 = vshll.u32 %v4684_v10, 16  ;;  %v769_v5 = vld [vmem:[#allocation2 + $0x9c] sm:$0xe] }
  0xc4   : > { %v1868_v20 = vpop.permute.xlu0 %1867  ;;  %v482_v11 = vsel %vm3922_vm6, %v412_v39, 0 }
  0xc5   : > { %1373 = vrot.lane.b32.xlu1 %v1338_v40, %s3862_s18  ;;  %v3521_v40 = vcombine.low %v4663_v45, %v4626_v58  ;;  %v2512_v58 = vsel %vm2506_vm11, %v2479_v25, %v4635_v34  ;;  %v2197_v45 = vrot.slane %v2195_v42, 1  ;;  %v1180_v17 = vor.u32 %v1179_v12, %v1175_v2  ;;  %v796_v42 = vld [vmem:[#allocation2 + $0x9c] sm:$0xf] }
  0xc6   : > { %1371 = vrot.lane.b32.xlu0 %v1335_v27, %s3862_s18  ;;  %v2183_v27 = vshll.u32 %v4668_v3, 16  ;;  %v2545_v44 = vsel %vm2539_vm12, %v2512_v58, %v1868_v20  ;;  %v2481_v20 = vsel %vm2473_vm10, %v2448_v16, %v4616_v14  ;;  %v2193_v14 = vor.u32 %v2192_v52, %v2188_v32  ;;  %v798_v58 = vld [vmem:[#allocation2 + $0xa8] sm:$0xf]  ;;  %v4757_v32 = vld [vmem:[#allocation2 + $0xac] sm:$0xf] }
  0xc7   : > { %v4661_v47 = vpop.permute.xlu1 %1981  ;;  %v2514_v35 = vsel %vm2506_vm11, %v2481_v20, %v4631_v29 }
  0xc8   : > { %v1980_v0 = vpop.permute.xlu0 %1979  ;;  %v2547_v26 = vsel %vm2539_vm12, %v2514_v35, %v4646_v55  ;;  %v4780_v35 = vld [vmem:[#allocation2 + $0xb0] ss:$0 sps:$4 sm:$0x11]  }
  0xc9   : > { %1485 = vrot.lane.b32.xlu1 %v4614_v60, %s3864_s20  ;;  %v413_v60 = vshll.u32 %v3842_v53, 16  ;;  %v2578_v56 = vsel %vm2572_vm13, %v2545_v44, %v1980_v0  ;;  %v3382_v0 = vcombine.low %v482_v11, %v482_v11  ;;  %v2580_v51 = vsel %vm2572_vm13, %v2547_v26, %v4661_v47  ;;  %v4761_v44 = vld [vmem:[#allocation2 + $0xa0] sm:$0xf] }
  0xca   : > { %1483 = vrot.lane.b32.xlu0 %v4609_v61, %s3864_s20  ;;  %v4692_v61 = vld [vmem:[#allocation2 + $0xa0] sm:$0xf]  ;;  %v2358_v47 = vrot.slane %v4668_v3, 1  ;;  %v1343_v11 = vrot.slane %v4730_v63, 1  ;;  %v1340_v26 = vrot.slane %v4684_v10, 1 }
  0xcb   : > { %v2254_v36 = vpop.permute.xlu1 %2253  ;;  %v4709_v50 = vcombine.low %v734_v59, %v4692_v61  ;;  %v415_v28 = vor.u32 %v413_v60, %v412_v39  ;;  %707 = vst.msk [vmem:[#allocation2 + $0xc8] sm:$0x1] %vm218_vm1, %v3382_v0  ;;  %v1184_v59 = vrot.slane %v1182_v1, 1 }
  0xcc   : > { %v2252_v23 = vpop.permute.xlu0 %2251 }
  0xcd   : > { %1757 = vrot.lane.b32.xlu1 %v1686_v21, %s3868_s28  ;;  %v2611_v53 = vsel %vm2605_vm14, %v2578_v56, %v2252_v23  ;;  %v466_v29 = vsel %vm3922_vm6, 0, %v415_v28  ;;  %v2185_v21 = vrot.slane %v2183_v27, 1  ;;  %v768_v23 = vld [vmem:[#allocation2 + $0x90] sm:$0xe]  ;;  %v3522_v27 = vcombine.low %v896_v30, %v4650_v49  ;;  %v832_v30 = vld [vmem:[#allocation2 + $0x9c] sm:$0xe] }
  0xce   : > { %1755 = vrot.lane.b32.xlu0 %v1674_v19, %s3868_s28  ;;  %v1189_v19 = vshll.u32 %v4709_v50, 16  ;;  %v3380_v37 = vcombine.low %v466_v29, %v466_v29  ;;  %v3381_v55 = vcombine.high %v466_v29, %v466_v29  ;;  %v1185_v52 = vsel %vm1029_vm4, %v1180_v17, %v1184_v59 }
  0xcf   : > { %v4714_v34 = vpop.permute.xlu1 %1230  ;;  %v2186_v2 = vsel %vm1029_vm4, %v2181_v43, %v2185_v21  ;;  %v3427_v39 = vcombine.low %v768_v23, %v4653_v15  ;;  %v3428_v43 = vcombine.low %v769_v5, %v4692_v61  ;;  %v3444_v56 = vcombine.low %v798_v58, %v4757_v32  ;;  %v863_v21 = vld [vmem:[#allocation2 + $0xb4] sm:$0xf] }
  0xd0   : > { %v2380_v22 = vpop.permute.xlu0 %2379  ;;  %705 = vst.msk [vmem:[#allocation2 + $0xc0] sm:$0xf] %vm215_vm0, %v3380_v37  ;;  %706 = vst.msk [vmem:[#allocation2 + $0xc4] sm:$0xf] %vm215_vm0, %v3381_v55  ;;  %v1191_v25 = vrot.slane %v1189_v19, 1  ;;  %v2360_v20 = vrot.slane %v3522_v27, 1  ;;  %v3475_v23 = vcombine.low %v832_v30, %v4761_v44 }
  0xd1   : > { %v2644_v54 = vsel %vm2638_vm15, %v2611_v53, %v2380_v22  ;;  %1885 = vrot.lane.b32.xlu1 %v1850_v24, %s3866_s24  ;;  %v2357_v24 = vrot.slane %v3521_v40, 1  ;;  %v1187_v40 = vshrl.u32 %v4709_v50, 16  ;;  %v2361_v53 = vrot.slane %v4675_v8, 1  ;;  %v4789_v37 = vld [vmem:[#allocation2 + $0xb8] sm:$0xf] }
  0xd2   : > { %1883 = vrot.lane.b32.xlu0 %v1847_v46, %s3866_s24  ;;  %3643 = vmatprep.mubr.msk.bf16.mxu0 %vm2691_vm3, %v2644_v54  ;;  %v2613_v46 = vsel %vm2605_vm14, %v2580_v51, %v2254_v36  ;;  %v2198_v36 = vsel %vm1029_vm4, %v2193_v14, %v2197_v45  ;;  %v3443_v22 = vcombine.low %v796_v42, %v4761_v44  ;;  %v1342_v61 = vrot.slane %v3428_v43, 1  ;;  %v4786_v14 = vld [vmem:[#allocation2 + $0xa4] ss:$0 sps:$4 sm:$0x11]   ;;  %v833_v51 = vld [vmem:[#allocation2 + $0xa8] sm:$0xe] }
  0xd3   : > { %v4737_v7 = vpop.permute.xlu1 %1232  ;;  %v1192_v49 = vor.u32 %v1191_v25, %v1187_v40  ;;  %v2359_v1 = vsel %vm1302_vm2, %v2357_v24, %v2358_v47  ;;  %v1702_v54 = vshll.u32 %v3444_v56, 16  ;;  %v2362_v8 = vsel %vm1302_vm2, %v2360_v20, %v2361_v53  ;;  %v861_v40 = vld [vmem:[#allocation2 + $0xa8] sm:$0xf]  ;;  %v4801_v25 = vld [vmem:[#allocation2 + $0xac] sm:$0xf] }
  0xd4   : > { %v2382_v60 = vpop.permute.xlu0 %2381  ;;  %v1339_v0 = vrot.slane %v3427_v39, 1  ;;  %v1690_v19 = vshll.u32 %v3443_v22, 16  ;;  %v1700_v55 = vshrl.u32 %v3444_v56, 16  ;;  %v1695_v59 = vshll.u32 %v4786_v14, 16  ;;  %v736_v39 = vld [vmem:[#allocation2 + $0xa8] sm:$0xf] }
  0xd5   : > { %v2646_v62 = vsel %vm2638_vm15, %v2613_v46, %v2382_v60  ;;  %1997 = vrot.lane.b32.xlu1 %v4659_v4, %s3865_s21  ;;  %v1194_v4 = vshll.u32 %v4730_v63, 16  ;;  %v1344_v63 = vsel %vm1302_vm2, %v1342_v61, %v1343_v11  ;;  %v1704_v46 = vrot.slane %v1702_v54, 1  ;;  %v4814_v43 = vld [vmem:[#allocation2 + $0xbc] ss:$0 sps:$4 sm:$0x11]  }
  0xd6   : > { %1995 = vrot.lane.b32.xlu0 %v4638_v41, %s3865_s21  ;;  %3644 = vmatmul.mubr.msk.bf16.gmra.mrb[4].mxu0 %vm2691_vm3, %v2646_v62  ;;  %v1707_v60 = vshll.u32 %v4780_v35, 16  ;;  %v1341_v24 = vsel %vm1302_vm2, %v1339_v0, %v1340_v26  ;;  %v1688_v62 = vshrl.u32 %v3443_v22, 16  ;;  %v1692_v17 = vrot.slane %v1690_v19, 1  ;;  %v4825_v11 = vld [vmem:[#allocation2 + $0xb0] ss:$0 sps:$4 sm:$0x11]  }
  0xd7   : > { %v4754_v3 = vpop.permute.xlu1 %1361  ;;  %v1196_v16 = vrot.slane %v1194_v4, 1  ;;  %v3476_v4 = vcombine.low %v833_v51, %v4757_v32  ;;  %v1705_v27 = vor.u32 %v1704_v46, %v1700_v55  ;;  %v1697_v42 = vrot.slane %v1695_v59, 1  ;;  %v738_v26 = vld [vmem:[#allocation2 + $0xb4] sm:$0xf]  ;;  %v897_v30 = vld [vmem:[#allocation2 + $0xa8] sm:$0xe] }
  0xd8   : > { %v4759_v41 = vpop.permute.xlu0 %1359  ;;  %v1693_v58 = vor.u32 %v1692_v17, %v1688_v62  ;;  %v1851_v20 = vrot.slane %v3475_v23, 1  ;;  %v1852_v53 = vrot.slane %v4786_v14, 1  ;;  %v4834_v14 = vld [vmem:[#allocation2 + $0xb8] sm:$0xf]  ;;  %v2219_v51 = vshll.u32 %v4814_v43, 16 }
  0xd9   : > { %2269 = vrot.lane.b32.xlu1 %v2198_v36, %s3869_s29  ;;  %v1197_v15 = vsel %vm1029_vm4, %v1192_v49, %v1196_v16  ;;  %v4799_v36 = vcombine.low %v863_v21, %v4789_v37  ;;  %v4812_v49 = vld [vmem:[#allocation2 + $0xac] sm:$0xf]  ;;  %v1854_v44 = vrot.slane %v3476_v4, 1  ;;  %v4845_v46 = vld [vmem:[#allocation2 + $0xb0] ss:$0 sps:$4 sm:$0x11]  }
  0xda   : > { %2267 = vrot.lane.b32.xlu0 %v2186_v2, %s3869_s29  ;;  %v1709_v2 = vrot.slane %v1707_v60, 1  ;;  %v4828_v54 = vcombine.low %v736_v39, %v4812_v49 }
  0xdb   : > { %v4769_v12 = vpop.permute.xlu1 %1473  ;;  %v2214_v32 = vshll.u32 %v4799_v36, 16 }
  0xdc   : > { %v4774_v28 = vpop.permute.xlu0 %1471  ;;  %v1710_v61 = vsel %vm1029_vm4, %v1705_v27, %v1709_v2  ;;  %v2221_v27 = vrot.slane %v2219_v51, 1  ;;  %v802_v51 = vld [vmem:[#allocation2 + $0xc0] sm:$0xf] }
  0xdd   : > { %1246 = vrot.lane.b32.xlu1 %v1185_v52, %s3863_s19  ;;  %v4810_v52 = vcombine.low %v861_v40, %v4801_v25  ;;  %v2216_v19 = vrot.slane %v2214_v32, 1  ;;  %v4876_v32 = vld [vmem:[#allocation2 + $0xbc] ss:$0 sps:$4 sm:$0x11]  }
  0xde   : > { %2395 = vrot.lane.b32.xlu0 %v2359_v1, %s3867_s27  ;;  %v1855_v1 = vrot.slane %v4780_v35, 1 }
  0xdf   : > { %v4782_v45 = vpop.permute.xlu1 %1745  ;;  %v2202_v0 = vshll.u32 %v4810_v52, 16  ;;  %v2200_v55 = vshrl.u32 %v4810_v52, 16 }
  0xe0   : > { %v1744_v29 = vpop.permute.xlu0 %1743 }
  0xe1   : > { %1248 = vrot.lane.b32.xlu1 %v1197_v15, %s3863_s19  ;;  %v2417_v15 = vsel %vm2407_vm8, %v4116_v48, %v4714_v34  ;;  %v2204_v40 = vrot.slane %v2202_v0, 1 }
  0xe2   : > { %2397 = vrot.lane.b32.xlu0 %v2362_v8, %s3867_s27  ;;  %v1698_v8 = vsel %vm1029_vm4, %v1693_v58, %v1697_v42  ;;  %v1206_v58 = vshll.u32 %v4845_v46, 16  ;;  %v3523_v42 = vcombine.low %v897_v30, %v4801_v25 }
  0xe3   : > { %v4794_v10 = vpop.permute.xlu1 %1873  ;;  %v2205_v25 = vor.u32 %v2204_v40, %v2200_v55  ;;  %v801_v55 = vld [vmem:[#allocation2 + $0xb8] sm:$0xf] }
  0xe4   : > { %v1872_v47 = vpop.permute.xlu0 %1871  ;;  %v1208_v0 = vrot.slane %v1206_v58, 1 }
  0xe5   : > { %1377 = vrot.lane.b32.xlu1 %v1344_v63, %s3862_s18  ;;  %v1853_v63 = vsel %vm1302_vm2, %v1851_v20, %v1852_v53 }
  0xe6   : > { %1375 = vrot.lane.b32.xlu0 %v1341_v24, %s3862_s18  ;;  %v4854_v24 = vcombine.low %v738_v26, %v4834_v14  ;;  %v2363_v26 = vrot.slane %v3523_v42, 1 }
  0xe7   : > { %v4807_v5 = vpop.permute.xlu1 %1985 }
  0xe8   : > { %v1984_v16 = vpop.permute.xlu0 %1983 }
  0xe9   : > { %1489 = vrot.lane.b32.xlu1 %v3444_v56, %s3864_s20  ;;  %v2450_v56 = vsel %vm2440_vm9, %v2417_v15, %v4759_v41  ;;  %v1856_v41 = vsel %vm1302_vm2, %v1854_v44, %v1855_v1  ;;  %v2364_v15 = vrot.slane %v4825_v11, 1 }
  0xea   : > { %1487 = vrot.lane.b32.xlu0 %v3443_v22, %s3864_s20  ;;  %v2483_v48 = vsel %vm2473_vm10, %v2450_v56, %v4774_v28  ;;  %v2212_v22 = vshrl.u32 %v4799_v36, 16  ;;  %v2419_v28 = vsel %vm2407_vm8, %v4133_v9, %v4737_v7  ;;  %v2207_v9 = vshll.u32 %v4825_v11, 16 }
  0xeb   : > { %v2258_v35 = vpop.permute.xlu1 %2257  ;;  %v2516_v21 = vsel %vm2506_vm11, %v2483_v48, %v1744_v29  ;;  %v1201_v29 = vshll.u32 %v4828_v54, 16  ;;  %v2452_v62 = vsel %vm2440_vm9, %v2419_v28, %v4754_v3  ;;  %v1218_v11 = vshll.u32 %v4876_v32, 16 }
  0xec   : > { %v2256_v34 = vpop.permute.xlu0 %2255  ;;  %v2549_v60 = vsel %vm2539_vm12, %v2516_v21, %v1872_v47  ;;  %v2485_v7 = vsel %vm2473_vm10, %v2452_v62, %v4769_v12  ;;  %v2217_v23 = vor.u32 %v2216_v19, %v2212_v22  ;;  %v1199_v12 = vshrl.u32 %v4828_v54, 16  ;;  %v4898_v21 = vld [vmem:[#allocation2 + $0xc4] sm:$0xf] }
  0xed   : > { %1761 = vrot.lane.b32.xlu1 %v1710_v61, %s3868_s28  ;;  %v2582_v17 = vsel %vm2572_vm13, %v2549_v60, %v1984_v16  ;;  %v2518_v2 = vsel %vm2506_vm11, %v2485_v7, %v4782_v45  ;;  %v1203_v16 = vrot.slane %v1201_v29, 1  ;;  %v1213_v45 = vshll.u32 %v4854_v24, 16  ;;  %v898_v61 = vld [vmem:[#allocation2 + $0xb4] sm:$0xe] }
  0xee   : > { %1759 = vrot.lane.b32.xlu0 %v1698_v8, %s3868_s28  ;;  %v2615_v47 = vsel %vm2605_vm14, %v2582_v17, %v2256_v34  ;;  %v2551_v39 = vsel %vm2539_vm12, %v2518_v2, %v4794_v10  ;;  %v2209_v20 = vrot.slane %v2207_v9, 1  ;;  %v2222_v8 = vsel %vm1029_vm4, %v2217_v23, %v2221_v27  ;;  %v771_v34 = vld [vmem:[#allocation2 + $0xb4] sm:$0xe]  ;;  %v4916_v2 = vld [vmem:[#allocation2 + $0xc8] ss:$0 sps:$4 sm:$0x11]  }
  0xef   : > { %v4859_v59 = vpop.permute.xlu1 %1234  ;;  %v2584_v44 = vsel %vm2572_vm13, %v2551_v39, %v4807_v5  ;;  %v1204_v5 = vor.u32 %v1203_v16, %v1199_v12  ;;  %v1215_v48 = vrot.slane %v1213_v45, 1  ;;  %v3524_v19 = vcombine.low %v898_v61, %v4789_v37  ;;  %v3846_v39 = vld [vmem:[#allocation2 + $0xbc] ss:$0 sps:$4 sm:$0x11]   ;;  %v867_v45 = vld [vmem:[#allocation2 + $0xcc] sm:$0xf] }
  0xf0   : > { %v2384_v4 = vpop.permute.xlu0 %2383  ;;  %v2617_v10 = vsel %vm2605_vm14, %v2584_v44, %v2258_v35  ;;  %v1211_v35 = vshrl.u32 %v4854_v24, 16  ;;  %v2365_v28 = vsel %vm1302_vm2, %v2363_v26, %v2364_v15  ;;  %v3430_v60 = vcombine.low %v771_v34, %v4834_v14  ;;  %v4923_v44 = vld [vmem:[#allocation2 + $0xd0] sm:$0xf] }
  0xf1   : > { %v2648_v3 = vsel %vm2638_vm15, %v2615_v47, %v2384_v4  ;;  %1889 = vrot.lane.b32.xlu1 %v1856_v41, %s3866_s24  ;;  %v1209_v29 = vsel %vm1029_vm4, %v1204_v5, %v1208_v0  ;;  %v1220_v37 = vrot.slane %v1218_v11, 1  ;;  %v3446_v62 = vcombine.low %v802_v51, %v4898_v21  ;;  %v835_v0 = vld [vmem:[#allocation2 + $0xc0] sm:$0xe] }
  0xf2   : > { %1887 = vrot.lane.b32.xlu0 %v1853_v63, %s3866_s24  ;;  %3647 = vmatprep.mubr.msk.bf16.mxu0 %vm2691_vm3, %v2648_v3  ;;  %v800_v63 = vld [vmem:[#allocation2 + $0xb4] sm:$0xf]  ;;  %v1216_v30 = vor.u32 %v1215_v48, %v1211_v35  ;;  %v2366_v40 = vrot.slane %v3524_v19, 1  ;;  %v2367_v9 = vrot.slane %v4814_v43, 1  ;;  %v1348_v23 = vrot.slane %v3430_v60, 1 }
  0xf3   : > { %v4881_v1 = vpop.permute.xlu1 %1236  ;;  %v3445_v47 = vcombine.low %v800_v63, %v801_v55  ;;  %v1349_v27 = vrot.slane %v4876_v32, 1  ;;  %v1726_v3 = vshll.u32 %v3446_v62, 16  ;;  %v865_v5 = vld [vmem:[#allocation2 + $0xc0] sm:$0xf]  ;;  %v4931_v35 = vld [vmem:[#allocation2 + $0xc4] sm:$0xf]  ;;  %v4935_v11 = vcombine.low %v867_v45, %v4923_v44 }
  0xf4   : > { %v2386_v53 = vpop.permute.xlu0 %2385  ;;  %v1221_v14 = vsel %vm1029_vm4, %v1216_v30, %v1220_v37  ;;  %v2368_v43 = vsel %vm1302_vm2, %v2366_v40, %v2367_v9  ;;  %v3478_v19 = vcombine.low %v835_v0, %v4898_v21  ;;  %v1858_v30 = vrot.slane %v3846_v39, 1 }
  0xf5   : > { %v2650_v56 = vsel %vm2638_vm15, %v2617_v10, %v2386_v53  ;;  %2001 = vrot.lane.b32.xlu1 %v4799_v36, %s3865_s21  ;;  %v2210_v36 = vsel %vm1029_vm4, %v2205_v25, %v2209_v20  ;;  %v1714_v12 = vshll.u32 %v3445_v47, 16  ;;  %v1350_v32 = vsel %vm1302_vm2, %v1348_v23, %v1349_v27  ;;  %v834_v53 = vld [vmem:[#allocation2 + $0xb4] sm:$0xe] }
  0xf6   : > { %1999 = vrot.lane.b32.xlu0 %v4810_v52, %s3865_s21  ;;  %3648 = vmatmul.mubr.msk.bf16.gmra.mrb[8].mxu0 %vm2691_vm3, %v2650_v56  ;;  %v770_v52 = vld [vmem:[#allocation2 + $0xa8] sm:$0xe]  ;;  %v1724_v25 = vshrl.u32 %v3446_v62, 16  ;;  %v1728_v20 = vrot.slane %v1726_v3, 1  ;;  %v1731_v10 = vshll.u32 %v4916_v2, 16  ;;  %v1712_v61 = vshrl.u32 %v3445_v47, 16 }
  0xf7   : > { %v4894_v22 = vpop.permute.xlu1 %1365  ;;  %v3429_v7 = vcombine.low %v770_v52, %v4812_v49  ;;  %v1346_v49 = vrot.slane %v4845_v46, 1  ;;  %v1716_v56 = vrot.slane %v1714_v12, 1  ;;  %v3477_v48 = vcombine.low %v834_v53, %v801_v55  ;;  %v4941_v55 = vld [vmem:[#allocation2 + $0xd4] ss:$0 sps:$4 sm:$0x11]  }
  0xf8   : > { %v4900_v41 = vpop.permute.xlu0 %1363  ;;  %v1729_v34 = vor.u32 %v1728_v20, %v1724_v25  ;;  %v2238_v37 = vshll.u32 %v4935_v11, 16  ;;  %v2421_v40 = vsel %vm2407_vm8, %v4223_v57, %v4859_v59  ;;  %v1860_v9 = vrot.slane %v3478_v19, 1 }
  0xf9   : > { %2273 = vrot.lane.b32.xlu1 %v2222_v8, %s3869_s29  ;;  %v1345_v42 = vrot.slane %v3429_v7, 1  ;;  %v1719_v8 = vshll.u32 %v3846_v39, 16  ;;  %v1717_v52 = vor.u32 %v1716_v56, %v1712_v61  ;;  %v1861_v7 = vrot.slane %v4916_v2, 1 }
  0xfa   : > { %2271 = vrot.lane.b32.xlu0 %v2210_v36, %s3869_s29  ;;  %v1733_v36 = vrot.slane %v1731_v10, 1  ;;  %v2236_v57 = vshrl.u32 %v4935_v11, 16  ;;  %v2240_v2 = vrot.slane %v2238_v37, 1  ;;  %v900_v10 = vld [vmem:[#allocation2 + $0xcc] sm:$0xe] }
  0xfb   : > { %v4908_v17 = vpop.permute.xlu1 %1477  ;;  %v1347_v46 = vsel %vm1302_vm2, %v1345_v42, %v1346_v49  ;;  %v1721_v63 = vrot.slane %v1719_v8, 1  ;;  %v2243_v49 = vshll.u32 %v4941_v55, 16  ;;  %v3526_v0 = vcombine.low %v900_v10, %v4923_v44 }
  0xfc   : > { %v1476_v4 = vpop.permute.xlu0 %1475  ;;  %v1734_v21 = vsel %vm1029_vm4, %v1729_v34, %v1733_v36  ;;  %v2241_v8 = vor.u32 %v2240_v2, %v2236_v57 }
  0xfd   : > { %1250 = vrot.lane.b32.xlu1 %v1209_v29, %s3863_s19  ;;  %v1857_v29 = vrot.slane %v3477_v48, 1  ;;  %v1722_v27 = vsel %vm1029_vm4, %v1717_v52, %v1721_v63  ;;  %v2373_v52 = vrot.slane %v4941_v55, 1 }
  0xfe   : > { %2399 = vrot.lane.b32.xlu0 %v2365_v28, %s3867_s27  ;;  %v3493_v28 = vcombine.low %v865_v5, %v4931_v35 }
  0xff   : > { %v4918_v58 = vpop.permute.xlu1 %1749 }
 0x100   : > { %v1748_v16 = vpop.permute.xlu0 %1747  ;;  %v2226_v3 = vshll.u32 %v3493_v28, 16  ;;  %v2224_v25 = vshrl.u32 %v3493_v28, 16 }
 0x101   : > { %1252 = vrot.lane.b32.xlu1 %v1221_v14, %s3863_s19  ;;  %v3850_v14 = vld [vmem:[#allocation2 + $0xc8] ss:$0 sps:$4 sm:$0x11]  }
 0x102   : > { %2401 = vrot.lane.b32.xlu0 %v2368_v43, %s3867_s27  ;;  %v2231_v12 = vshll.u32 %v3850_v14, 16  ;;  %v2228_v20 = vrot.slane %v2226_v3, 1 }
 0x103   : > { %v4928_v15 = vpop.permute.xlu1 %1877 }
 0x104   : > { %v1876_v26 = vpop.permute.xlu0 %1875  ;;  %v2229_v48 = vor.u32 %v2228_v20, %v2224_v25 }
 0x105   : > { %1381 = vrot.lane.b32.xlu1 %v1350_v32, %s3862_s18 }
 0x106   : > { %1379 = vrot.lane.b32.xlu0 %v1347_v46, %s3862_s18  ;;  %v899_v46 = vld [vmem:[#allocation2 + $0xc0] sm:$0xe] }
 0x107   : > { %v1990_v51 = vpop.permute.xlu1 %1989  ;;  %v3525_v34 = vcombine.low %v899_v46, %v4931_v35 }
 0x108   : > { %v1988_v60 = vpop.permute.xlu0 %1987 }
 0x109   : > { %1493 = vrot.lane.b32.xlu1 %v3446_v62, %s3864_s20  ;;  %v2454_v62 = vsel %vm2440_vm9, %v2421_v40, %v4900_v41  ;;  %v2423_v41 = vsel %vm2407_vm8, %v4253_v18, %v4881_v1 }
 0x10a   : > { %1491 = vrot.lane.b32.xlu0 %v3445_v47, %s3864_s20  ;;  %v2487_v43 = vsel %vm2473_vm10, %v2454_v62, %v1476_v4  ;;  %v1859_v47 = vsel %vm1302_vm2, %v1857_v29, %v1858_v30  ;;  %v1862_v4 = vsel %vm1302_vm2, %v1860_v9, %v1861_v7  ;;  %v2370_v29 = vrot.slane %v3850_v14, 1 }
 0x10b   : > { %v2262_v23 = vpop.permute.xlu1 %2261  ;;  %v2520_v59 = vsel %vm2506_vm11, %v2487_v43, %v1748_v16  ;;  %v2456_v16 = vsel %vm2440_vm9, %v2423_v41, %v4894_v22 }
 0x10c   : > { %v2260_v42 = vpop.permute.xlu0 %2259  ;;  %v2553_v39 = vsel %vm2539_vm12, %v2520_v59, %v1876_v26  ;;  %v2489_v53 = vsel %vm2473_vm10, %v2456_v16, %v4908_v17  ;;  %v2245_v17 = vrot.slane %v2243_v49, 1 }
 0x10d   : > { %1765 = vrot.lane.b32.xlu1 %v1734_v21, %s3868_s28  ;;  %v2586_v45 = vsel %vm2572_vm13, %v2553_v39, %v1988_v60  ;;  %v2522_v61 = vsel %vm2506_vm11, %v2489_v53, %v4918_v58  ;;  %v2233_v58 = vrot.slane %v2231_v12, 1  ;;  %v2369_v60 = vrot.slane %v3525_v34, 1 }
 0x10e   : > { %1763 = vrot.lane.b32.xlu0 %v1722_v27, %s3868_s28  ;;  %v2619_v18 = vsel %vm2605_vm14, %v2586_v45, %v2260_v42  ;;  %v2555_v22 = vsel %vm2539_vm12, %v2522_v61, %v4928_v15  ;;  %v2246_v44 = vsel %vm1029_vm4, %v2241_v8, %v2245_v17 }
 0x10f   : > { %v1239_v32 = vpop.permute.xlu1 %1238  ;;  %v2588_v26 = vsel %vm2572_vm13, %v2555_v22, %v1990_v51  ;;  %v2372_v51 = vrot.slane %v3526_v0, 1  ;;  %v2234_v35 = vsel %vm1029_vm4, %v2229_v48, %v2233_v58  ;;  %v2371_v37 = vsel %vm1302_vm2, %v2369_v60, %v2370_v29 }
 0x110   : > { %v2388_v1 = vpop.permute.xlu0 %2387  ;;  %v2621_v36 = vsel %vm2605_vm14, %v2588_v26, %v2262_v23  ;;  %v2425_v23 = vsel %vm2407_vm8, %v4342_v6, %v1239_v32 }
 0x111   : > { %v2652_v56 = vsel %vm2638_vm15, %v2619_v18, %v2388_v1  ;;  %1893 = vrot.lane.b32.xlu1 %v1862_v4, %s3866_s24 }
 0x112   : > { %1891 = vrot.lane.b32.xlu0 %v1859_v47, %s3866_s24  ;;  %3651 = vmatprep.mubr.msk.bf16.mxu0 %vm2691_vm3, %v2652_v56 }
 0x113   : > { %v1241_v5 = vpop.permute.xlu1 %1240 }
 0x114   : > { %v2390_v19 = vpop.permute.xlu0 %2389  ;;  %v2427_v59 = vsel %vm2407_vm8, %v4378_v31, %v1241_v5 }
 0x115   : > { %v2654_v15 = vsel %vm2638_vm15, %v2621_v36, %v2390_v19  ;;  %2005 = vrot.lane.b32.xlu1 %v4935_v11, %s3865_s21  ;;  %v2374_v11 = vsel %vm1302_vm2, %v2372_v51, %v2373_v52 }
 0x116   : > { %2003 = vrot.lane.b32.xlu0 %v3493_v28, %s3865_s21  ;;  %3652 = vmatmul.mubr.msk.bf16.gmra.mrb[12].mxu0 %vm2691_vm3, %v2654_v15 }
 0x117   : > { %v1370_v63 = vpop.permute.xlu1 %1369 }
 0x118   : > { %v1368_v30 = vpop.permute.xlu0 %1367  ;;  %v2460_v2 = vsel %vm2440_vm9, %v2427_v59, %v1370_v63 }
 0x119   : > { %2277 = vrot.lane.b32.xlu1 %v2246_v44, %s3869_s29  ;;  %v2458_v27 = vsel %vm2440_vm9, %v2425_v23, %v1368_v30 }
 0x11a   : > { %2275 = vrot.lane.b32.xlu0 %v2234_v35, %s3869_s29 }
 0x11b   : > { %v1482_v28 = vpop.permute.xlu1 %1481 }
 0x11c   : > { %v1480_v40 = vpop.permute.xlu0 %1479  ;;  %v2493_v6 = vsel %vm2473_vm10, %v2460_v2, %v1482_v28 }
 0x11d   : > { %2405 = vrot.lane.b32.xlu1 %v2374_v11, %s3867_s27  ;;  %v2491_v43 = vsel %vm2473_vm10, %v2458_v27, %v1480_v40 }
 0x11e   : > { %2403 = vrot.lane.b32.xlu0 %v2371_v37, %s3867_s27 }
 0x11f   : > { %v1754_v55 = vpop.permute.xlu1 %1753 }
 0x120   : > { %v1752_v21 = vpop.permute.xlu0 %1751  ;;  %v2526_v12 = vsel %vm2506_vm11, %v2493_v6, %v1754_v55 }
 0x121   : > { %v2524_v57 = vsel %vm2506_vm11, %v2491_v43, %v1752_v21 }
 0x123   : > { %v1882_v9 = vpop.permute.xlu1 %1881 }
 0x124   : > { %v1880_v7 = vpop.permute.xlu0 %1879  ;;  %v2559_v45 = vsel %vm2539_vm12, %v2526_v12, %v1882_v9 }
 0x125   : > { %v2557_v47 = vsel %vm2539_vm12, %v2524_v57, %v1880_v7 }
 0x127   : > { %v1994_v14 = vpop.permute.xlu1 %1993 }
 0x128   : > { %v1992_v62 = vpop.permute.xlu0 %1991  ;;  %v2592_v31 = vsel %vm2572_vm13, %v2559_v45, %v1994_v14 }
 0x129   : > { %v2590_v49 = vsel %vm2572_vm13, %v2557_v47, %v1992_v62 }
 0x12b   : > { %v2266_v3 = vpop.permute.xlu1 %2265 }
 0x12c   : > { %v2264_v42 = vpop.permute.xlu0 %2263  ;;  %v2625_v25 = vsel %vm2605_vm14, %v2592_v31, %v2266_v3 }
 0x12d   : > { %v2623_v39 = vsel %vm2605_vm14, %v2590_v49, %v2264_v42 }
 0x12f   : > { %v1243_v41 = vpop.permute.xlu1 %1242 }
 0x130   : > { %v2392_v4 = vpop.permute.xlu0 %2391  ;;  %v2429_v26 = vsel %vm2407_vm8, %v4517_v13, %v1243_v41 }
 0x131   : > { %v2656_v16 = vsel %vm2638_vm15, %v2623_v39, %v2392_v4 }
 0x132   : > { %3655 = vmatprep.mubr.msk.bf16.mxu1 %vm2691_vm3, %v2656_v16 }
 0x133   : > { %v1245_v32 = vpop.permute.xlu1 %1244 }
 0x134   : > { %v2394_v20 = vpop.permute.xlu0 %2393  ;;  %v2431_v19 = vsel %vm2407_vm8, %v4551_v38, %v1245_v32 }
 0x135   : > { %v2658_v10 = vsel %vm2638_vm15, %v2625_v25, %v2394_v20 }
 0x136   : > { %3656 = vmatmul.mubr.msk.bf16.vlgmr.msra.gmra.mrb[0].mxu1 %vm2691_vm3, %v2658_v10 }
 0x137   : > { %v1374_v53 = vpop.permute.xlu1 %1373 }
 0x138   : > { %v1372_v18 = vpop.permute.xlu0 %1371  ;;  %v2464_v44 = vsel %vm2440_vm9, %v2431_v19, %v1374_v53 }
 0x139   : > { %v2462_v5 = vsel %vm2440_vm9, %v2429_v26, %v1372_v18 }
 0x13b   : > { %v1486_v1 = vpop.permute.xlu1 %1485 }
 0x13c   : > { %v1484_v46 = vpop.permute.xlu0 %1483  ;;  %v2497_v13 = vsel %vm2473_vm10, %v2464_v44, %v1486_v1 }
 0x13d   : > { %v2495_v58 = vsel %vm2473_vm10, %v2462_v5, %v1484_v46 }
 0x13f   : > { %v1758_v61 = vpop.permute.xlu1 %1757 }
 0x140   : > { %v1756_v56 = vpop.permute.xlu0 %1755  ;;  %v2530_v60 = vsel %vm2506_vm11, %v2497_v13, %v1758_v61 }
 0x141   : > { %v2528_v36 = vsel %vm2506_vm11, %v2495_v58, %v1756_v56 }
 0x143   : > { %v1886_v22 = vpop.permute.xlu1 %1885 }
 0x144   : > { %v1884_v8 = vpop.permute.xlu0 %1883  ;;  %v2563_v30 = vsel %vm2539_vm12, %v2530_v60, %v1886_v22 }
 0x145   : > { %v2561_v15 = vsel %vm2539_vm12, %v2528_v36, %v1884_v8 }
 0x147   : > { %v1998_v17 = vpop.permute.xlu1 %1997 }
 0x148   : > { %v1996_v0 = vpop.permute.xlu0 %1995  ;;  %v2596_v38 = vsel %vm2572_vm13, %v2563_v30, %v1998_v17 }
 0x149   : > { %v2594_v51 = vsel %vm2572_vm13, %v2561_v15, %v1996_v0 }
 0x14b   : > { %v2270_v48 = vpop.permute.xlu1 %2269 }
 0x14c   : > { %v2268_v34 = vpop.permute.xlu0 %2267  ;;  %v2629_v28 = vsel %vm2605_vm14, %v2596_v38, %v2270_v48 }
 0x14d   : > { %v2627_v63 = vsel %vm2605_vm14, %v2594_v51, %v2268_v34 }
 0x14f   : > { %v1247_v52 = vpop.permute.xlu1 %1246 }
 0x150   : > { %v2396_v35 = vpop.permute.xlu0 %2395  ;;  %v2433_v42 = vsel %vm2407_vm8, %v4666_v33, %v1247_v52 }
 0x151   : > { %v2660_v29 = vsel %vm2638_vm15, %v2627_v63, %v2396_v35 }
 0x152   : > { %3659 = vmatprep.mubr.msk.bf16.mxu1 %vm2691_vm3, %v2660_v29 }
 0x153   : > { %v1249_v11 = vpop.permute.xlu1 %1248 }
 0x154   : > { %v2398_v37 = vpop.permute.xlu0 %2397  ;;  %v2435_v41 = vsel %vm2407_vm8, %v4709_v50, %v1249_v11 }
 0x155   : > { %v2662_v40 = vsel %vm2638_vm15, %v2629_v28, %v2398_v37 }
 0x156   : > { %3660 = vmatmul.mubr.msk.bf16.gmra.mrb[4].mxu1 %vm2691_vm3, %v2662_v40 }
 0x157   : > { %v1378_v55 = vpop.permute.xlu1 %1377 }
 0x158   : > { %v1376_v21 = vpop.permute.xlu0 %1375  ;;  %v2468_v39 = vsel %vm2440_vm9, %v2435_v41, %v1378_v55 }
 0x159   : > { %v2466_v57 = vsel %vm2440_vm9, %v2433_v42, %v1376_v21 }
 0x15b   : > { %v1490_v9 = vpop.permute.xlu1 %1489 }
 0x15c   : > { %v1488_v7 = vpop.permute.xlu0 %1487  ;;  %v2501_v33 = vsel %vm2473_vm10, %v2468_v39, %v1490_v9 }
 0x15d   : > { %v2499_v47 = vsel %vm2473_vm10, %v2466_v57, %v1488_v7 }
 0x15f   : > { %v1762_v14 = vpop.permute.xlu1 %1761 }
 0x160   : > { %v1760_v62 = vpop.permute.xlu0 %1759  ;;  %v2534_v31 = vsel %vm2506_vm11, %v2501_v33, %v1762_v14 }
 0x161   : > { %v2532_v49 = vsel %vm2506_vm11, %v2499_v47, %v1760_v62 }
 0x163   : > { %v1890_v23 = vpop.permute.xlu1 %1889 }
 0x164   : > { %v1888_v27 = vpop.permute.xlu0 %1887  ;;  %v2567_v25 = vsel %vm2539_vm12, %v2534_v31, %v1890_v23 }
 0x165   : > { %v2565_v6 = vsel %vm2539_vm12, %v2532_v49, %v1888_v27 }
 0x167   : > { %v2002_v3 = vpop.permute.xlu1 %2001 }
 0x168   : > { %v2000_v43 = vpop.permute.xlu0 %1999  ;;  %v2600_v50 = vsel %vm2572_vm13, %v2567_v25, %v2002_v3 }
 0x169   : > { %v2598_v4 = vsel %vm2572_vm13, %v2565_v6, %v2000_v43 }
 0x16b   : > { %v2274_v59 = vpop.permute.xlu1 %2273 }
 0x16c   : > { %v2272_v2 = vpop.permute.xlu0 %2271  ;;  %v2633_v10 = vsel %vm2605_vm14, %v2600_v50, %v2274_v59 }
 0x16d   : > { %v2631_v16 = vsel %vm2605_vm14, %v2598_v4, %v2272_v2 }
 0x16f   : > { %v1251_v12 = vpop.permute.xlu1 %1250 }
 0x170   : > { %v2400_v45 = vpop.permute.xlu0 %2399  ;;  %v2437_v58 = vsel %vm2407_vm8, %v4828_v54, %v1251_v12 }
 0x171   : > { %v2664_v32 = vsel %vm2638_vm15, %v2631_v16, %v2400_v45 }
 0x172   : > { %3663 = vmatprep.mubr.msk.bf16.mxu1 %vm2691_vm3, %v2664_v32 }
 0x173   : > { %v1253_v20 = vpop.permute.xlu1 %1252 }
 0x174   : > { %v2402_v53 = vpop.permute.xlu0 %2401  ;;  %v2439_v5 = vsel %vm2407_vm8, %v4854_v24, %v1253_v20 }
 0x175   : > { %v2666_v18 = vsel %vm2638_vm15, %v2633_v10, %v2402_v53 }
 0x176   : > { %3664 = vmatmul.mubr.msk.bf16.gmra.mrb[8].mxu1 %vm2691_vm3, %v2666_v18 }
 0x177   : > { %v1382_v1 = vpop.permute.xlu1 %1381 }
 0x178   : > { %v1380_v46 = vpop.permute.xlu0 %1379  ;;  %v2472_v34 = vsel %vm2440_vm9, %v2439_v5, %v1382_v1 }
 0x179   : > { %v2470_v36 = vsel %vm2440_vm9, %v2437_v58, %v1380_v46 }
 0x17b   : > { %v1494_v61 = vpop.permute.xlu1 %1493 }
 0x17c   : > { %v1492_v56 = vpop.permute.xlu0 %1491  ;;  %v2505_v19 = vsel %vm2473_vm10, %v2472_v34, %v1494_v61 }
 0x17d   : > { %v2503_v15 = vsel %vm2473_vm10, %v2470_v36, %v1492_v56 }
 0x17f   : > { %v1766_v22 = vpop.permute.xlu1 %1765 }
 0x180   : > { %v1764_v8 = vpop.permute.xlu0 %1763  ;;  %v2538_v44 = vsel %vm2506_vm11, %v2505_v19, %v1766_v22 }
 0x181   : > { %v2536_v54 = vsel %vm2506_vm11, %v2503_v15, %v1764_v8 }
 0x183   : > { %v1894_v17 = vpop.permute.xlu1 %1893 }
 0x184   : > { %v1892_v0 = vpop.permute.xlu0 %1891  ;;  %v2571_v52 = vsel %vm2539_vm12, %v2538_v44, %v1894_v17 }
 0x185   : > { %v2569_v60 = vsel %vm2539_vm12, %v2536_v54, %v1892_v0 }
 0x187   : > { %v2006_v26 = vpop.permute.xlu1 %2005 }
 0x188   : > { %v2004_v48 = vpop.permute.xlu0 %2003  ;;  %v2604_v29 = vsel %vm2572_vm13, %v2571_v52, %v2006_v26 }
 0x189   : > { %v2602_v28 = vsel %vm2572_vm13, %v2569_v60, %v2004_v48 }
 0x18b   : > { %v3641_v24 = vpop.f32.mrb[0].mxu0  ;;  %v2278_v51 = vpop.permute.xlu1 %2277 }
 0x18c   : > { %v3584_v13 = vpack.c.bf16 %v3641_v24, %v3641_v24  ;;  %v2762_v63 = vpop.f32.mrb[1].mxu0  ;;  %v2276_v35 = vpop.permute.xlu0 %2275  ;;  %v3120_v37 = vmul.f32 %v3641_v24, %v3641_v24  ;;  %v2637_v40 = vsel %vm2605_vm14, %v2604_v29, %v2278_v51  ;;  %v3052_v27 = vsel %vm2407_vm8, %v3641_v24, 0.0 }
 0x18d   : > { %v3582_v30 = vpack.c.bf16 %v2762_v63, %v2762_v63  ;;  %v3118_v38 = vmul.f32 %v2762_v63, %v2762_v63  ;;  %v3642_v11 = vpop.f32.mrb[2].mxu0  ;;  %v3049_v9 = vsel %vm2407_vm8, %v2762_v63, 0.0  ;;  %v2635_v3 = vsel %vm2605_vm14, %v2602_v28, %v2276_v35 }
 0x18e   : > { %3019 = vst.msk [vmem:[%s5071_s7 + $0x8] sm:$0xf] %vm215_vm0, %v3584_v13  ;;  %v3585_v55 = vpack.c.bf16 %v3642_v11, %v3642_v11  ;;  %v2765_v21 = vpop.f32.mrb[3].mxu0  ;;  %v3121_v47 = vmul.f32 %v3642_v11, %v3642_v11  ;;  %v3153_v39 = vsel %vm2407_vm8, %v3120_v37, 0.0  ;;  %v3054_v4 = vsel %vm2407_vm8, %v3642_v11, 0.0 }
 0x18f   : > { %3017 = vst.msk [vmem:[%s5071_s7] sm:$0xf] %vm215_vm0, %v3582_v30  ;;  %v3583_v7 = vpack.c.bf16 %v2765_v21, %v2765_v21  ;;  %v3050_v14 = vsel %vm2407_vm8, %v2765_v21, 0.0  ;;  %v3119_v62 = vmul.f32 %v2765_v21, %v2765_v21  ;;  %v2406_v23 = vpop.permute.xlu1 %2405  ;;  %v3150_v59 = vsel %vm2407_vm8, %v3118_v38, 0.0 }
 0x190   : > { %3020 = vst.msk [vmem:[%s5071_s7 + $0xc] sm:$0xf] %vm215_vm0, %v3585_v55  ;;  %v3051_v43 = vadd.f32 %v3050_v14, %v3049_v9  ;;  %v2670_v42 = vsel %vm2638_vm15, %v2637_v40, %v2406_v23  ;;  %v2404_v57 = vpop.permute.xlu0 %2403  ;;  %v3155_v16 = vsel %vm2407_vm8, %v3121_v47, 0.0 }
 0x191   : > { %3018 = vst.msk [vmem:[%s5071_s7 + $0x4] sm:$0xf] %vm215_vm0, %v3583_v7  ;;  %v3151_v2 = vsel %vm2407_vm8, %v3119_v62, 0.0  ;;  %v2668_v49 = vsel %vm2638_vm15, %v2635_v3, %v2404_v57 }
 0x192   : > { %v3053_v41 = vadd.f32 %v3052_v27, %v3051_v43  ;;  %v3152_v6 = vadd.f32 %v3151_v2, %v3150_v59  ;;  %3667 = vmatprep.mubr.msk.bf16.mxu1 %vm2691_vm3, %v2668_v49 }
 0x193   : > { %3668 = vmatmul.mubr.msk.bf16.gmra.mrb[12].mxu1 %vm2691_vm3, %v2670_v42 }
 0x194   : > { %v3154_v12 = vadd.f32 %v3153_v39, %v3152_v6  ;;  %v3055_v33 = vadd.f32 %v3054_v4, %v3053_v41 }
 0x196   : > { %v3156_v45 = vadd.f32 %v3155_v16, %v3154_v12 }
 0x1a9   : > { %v3645_v31 = vpop.f32.mrb[4].mxu0 }
 0x1aa   : > { %v3588_v32 = vpack.c.bf16 %v3645_v31, %v3645_v31  ;;  %v2778_v25 = vpop.f32.mrb[5].mxu0  ;;  %v3124_v8 = vmul.f32 %v3645_v31, %v3645_v31  ;;  %v3060_v5 = vsel %vm2407_vm8, %v3645_v31, 0.0 }
 0x1ab   : > { %v3586_v50 = vpack.c.bf16 %v2778_v25, %v2778_v25  ;;  %v3056_v20 = vsel %vm2407_vm8, %v2778_v25, 0.0  ;;  %v3122_v10 = vmul.f32 %v2778_v25, %v2778_v25  ;;  %v3646_v53 = vpop.f32.mrb[6].mxu0 }
 0x1ac   : > { %3023 = vst.msk [vmem:[%s5071_s7 + $0x18] sm:$0xf] %vm215_vm0, %v3588_v32  ;;  %v3057_v18 = vadd.f32 %v3056_v20, %v3055_v33  ;;  %v3589_v1 = vpack.c.bf16 %v3646_v53, %v3646_v53  ;;  %v2781_v46 = vpop.f32.mrb[7].mxu0  ;;  %v3125_v48 = vmul.f32 %v3646_v53, %v3646_v53  ;;  %v3062_v36 = vsel %vm2407_vm8, %v3646_v53, 0.0 }
 0x1ad   : > { %3021 = vst.msk [vmem:[%s5071_s7 + $0x10] sm:$0xf] %vm215_vm0, %v3586_v50  ;;  %v3157_v61 = vsel %vm2407_vm8, %v3122_v10, 0.0  ;;  %v3587_v56 = vpack.c.bf16 %v2781_v46, %v2781_v46  ;;  %v3058_v22 = vsel %vm2407_vm8, %v2781_v46, 0.0  ;;  %v3123_v26 = vmul.f32 %v2781_v46, %v2781_v46 }
 0x1ae   : > { %v3158_v17 = vadd.f32 %v3157_v61, %v3156_v45  ;;  %3024 = vst.msk [vmem:[%s5071_s7 + $0x1c] sm:$0xf] %vm215_vm0, %v3589_v1  ;;  %v3059_v0 = vadd.f32 %v3058_v22, %v3057_v18  ;;  %v3161_v15 = vsel %vm2407_vm8, %v3124_v8, 0.0  ;;  %v3163_v51 = vsel %vm2407_vm8, %v3125_v48, 0.0 }
 0x1af   : > { %3022 = vst.msk [vmem:[%s5071_s7 + $0x14] sm:$0xf] %vm215_vm0, %v3587_v56  ;;  %v3159_v34 = vsel %vm2407_vm8, %v3123_v26, 0.0 }
 0x1b0   : > { %v3061_v58 = vadd.f32 %v3060_v5, %v3059_v0  ;;  %v3160_v19 = vadd.f32 %v3159_v34, %v3158_v17 }
 0x1b2   : > { %v3063_v44 = vadd.f32 %v3062_v36, %v3061_v58  ;;  %v3162_v24 = vadd.f32 %v3161_v15, %v3160_v19 }
 0x1b4   : > { %v3164_v54 = vadd.f32 %v3163_v51, %v3162_v24 }
 0x1c9   : > { %v3649_v52 = vpop.f32.mrb[8].mxu0 }
 0x1ca   : > { %v3592_v13 = vpack.c.bf16 %v3649_v52, %v3649_v52  ;;  %v2794_v63 = vpop.f32.mrb[9].mxu0  ;;  %v3128_v21 = vmul.f32 %v3649_v52, %v3649_v52  ;;  %v3068_v62 = vsel %vm2407_vm8, %v3649_v52, 0.0 }
 0x1cb   : > { %v3590_v35 = vpack.c.bf16 %v2794_v63, %v2794_v63  ;;  %v3064_v60 = vsel %vm2407_vm8, %v2794_v63, 0.0  ;;  %v3126_v29 = vmul.f32 %v2794_v63, %v2794_v63  ;;  %v3650_v30 = vpop.f32.mrb[10].mxu0 }
 0x1cc   : > { %3027 = vst.msk [vmem:[%s5071_s7 + $0x28] sm:$0xf] %vm215_vm0, %v3592_v13  ;;  %v3065_v38 = vadd.f32 %v3064_v60, %v3063_v44  ;;  %v3593_v11 = vpack.c.bf16 %v3650_v30, %v3650_v30  ;;  %v2797_v28 = vpop.f32.mrb[11].mxu0  ;;  %v3129_v23 = vmul.f32 %v3650_v30, %v3650_v30  ;;  %v3070_v43 = vsel %vm2407_vm8, %v3650_v30, 0.0 }
 0x1cd   : > { %3025 = vst.msk [vmem:[%s5071_s7 + $0x20] sm:$0xf] %vm215_vm0, %v3590_v35  ;;  %v3165_v37 = vsel %vm2407_vm8, %v3126_v29, 0.0  ;;  %v3591_v40 = vpack.c.bf16 %v2797_v28, %v2797_v28  ;;  %v3066_v55 = vsel %vm2407_vm8, %v2797_v28, 0.0  ;;  %v3127_v14 = vmul.f32 %v2797_v28, %v2797_v28 }
 0x1ce   : > { %v3166_v9 = vadd.f32 %v3165_v37, %v3164_v54  ;;  %3028 = vst.msk [vmem:[%s5071_s7 + $0x2c] sm:$0xf] %vm215_vm0, %v3593_v11  ;;  %v3067_v7 = vadd.f32 %v3066_v55, %v3065_v38  ;;  %v3169_v57 = vsel %vm2407_vm8, %v3128_v21, 0.0  ;;  %v3171_v2 = vsel %vm2407_vm8, %v3129_v23, 0.0 }
 0x1cf   : > { %3026 = vst.msk [vmem:[%s5071_s7 + $0x24] sm:$0xf] %vm215_vm0, %v3591_v40  ;;  %v3167_v3 = vsel %vm2407_vm8, %v3127_v14, 0.0 }
 0x1d0   : > { %v3069_v27 = vadd.f32 %v3068_v62, %v3067_v7  ;;  %v3168_v42 = vadd.f32 %v3167_v3, %v3166_v9 }
 0x1d2   : > { %v3071_v59 = vadd.f32 %v3070_v43, %v3069_v27  ;;  %v3170_v47 = vadd.f32 %v3169_v57, %v3168_v42 }
 0x1d4   : > { %v3172_v49 = vadd.f32 %v3171_v2, %v3170_v47 }
 0x1e9   : > { %v3653_v41 = vpop.f32.mrb[12].mxu0 }
 0x1ea   : > { %v3596_v6 = vpack.c.bf16 %v3653_v41, %v3653_v41  ;;  %v2810_v39 = vpop.f32.mrb[13].mxu0  ;;  %v3132_v10 = vmul.f32 %v3653_v41, %v3653_v41  ;;  %v3076_v46 = vsel %vm2407_vm8, %v3653_v41, 0.0 }
 0x1eb   : > { %v3594_v4 = vpack.c.bf16 %v2810_v39, %v2810_v39  ;;  %v3072_v12 = vsel %vm2407_vm8, %v2810_v39, 0.0  ;;  %v3130_v33 = vmul.f32 %v2810_v39, %v2810_v39  ;;  %v3654_v16 = vpop.f32.mrb[14].mxu0 }
 0x1ec   : > { %3031 = vst.msk [vmem:[%s5071_s7 + $0x38] sm:$0xf] %vm215_vm0, %v3596_v6  ;;  %v3073_v45 = vadd.f32 %v3072_v12, %v3071_v59  ;;  %v3597_v31 = vpack.c.bf16 %v3654_v16, %v3654_v16  ;;  %v2813_v32 = vpop.f32.mrb[15].mxu0  ;;  %v3133_v61 = vmul.f32 %v3654_v16, %v3654_v16  ;;  %v3078_v8 = vsel %vm2407_vm8, %v3654_v16, 0.0 }
 0x1ed   : > { %3029 = vst.msk [vmem:[%s5071_s7 + $0x30] sm:$0xf] %vm215_vm0, %v3594_v4  ;;  %v3173_v25 = vsel %vm2407_vm8, %v3130_v33, 0.0  ;;  %v3595_v50 = vpack.c.bf16 %v2813_v32, %v2813_v32  ;;  %v3074_v20 = vsel %vm2407_vm8, %v2813_v32, 0.0  ;;  %v3131_v1 = vmul.f32 %v2813_v32, %v2813_v32 }
 0x1ee   : > { %v3174_v53 = vadd.f32 %v3173_v25, %v3172_v49  ;;  %3032 = vst.msk [vmem:[%s5071_s7 + $0x3c] sm:$0xf] %vm215_vm0, %v3597_v31  ;;  %v3075_v18 = vadd.f32 %v3074_v20, %v3073_v45  ;;  %v3177_v0 = vsel %vm2407_vm8, %v3132_v10, 0.0  ;;  %v3179_v48 = vsel %vm2407_vm8, %v3133_v61, 0.0 }
 0x1ef   : > { %3030 = vst.msk [vmem:[%s5071_s7 + $0x34] sm:$0xf] %vm215_vm0, %v3595_v50  ;;  %v3175_v22 = vsel %vm2407_vm8, %v3131_v1, 0.0 }
 0x1f0   : > { %v3077_v56 = vadd.f32 %v3076_v46, %v3075_v18  ;;  %v3176_v17 = vadd.f32 %v3175_v22, %v3174_v53 }
 0x1f2   : > { %v3079_v26 = vadd.f32 %v3078_v8, %v3077_v56  ;;  %v3178_v5 = vadd.f32 %v3177_v0, %v3176_v17 }
 0x1f4   : > { %v3180_v58 = vadd.f32 %v3179_v48, %v3178_v5 }
 0x209   : > { %v3657_v34 = vpop.f32.mrb[0].mxu1 }
 0x20a   : > { %v3600_v36 = vpack.c.bf16 %v3657_v34, %v3657_v34  ;;  %v2826_v19 = vpop.f32.mrb[1].mxu1  ;;  %v3136_v29 = vmul.f32 %v3657_v34, %v3657_v34  ;;  %v3084_v28 = vsel %vm2407_vm8, %v3657_v34, 0.0 }
 0x20b   : > { %v3598_v15 = vpack.c.bf16 %v2826_v19, %v2826_v19  ;;  %v3080_v44 = vsel %vm2407_vm8, %v2826_v19, 0.0  ;;  %v3134_v24 = vmul.f32 %v2826_v19, %v2826_v19  ;;  %v3658_v51 = vpop.f32.mrb[2].mxu1 }
 0x20c   : > { %3035 = vst.msk [vmem:[%s5071_s7 + $0x48] sm:$0xf] %vm215_vm0, %v3600_v36  ;;  %v3081_v54 = vadd.f32 %v3080_v44, %v3079_v26  ;;  %v3601_v52 = vpack.c.bf16 %v3658_v51, %v3658_v51  ;;  %v2829_v13 = vpop.f32.mrb[3].mxu1  ;;  %v3137_v37 = vmul.f32 %v3658_v51, %v3658_v51  ;;  %v3086_v21 = vsel %vm2407_vm8, %v3658_v51, 0.0 }
 0x20d   : > { %3033 = vst.msk [vmem:[%s5071_s7 + $0x40] sm:$0xf] %vm215_vm0, %v3598_v15  ;;  %v3181_v63 = vsel %vm2407_vm8, %v3134_v24, 0.0  ;;  %v3599_v35 = vpack.c.bf16 %v2829_v13, %v2829_v13  ;;  %v3082_v60 = vsel %vm2407_vm8, %v2829_v13, 0.0  ;;  %v3135_v11 = vmul.f32 %v2829_v13, %v2829_v13 }
 0x20e   : > { %v3182_v30 = vadd.f32 %v3181_v63, %v3180_v58  ;;  %3036 = vst.msk [vmem:[%s5071_s7 + $0x4c] sm:$0xf] %vm215_vm0, %v3601_v52  ;;  %v3083_v38 = vadd.f32 %v3082_v60, %v3081_v54  ;;  %v3185_v7 = vsel %vm2407_vm8, %v3136_v29, 0.0  ;;  %v3187_v23 = vsel %vm2407_vm8, %v3137_v37, 0.0 }
 0x20f   : > { %3034 = vst.msk [vmem:[%s5071_s7 + $0x44] sm:$0xf] %vm215_vm0, %v3599_v35  ;;  %v3183_v55 = vsel %vm2407_vm8, %v3135_v11, 0.0 }
 0x210   : > { %v3085_v40 = vadd.f32 %v3084_v28, %v3083_v38  ;;  %v3184_v9 = vadd.f32 %v3183_v55, %v3182_v30 }
 0x212   : > { %v3087_v14 = vadd.f32 %v3086_v21, %v3085_v40  ;;  %v3186_v62 = vadd.f32 %v3185_v7, %v3184_v9 }
 0x214   : > { %v3188_v27 = vadd.f32 %v3187_v23, %v3186_v62 }
 0x229   : > { %v3661_v3 = vpop.f32.mrb[4].mxu1 }
 0x22a   : > { %v3604_v43 = vpack.c.bf16 %v3661_v3, %v3661_v3  ;;  %v2842_v42 = vpop.f32.mrb[5].mxu1  ;;  %v3140_v33 = vmul.f32 %v3661_v3, %v3661_v3  ;;  %v3092_v32 = vsel %vm2407_vm8, %v3661_v3, 0.0 }
 0x22b   : > { %v3602_v57 = vpack.c.bf16 %v2842_v42, %v2842_v42  ;;  %v3088_v59 = vsel %vm2407_vm8, %v2842_v42, 0.0  ;;  %v3138_v47 = vmul.f32 %v2842_v42, %v2842_v42  ;;  %v3662_v2 = vpop.f32.mrb[6].mxu1 }
 0x22c   : > { %3039 = vst.msk [vmem:[%s5071_s7 + $0x58] sm:$0xf] %vm215_vm0, %v3604_v43  ;;  %v3089_v49 = vadd.f32 %v3088_v59, %v3087_v14  ;;  %v3605_v41 = vpack.c.bf16 %v3662_v2, %v3662_v2  ;;  %v2845_v6 = vpop.f32.mrb[7].mxu1  ;;  %v3141_v25 = vmul.f32 %v3662_v2, %v3662_v2  ;;  %v3094_v10 = vsel %vm2407_vm8, %v3662_v2, 0.0 }
 0x22d   : > { %3037 = vst.msk [vmem:[%s5071_s7 + $0x50] sm:$0xf] %vm215_vm0, %v3602_v57  ;;  %v3189_v39 = vsel %vm2407_vm8, %v3138_v47, 0.0  ;;  %v3603_v4 = vpack.c.bf16 %v2845_v6, %v2845_v6  ;;  %v3090_v12 = vsel %vm2407_vm8, %v2845_v6, 0.0  ;;  %v3139_v31 = vmul.f32 %v2845_v6, %v2845_v6 }
 0x22e   : > { %v3190_v16 = vadd.f32 %v3189_v39, %v3188_v27  ;;  %3040 = vst.msk [vmem:[%s5071_s7 + $0x5c] sm:$0xf] %vm215_vm0, %v3605_v41  ;;  %v3091_v45 = vadd.f32 %v3090_v12, %v3089_v49  ;;  %v3193_v18 = vsel %vm2407_vm8, %v3140_v33, 0.0  ;;  %v3195_v61 = vsel %vm2407_vm8, %v3141_v25, 0.0 }
 0x22f   : > { %3038 = vst.msk [vmem:[%s5071_s7 + $0x54] sm:$0xf] %vm215_vm0, %v3603_v4  ;;  %v3191_v20 = vsel %vm2407_vm8, %v3139_v31, 0.0 }
 0x230   : > { %v3093_v50 = vadd.f32 %v3092_v32, %v3091_v45  ;;  %v3192_v53 = vadd.f32 %v3191_v20, %v3190_v16 }
 0x232   : > { %v3095_v1 = vadd.f32 %v3094_v10, %v3093_v50  ;;  %v3194_v46 = vadd.f32 %v3193_v18, %v3192_v53 }
 0x234   : > { %v3196_v56 = vadd.f32 %v3195_v61, %v3194_v46 }
 0x249   : > { %v3665_v22 = vpop.f32.mrb[8].mxu1 }
 0x24a   : > { %v3608_v8 = vpack.c.bf16 %v3665_v22, %v3665_v22  ;;  %v2858_v17 = vpop.f32.mrb[9].mxu1  ;;  %v3144_v24 = vmul.f32 %v3665_v22, %v3665_v22  ;;  %v3100_v13 = vsel %vm2407_vm8, %v3665_v22, 0.0 }
 0x24b   : > { %v3606_v0 = vpack.c.bf16 %v2858_v17, %v2858_v17  ;;  %v3096_v26 = vsel %vm2407_vm8, %v2858_v17, 0.0  ;;  %v3142_v5 = vmul.f32 %v2858_v17, %v2858_v17  ;;  %v3666_v48 = vpop.f32.mrb[10].mxu1 }
 0x24c   : > { %3043 = vst.msk [vmem:[%s5071_s7 + $0x68] sm:$0xf] %vm215_vm0, %v3608_v8  ;;  %v3097_v58 = vadd.f32 %v3096_v26, %v3095_v1  ;;  %v3609_v34 = vpack.c.bf16 %v3666_v48, %v3666_v48  ;;  %v2861_v36 = vpop.f32.mrb[11].mxu1  ;;  %v3145_v63 = vmul.f32 %v3666_v48, %v3666_v48  ;;  %v3102_v29 = vsel %vm2407_vm8, %v3666_v48, 0.0 }
 0x24d   : > { %3041 = vst.msk [vmem:[%s5071_s7 + $0x60] sm:$0xf] %vm215_vm0, %v3606_v0  ;;  %v3197_v19 = vsel %vm2407_vm8, %v3142_v5, 0.0  ;;  %v3607_v15 = vpack.c.bf16 %v2861_v36, %v2861_v36  ;;  %v3098_v44 = vsel %vm2407_vm8, %v2861_v36, 0.0  ;;  %v3143_v52 = vmul.f32 %v2861_v36, %v2861_v36 }
 0x24e   : > { %v3198_v51 = vadd.f32 %v3197_v19, %v3196_v56  ;;  %3044 = vst.msk [vmem:[%s5071_s7 + $0x6c] sm:$0xf] %vm215_vm0, %v3609_v34  ;;  %v3099_v54 = vadd.f32 %v3098_v44, %v3097_v58  ;;  %v3201_v38 = vsel %vm2407_vm8, %v3144_v24, 0.0  ;;  %v3203_v37 = vsel %vm2407_vm8, %v3145_v63, 0.0 }
 0x24f   : > { %3042 = vst.msk [vmem:[%s5071_s7 + $0x64] sm:$0xf] %vm215_vm0, %v3607_v15  ;;  %v3199_v60 = vsel %vm2407_vm8, %v3143_v52, 0.0 }
 0x250   : > { %v3101_v35 = vadd.f32 %v3100_v13, %v3099_v54  ;;  %v3200_v30 = vadd.f32 %v3199_v60, %v3198_v51 }
 0x252   : > { %v3103_v11 = vadd.f32 %v3102_v29, %v3101_v35  ;;  %v3202_v28 = vadd.f32 %v3201_v38, %v3200_v30 }
 0x254   : > { %v3204_v40 = vadd.f32 %v3203_v37, %v3202_v28 }
 0x266   : > { %v3669_v55 = vpop.f32.mrb[12].mxu1 }
 0x267   : > { %v3612_v21 = vpack.c.bf16 %v3669_v55, %v3669_v55  ;;  %v2874_v9 = vpop.f32.mrb[13].mxu1  ;;  %v3148_v47 = vmul.f32 %v3669_v55, %v3669_v55  ;;  %v3108_v6 = vsel %vm2407_vm8, %v3669_v55, 0.0 }
 0x268   : > { %v3610_v7 = vpack.c.bf16 %v2874_v9, %v2874_v9  ;;  %v3104_v14 = vsel %vm2407_vm8, %v2874_v9, 0.0  ;;  %v3146_v62 = vmul.f32 %v2874_v9, %v2874_v9  ;;  %v3670_v23 = vpop.f32.mrb[14].mxu1 }
 0x269   : > { %3047 = vst.msk [vmem:[%s5071_s7 + $0x78] sm:$0xf] %vm215_vm0, %v3612_v21  ;;  %v3105_v27 = vadd.f32 %v3104_v14, %v3103_v11  ;;  %v3613_v3 = vpack.c.bf16 %v3670_v23, %v3670_v23  ;;  %v2877_v43 = vpop.f32.mrb[15].mxu1  ;;  %v3149_v39 = vmul.f32 %v3670_v23, %v3670_v23  ;;  %v3110_v33 = vsel %vm2407_vm8, %v3670_v23, 0.0 }
 0x26a   : > { %3045 = vst.msk [vmem:[%s5071_s7 + $0x70] sm:$0xf] %vm215_vm0, %v3610_v7  ;;  %v3205_v42 = vsel %vm2407_vm8, %v3146_v62, 0.0  ;;  %v3611_v57 = vpack.c.bf16 %v2877_v43, %v2877_v43  ;;  %v3106_v59 = vsel %vm2407_vm8, %v2877_v43, 0.0  ;;  %v3147_v41 = vmul.f32 %v2877_v43, %v2877_v43 }
 0x26b   : > { %v3206_v2 = vadd.f32 %v3205_v42, %v3204_v40  ;;  %3048 = vst.msk [vmem:[%s5071_s7 + $0x7c] sm:$0xf] %vm215_vm0, %v3613_v3  ;;  %v3107_v49 = vadd.f32 %v3106_v59, %v3105_v27  ;;  %v3209_v45 = vsel %vm2407_vm8, %v3148_v47, 0.0  ;;  %v3211_v25 = vsel %vm2407_vm8, %v3149_v39, 0.0 }
 0x26c   : > { %3046 = vst.msk [vmem:[%s5071_s7 + $0x74] sm:$0xf] %vm215_vm0, %v3611_v57  ;;  %v3207_v12 = vsel %vm2407_vm8, %v3147_v41, 0.0  ;;  %vm3221_vm0 = vcmask 25600  }
 0x26d   : > { %v3109_v4 = vadd.f32 %v3108_v6, %v3107_v49  ;;  %v3208_v16 = vadd.f32 %v3207_v12, %v3206_v2 }
 0x26f   : > { %v3111_v31 = vadd.f32 %v3110_v33, %v3109_v4  ;;  %v3210_v32 = vadd.f32 %v3209_v45, %v3208_v16 }
 0x271   : > { %v3112_v50 = vrot.slane %v3111_v31, 4  ;;  %v3212_v20 = vadd.f32 %v3211_v25, %v3210_v32 }
 0x273   : > { %v3113_v10 = vadd.f32 %v3112_v50, %v3111_v31  ;;  %v3213_v53 = vrot.slane %v3212_v20, 4 }
 0x275   : > { %v3114_v18 = vrot.slane %v3113_v10, 2  ;;  %v3214_v1 = vadd.f32 %v3213_v53, %v3212_v20 }
 0x277   : > { %v3115_v46 = vadd.f32 %v3114_v18, %v3113_v10  ;;  %v3215_v61 = vrot.slane %v3214_v1, 2 }
 0x279   : > { %v3116_v56 = vrot.slane %v3115_v46, 1  ;;  %v3216_v22 = vadd.f32 %v3215_v61, %v3214_v1 }
 0x27b   : > { %v3217_v8 = vrot.slane %v3216_v22, 1  ;;  %v3117_v17 = vadd.f32 %v3116_v56, %v3115_v46 }
 0x27d   : > { %v3218_v0 = vadd.f32 %v3217_v8, %v3216_v22 }
 0x27f   : > { %v3220_v26 = vsel %vm448_vm5, %v3117_v17, %v3218_v0 }
 0x280   : > { %3222 = vst.msk [vmem:[%s181_s11] sm:$0x3] %vm3221_vm0, %v3220_v26 }
 0x281 PF: > { %s14_s12 = sadd.s32 1, %s3859_s12  }
 0x282   : > { %p11_p4 = scmp.ge.s32.totalorder %s14_s12, 4  }
 0x284   :  { %13 = sbr.rel (!%p11_p4) target bundleno = 1 (0x1), region = 73 }

// kernel: resnet_basic_block_forward.4
= control target key start
LH: loop header
LB: loop body
LE: loop exit
PB: predicated region body
PF: predicated region fallthrough
CT: control target
= control target key end

     0   :  { %s4083_s18 = smov 0   ;;  %s5612_s0 = inlined_call_operand.vmem [shape: bf16[2,256,4], index: 0, kind: input, shape index: {}]   ;;  %s5613_s1 = inlined_call_operand.vmem [shape: f32[1,4], index: 1, kind: input, shape index: {}]   ;;  %s5614_s2 = inlined_call_operand.vmem [shape: f32[1,4], index: 2, kind: input, shape index: {}]   ;;  %s5615_s3 = inlined_call_operand.vmem [shape: bf16[36,4], index: 3, kind: input, shape index: {}]   ;;  %s5616_s4 = inlined_call_operand.vmem [shape: bf16[2,256,4], index: 4, kind: output, shape index: {0}]   ;;  %s5617_s5 = inlined_call_operand.vmem [shape: f32[2,2,4], index: 5, kind: output, shape index: {1}]  }
   0x1 LB: > { %s3441_s19 = sadd.s32 4294967295, %s4042_s18   ;;  %p3445_p0 = scmp.ge.s32.totalorder %s4042_s18, 1  ;;  %s4042_s18 = sphi %s4083_s18, %s16_s18  }
   0x2   : > { %p190_p1 = scmp.lt.s32.totalorder %s4042_s18, 3 }
   0x4   : > { %p191_p2 = pnand %p3445_p0, %p190_p1 }
   0x5   : > { %vm427_vm0 = vcmask (!%p191_p2), 27648   ;;  %vm430_vm1 = vcmask (!%p191_p2), 24576   ;;  %v4044_v0 = vmov (!%p191_p2), 0   ;;  %p222_p3 = scmp.lt.s32.totalorder (!%p191_p2), %s3441_s19, 1  ;;  %v4110_v1 = vld [vmem:[%s5613_s1] ss:$0 sm:$0xff] (!%p191_p2) }
   0x6   : > { %194 = sbr.rel (%p191_p2) target bundleno = 651 (0x28b), region = 36  ;;  %428 = vst.msk [vmem:[#allocation2] sm:$0xf] (!%p191_p2), %vm427_vm0, %v4044_v0  ;;  %429 = vst.msk [vmem:[#allocation2 + $0x4] sm:$0xf] (!%p191_p2), %vm427_vm0, %v4044_v0  ;;  %vm1434_vm3 = vcmask (!%p191_p2), 1046528  }
   0x7   : > { %431 = vst.msk [vmem:[#allocation2 + $0x8] sm:$0x1] (!%p191_p2), %vm430_vm1, %v4044_v0  ;;  %435 = vst.msk [vmem:[#allocation2 + $0xd4] sm:$0x1] (!%p191_p2), %vm430_vm1, %v4044_v0  ;;  %vm1161_vm2 = vsmask.f32 (!%p191_p2), 7424 }
   0x8   : > { %433 = vst.msk [vmem:[#allocation2 + $0xcc] sm:$0xf] (!%p191_p2), %vm427_vm0, %v4044_v0  ;;  %434 = vst.msk [vmem:[#allocation2 + $0xd0] sm:$0xf] (!%p191_p2), %vm427_vm0, %v4044_v0  ;;  %v4116_v3 = vld [vmem:[%s5614_s2] ss:$0 sm:$0xff] (!%p191_p2) }
   0x9   : > { %vm580_vm4 = vcmask (!%p191_p2), 1040384   ;;  %s4045_s28 = smov (!%p191_p2), 8   ;;  %vm581_vm5 = vsmask.f32 (!%p191_p2), 256  ;;  %s4046_s29 = smov (!%p191_p2), 4   ;;  %vm2856_vm7 = vcmask (!%p191_p2), 1041408  }
   0xa   : > { %vm4147_vm6 = vmand (!%p191_p2), %vm580_vm4, %vm581_vm5  ;;  %s4047_s30 = smov (!%p191_p2), 12   ;;  %s4048_s6 = smov (!%p191_p2), 24   ;;  %vm2539_vm8 = vcmask (!%p191_p2), 31744   ;;  %vm2572_vm9 = vcmask (!%p191_p2), 64512   ;;  %vm2605_vm10 = vcmask (!%p191_p2), 97280   ;;  %vm2638_vm11 = vcmask (!%p191_p2), 130048  }
   0xb   : > { %s4049_s7 = smov (!%p191_p2), 20   ;;  %s4050_s8 = smov (!%p191_p2), 32   ;;  %vm2671_vm12 = vcmask (!%p191_p2), 162816   ;;  %vm2704_vm13 = vcmask (!%p191_p2), 195584   ;;  %vm2737_vm14 = vcmask (!%p191_p2), 228352   ;;  %vm2770_vm15 = vcmask (!%p191_p2), 261120  }
   0xc   : > { %s4051_s13 = smov (!%p191_p2), 16   ;;  %s4052_s14 = smov (!%p191_p2), 28   ;;  %vm2823_vm5 = vcmask (!%p191_p2), 293888  }
   0xd   : > { %s5622_s19 = smov (!%p222_p3, %s3441_s19), 1  ;;  %v841_v6 = vld [vmem:[#allocation2 + $0x4] sm:$0xf]  ;;  %v888_v7 = vld [vmem:[#allocation2] sm:$0xe] }
   0xe   : > { %s3698_s20 = sshll.u32 %s5622_s19, 7  ;;  %v3893_v12 = vld [vmem:[#allocation2 + $0x8] ss:$0 sps:$4 sm:$0x11]   ;;  %v3533_v13 = vcombine.low %v888_v7, %v841_v6  ;;  %v840_v14 = vld [vmem:[#allocation2] sm:$0xf] }
   0xf   : > { %s4105_s23 = scalar_lea.vmem %s5612_s0, %s3698_s20  ;;  %v4120_v17 = vcombine.low %v840_v14, %v841_v6  ;;  %v1436_v22 = vrot.slane %v3893_v12, 1  ;;  %v1170_v23 = vshll.u32 %v3893_v12, 16  ;;  %s5470_s26 = scalar_lea.vmem %s5616_s4, %s3698_s20 }
  0x10   : > { %v3796_v2 = vld [vmem:[%s4105_s23 + $0x8] sm:$0xff]   ;;  %v3733_v4 = vld [vmem:[%s4105_s23] sm:$0xff]   ;;  %v3797_v5 = vld [vmem:[%s4105_s23 + $0x10] sm:$0xff]   ;;  %v1435_v21 = vrot.slane %v3533_v13, 1  ;;  %s3450_s20 = sshll.u32 %s5622_s19, 1 }
  0x11   : > { %v3738_v8 = vunpack.c.l.bf16 %v3796_v2  ;;  %v3739_v9 = vunpack.c.h.bf16 %v3796_v2  ;;  %v3734_v10 = vunpack.c.l.bf16 %v3733_v4  ;;  %v3735_v11 = vunpack.c.h.bf16 %v3733_v4  ;;  %v3798_v29 = vld [vmem:[%s4105_s23 + $0x18] sm:$0xff]   ;;  %v3799_v57 = vld [vmem:[%s4105_s23 + $0x20] sm:$0xff]  }
  0x12   : > { %v3742_v15 = vunpack.c.l.bf16 %v3797_v5  ;;  %v3743_v16 = vunpack.c.h.bf16 %v3797_v5  ;;  %v1163_v25 = vshrl.u32 %v4120_v17, 16  ;;  %v1165_v26 = vshll.u32 %v4120_v17, 16 }
  0x13   : > { %v310_v18 = vmul.f32 %v3738_v8, %v4110_v1  ;;  %v311_v19 = vmul.f32 %v3739_v9, %v4110_v1  ;;  %v308_v20 = vmul.f32 %v3734_v10, %v4110_v1  ;;  %v309_v24 = vmul.f32 %v3735_v11, %v4110_v1 }
  0x14   : > { %v1437_v30 = vsel %vm1434_vm3, %v1435_v21, %v1436_v22  ;;  %v1172_v31 = vrot.slane %v1170_v23, 1  ;;  %v1167_v34 = vrot.slane %v1165_v26, 1  ;;  %v312_v37 = vmul.f32 %v3742_v15, %v4110_v1 }
  0x15   : > { %v349_v27 = vadd.f32 %v4116_v3, %v310_v18  ;;  %v350_v28 = vadd.f32 %v4116_v3, %v311_v19  ;;  %v347_v32 = vadd.f32 %v4116_v3, %v308_v20  ;;  %v348_v33 = vadd.f32 %v4116_v3, %v309_v24  ;;  %1483 = vrot.lane.b32.xlu1 %v1437_v30, %s4045_s28 }
  0x16   : > { %v313_v40 = vmul.f32 %v3743_v16, %v4110_v1  ;;  %v3746_v41 = vunpack.c.l.bf16 %v3798_v29  ;;  %v1168_v42 = vor.u32 %v1167_v34, %v1163_v25  ;;  %v351_v44 = vadd.f32 %v4116_v3, %v312_v37 }
  0x17   : > { %v381_v35 = vmax.f32 %v349_v27, 0.0  ;;  %v382_v36 = vmax.f32 %v350_v28, 0.0  ;;  %v379_v38 = vmax.f32 %v347_v32, 0.0  ;;  %v380_v39 = vmax.f32 %v348_v33, 0.0 }
  0x18   : > { %v3747_v45 = vunpack.c.h.bf16 %v3798_v29  ;;  %v352_v47 = vadd.f32 %v4116_v3, %v313_v40  ;;  %v314_v48 = vmul.f32 %v3746_v41, %v4110_v1  ;;  %v1173_v49 = vsel %vm1161_vm2, %v1168_v42, %v1172_v31 }
  0x19   : > { %v412_v43 = vpack.c.bf16 %v382_v36, %v381_v35  ;;  %v411_v46 = vpack.c.bf16 %v380_v39, %v379_v38  ;;  %v383_v52 = vmax.f32 %v351_v44, 0.0  ;;  %1354 = vrot.lane.b32.xlu0 %v1173_v49, %s4046_s29  ;;  %v3750_v5 = vunpack.c.l.bf16 %v3799_v57 }
  0x1a   : > { %v384_v55 = vmax.f32 %v352_v47, 0.0  ;;  %v315_v56 = vmul.f32 %v3747_v45, %v4110_v1  ;;  %v353_v59 = vadd.f32 %v4116_v3, %v314_v48  ;;  %v3751_v13 = vunpack.c.h.bf16 %v3799_v57 }
  0x1b   : > { %v444_v50 = vshrl.u32 %v412_v43, 16  ;;  %v447_v51 = vshll.u32 %v412_v43, 16  ;;  %v437_v53 = vshrl.u32 %v411_v46, 16  ;;  %v440_v54 = vshll.u32 %v411_v46, 16 }
  0x1c   : > { %v413_v62 = vpack.c.bf16 %v384_v55, %v383_v52  ;;  %v354_v63 = vadd.f32 %v4116_v3, %v315_v56  ;;  %v385_v2 = vmax.f32 %v353_v59, 0.0  ;;  %v316_v29 = vmul.f32 %v3750_v5, %v4110_v1  ;;  %v3801_v5 = vld [vmem:[%s4105_s23 + $0x30] sm:$0xff]  }
  0x1d   : > { %v446_v58 = vrot.slane %v444_v50, 7  ;;  %v439_v61 = vrot.slane %v437_v53, 7  ;;  %v317_v30 = vmul.f32 %v3751_v13, %v4110_v1 }
  0x1e   : > { %v451_v7 = vshrl.u32 %v413_v62, 16  ;;  %v454_v8 = vshll.u32 %v413_v62, 16  ;;  %v386_v9 = vmax.f32 %v354_v63, 0.0  ;;  %v355_v37 = vadd.f32 %v4116_v3, %v316_v29 }
  0x1f   : > { %v449_v0 = vor.u32 %v447_v51, %v446_v58  ;;  %v600_v4 = vsel %vm4147_vm6, %v446_v58, 0  ;;  %v442_v6 = vor.u32 %v440_v54, %v439_v61  ;;  %v599_v11 = vsel %vm4147_vm6, %v439_v61, 0  ;;  %v3800_v51 = vld [vmem:[%s4105_s23 + $0x28] sm:$0xff]  }
  0x20   : > { %v3458_v12 = vcombine.low %v600_v4, %v600_v4  ;;  %v453_v18 = vrot.slane %v451_v7, 7  ;;  %v414_v21 = vpack.c.bf16 %v386_v9, %v385_v2  ;;  %v3455_v22 = vcombine.low %v599_v11, %v599_v11 }
  0x21   : > { %v584_v10 = vsel %vm4147_vm6, 0, %v449_v0  ;;  %v583_v16 = vsel %vm4147_vm6, 0, %v442_v6  ;;  %v356_v38 = vadd.f32 %v4116_v3, %v317_v30  ;;  %v387_v49 = vmax.f32 %v355_v37, 0.0 }
  0x22   : > { %v3456_v14 = vcombine.low %v584_v10, %v584_v10  ;;  %v3457_v15 = vcombine.high %v584_v10, %v584_v10  ;;  %v3453_v19 = vcombine.low %v583_v16, %v583_v16  ;;  %v3454_v20 = vcombine.high %v583_v16, %v583_v16  ;;  %797 = vst.msk [vmem:[#allocation2 + $0x20] sm:$0x1] %vm430_vm1, %v3458_v12 }
  0x23   : > { %v456_v23 = vor.u32 %v454_v8, %v453_v18  ;;  %v601_v24 = vsel %vm4147_vm6, %v453_v18, 0  ;;  %v458_v25 = vshrl.u32 %v414_v21, 16  ;;  %794 = vst.msk [vmem:[#allocation2 + $0x14] sm:$0x1] %vm430_vm1, %v3455_v22  ;;  %v461_v28 = vshll.u32 %v414_v21, 16 }
  0x24   : > { %795 = vst.msk [vmem:[#allocation2 + $0x18] sm:$0xf] %vm427_vm0, %v3456_v14  ;;  %796 = vst.msk [vmem:[#allocation2 + $0x1c] sm:$0xf] %vm427_vm0, %v3457_v15  ;;  %v3461_v26 = vcombine.low %v601_v24, %v601_v24  ;;  %v388_v50 = vmax.f32 %v356_v38, 0.0  ;;  %v3754_v4 = vunpack.c.l.bf16 %v3800_v51  ;;  %v3755_v9 = vunpack.c.h.bf16 %v3800_v51 }
  0x25   : > { %792 = vst.msk [vmem:[#allocation2 + $0xc] sm:$0xf] %vm427_vm0, %v3453_v19  ;;  %793 = vst.msk [vmem:[#allocation2 + $0x10] sm:$0xf] %vm427_vm0, %v3454_v20  ;;  %v585_v27 = vsel %vm4147_vm6, 0, %v456_v23  ;;  %v460_v33 = vrot.slane %v458_v25, 7  ;;  %v3758_v18 = vunpack.c.l.bf16 %v3801_v5 }
  0x26   : > { %v3459_v31 = vcombine.low %v585_v27, %v585_v27  ;;  %v3460_v32 = vcombine.high %v585_v27, %v585_v27  ;;  %800 = vst.msk [vmem:[#allocation2 + $0x2c] sm:$0x1] %vm430_vm1, %v3461_v26  ;;  %v4207_v8 = vpack.c.bf16 %v388_v50, %v387_v49  ;;  %v318_v21 = vmul.f32 %v3754_v4, %v4110_v1  ;;  %v4228_v27 = vld [vmem:[%s4105_s23 + $0x38] sm:$0xff]  }
  0x27   : > { %v602_v34 = vsel %vm4147_vm6, %v460_v33, 0  ;;  %v463_v35 = vor.u32 %v461_v28, %v460_v33  ;;  %v319_v25 = vmul.f32 %v3755_v9, %v4110_v1  ;;  %v3759_v26 = vunpack.c.h.bf16 %v3801_v5 }
  0x28   : > { %798 = vst.msk [vmem:[#allocation2 + $0x24] sm:$0xf] %vm427_vm0, %v3459_v31  ;;  %799 = vst.msk [vmem:[#allocation2 + $0x28] sm:$0xf] %vm427_vm0, %v3460_v32  ;;  %v3464_v36 = vcombine.low %v602_v34, %v602_v34  ;;  %v465_v24 = vshrl.u32 %v4207_v8, 16  ;;  %v320_v37 = vmul.f32 %v3758_v18, %v4110_v1 }
  0x29   : > { %v586_v48 = vsel %vm4147_vm6, 0, %v463_v35  ;;  %v4204_v2 = vld [vmem:[#allocation2 + $0x20] ss:$0 sps:$4 sm:$0x11]  }
  0x2a   : > { %803 = vst.msk [vmem:[#allocation2 + $0x38] sm:$0x1] %vm430_vm1, %v3464_v36  ;;  %v3462_v54 = vcombine.low %v586_v48, %v586_v48  ;;  %v3463_v55 = vcombine.high %v586_v48, %v586_v48  ;;  %v4196_v56 = vld [vmem:[#allocation2 + $0x14] ss:$0 sps:$4 sm:$0x11]   ;;  %v2460_v32 = vrot.slane %v4204_v2, 1  ;;  %v4265_v4 = vadd.f32 %v4116_v3, %v320_v37 }
  0x2b   : > { %v906_v39 = vld [vmem:[#allocation2 + $0x18] sm:$0xf]  ;;  %v4179_v40 = vld [vmem:[#allocation2 + $0x1c] sm:$0xf]  ;;  %v1948_v16 = vrot.slane %v4196_v56, 1 }
  0x2c   : > { %v4182_v41 = vcombine.low %v906_v39, %v4179_v40  ;;  %v904_v42 = vld [vmem:[#allocation2 + $0xc] sm:$0xf]  ;;  %v905_v43 = vld [vmem:[#allocation2 + $0x10] sm:$0xf]  ;;  %v969_v46 = vld [vmem:[#allocation2 + $0x18] sm:$0xf] }
  0x2d   : > { %v952_v44 = vld [vmem:[#allocation2 + $0xc] sm:$0xe]  ;;  %v4185_v45 = vcombine.low %v904_v42, %v905_v43  ;;  %v970_v47 = vld [vmem:[#allocation2 + $0x1c] sm:$0xf]  ;;  %v1017_v52 = vld [vmem:[#allocation2 + $0x18] sm:$0xe] }
  0x2e   : > { %1597 = vrot.lane.b32.xlu1 %v4182_v41, %s4047_s30  ;;  %v4194_v53 = vcombine.low %v969_v46, %v970_v47  ;;  %v3581_v57 = vcombine.low %v952_v44, %v905_v43  ;;  %v843_v61 = vld [vmem:[#allocation2 + $0x10] sm:$0xf]  ;;  %801 = vst.msk [vmem:[#allocation2 + $0x30] sm:$0xf] %vm427_vm0, %v3462_v54  ;;  %802 = vst.msk [vmem:[#allocation2 + $0x34] sm:$0xf] %vm427_vm0, %v3463_v55  ;;  %v3629_v11 = vcombine.low %v1017_v52, %v970_v47 }
  0x2f   : > { %1595 = vrot.lane.b32.xlu0 %v4185_v45, %s4047_s30  ;;  %v971_v58 = vld [vmem:[#allocation2 + $0x24] sm:$0xf]  ;;  %v972_v59 = vld [vmem:[#allocation2 + $0x28] sm:$0xf]  ;;  %v953_v6 = vld [vmem:[#allocation2 + $0x18] sm:$0xe]  ;;  %v4243_v43 = vadd.f32 %v4116_v3, %v318_v21  ;;  %v4255_v54 = vadd.f32 %v4116_v3, %v319_v25  ;;  %v4258_v55 = vmul.f32 %v3759_v26, %v4110_v1 }
  0x30   : > { %v4198_v62 = vcombine.low %v971_v58, %v972_v59  ;;  %v908_v63 = vld [vmem:[#allocation2 + $0x24] sm:$0xf]  ;;  %v4202_v0 = vld [vmem:[#allocation2 + $0x28] sm:$0xf]  ;;  %v889_v7 = vld [vmem:[#allocation2 + $0xc] sm:$0xe]  ;;  %v3582_v19 = vcombine.low %v953_v6, %v4179_v40 }
  0x31   : > { %v1018_v10 = vld [vmem:[#allocation2 + $0x24] sm:$0xe]  ;;  %v4214_v12 = vcombine.low %v908_v63, %v4202_v0  ;;  %v4216_v13 = vld [vmem:[#allocation2 + $0x14] ss:$0 sps:$4 sm:$0x11]   ;;  %v3534_v14 = vcombine.low %v889_v7, %v843_v61  ;;  %v1947_v15 = vrot.slane %v3581_v57, 1  ;;  %v3762_v57 = vunpack.c.l.bf16 %v4228_v27 }
  0x32   : > { %2109 = vrot.lane.b32.xlu1 %v4198_v62, %s4048_s6  ;;  %v4220_v20 = vld [vmem:[#allocation2 + $0x20] ss:$0 sps:$4 sm:$0x11]   ;;  %v3630_v22 = vcombine.low %v1018_v10, %v972_v59  ;;  %v4223_v23 = vld [vmem:[#allocation2 + $0x2c] ss:$0 sps:$4 sm:$0x11]  }
  0x33   : > { %2107 = vrot.lane.b32.xlu0 %v4194_v53, %s4048_s6  ;;  %v1438_v28 = vrot.slane %v3534_v14, 1  ;;  %v1439_v29 = vrot.slane %v4216_v13, 1  ;;  %v842_v30 = vld [vmem:[#allocation2 + $0xc] sm:$0xf]  ;;  %v2459_v31 = vrot.slane %v3629_v11, 1  ;;  %v1949_v35 = vsel %vm1434_vm3, %v1947_v15, %v1948_v16 }
  0x34   : > { %v847_v36 = vld [vmem:[#allocation2 + $0x28] sm:$0xf]  ;;  %v1950_v39 = vrot.slane %v3582_v19, 1  ;;  %v1951_v40 = vrot.slane %v4220_v20, 1  ;;  %v891_v42 = vld [vmem:[#allocation2 + $0x24] sm:$0xe]  ;;  %v4246_v46 = vcombine.low %v842_v30, %v843_v61 }
  0x35   : > { %v910_v33 = vld [vmem:[#allocation2 + $0x30] sm:$0xf]  ;;  %v4234_v34 = vld [vmem:[#allocation2 + $0x34] sm:$0xf]  ;;  %v1690_v44 = vshll.u32 %v4182_v41, 16  ;;  %v2462_v47 = vrot.slane %v3630_v22, 1  ;;  %v3536_v50 = vcombine.low %v891_v42, %v847_v36  ;;  %v1440_v59 = vsel %vm1434_vm3, %v1438_v28, %v1439_v29 }
  0x36   : > { %v4239_v38 = vcombine.low %v910_v33, %v4234_v34  ;;  %v2463_v48 = vrot.slane %v4223_v23, 1  ;;  %v4249_v49 = vld [vmem:[#allocation2 + $0x2c] ss:$0 sps:$4 sm:$0x11]   ;;  %v844_v51 = vld [vmem:[#allocation2 + $0x18] sm:$0xf]  ;;  %v2461_v61 = vsel %vm1434_vm3, %v2459_v31, %v2460_v32  ;;  %v1952_v6 = vsel %vm1434_vm3, %v1950_v39, %v1951_v40 }
  0x37   : > { %1599 = vrot.lane.b32.xlu0 %v4214_v12, %s4047_s30  ;;  %v845_v52 = vld [vmem:[#allocation2 + $0x1c] sm:$0xf]  ;;  %v1678_v58 = vshll.u32 %v4185_v45, 16  ;;  %v890_v63 = vld [vmem:[#allocation2 + $0x18] sm:$0xe]  ;;  %v2202_v5 = vshll.u32 %v4198_v62, 16  ;;  %v3763_v33 = vunpack.c.h.bf16 %v4228_v27 }
  0x38   : > { %1601 = vrot.lane.b32.xlu1 %v4239_v38, %s4047_s30  ;;  %v4269_v7 = vld [vmem:[#allocation2 + $0x20] ss:$0 sps:$4 sm:$0x11]   ;;  %v3535_v9 = vcombine.low %v890_v63, %v845_v52  ;;  %v1688_v10 = vshrl.u32 %v4182_v41, 16  ;;  %v2464_v11 = vsel %vm1434_vm3, %v2462_v47, %v2463_v48  ;;  %v846_v14 = vld [vmem:[#allocation2 + $0x24] sm:$0xf]  ;;  %v4273_v15 = vcombine.low %v844_v51, %v845_v52 }
  0x39   : > { %v1692_v16 = vrot.slane %v1690_v44, 1  ;;  %v1177_v18 = vshll.u32 %v4246_v46, 16  ;;  %v1444_v19 = vrot.slane %v3536_v50, 1  ;;  %v1445_v21 = vrot.slane %v4249_v49, 1 }
  0x3a   : > { %v1695_v22 = vshll.u32 %v4220_v20, 16  ;;  %v1175_v41 = vshrl.u32 %v4246_v46, 16  ;;  %v1441_v25 = vrot.slane %v3535_v9, 1  ;;  %v1442_v26 = vrot.slane %v4269_v7, 1 }
  0x3b   : > { %1995 = vrot.lane.b32.xlu0 %v1949_v35, %s4049_s7  ;;  %v1179_v28 = vrot.slane %v1177_v18, 1  ;;  %v1182_v29 = vshll.u32 %v4216_v13, 16  ;;  %v2200_v30 = vshrl.u32 %v4198_v62, 16  ;;  %v2204_v31 = vrot.slane %v2202_v5, 1 }
  0x3c   : > { %1485 = vrot.lane.b32.xlu1 %v1440_v59, %s4045_s28  ;;  %v2207_v32 = vshll.u32 %v4223_v23, 16  ;;  %v4286_v35 = vcombine.low %v846_v14, %v847_v36  ;;  %v1189_v37 = vshll.u32 %v4273_v15, 16  ;;  %v1676_v20 = vshrl.u32 %v4185_v45, 16  ;;  %v3977_v45 = vld [vmem:[%s5615_s3] sm:$0xff]  }
  0x3d   : > { %v1680_v39 = vrot.slane %v1678_v58, 1  ;;  %v2190_v40 = vshll.u32 %v4194_v53, 16  ;;  %v1693_v62 = vor.u32 %v1692_v16, %v1688_v10  ;;  %v1697_v13 = vrot.slane %v1695_v22, 1  ;;  %v4304_v58 = vld [vmem:[%s4105_s23 + $0x40] sm:$0xff]   ;;  %3830 = vmatprep.subr.bf16.mxu0 %v3977_v45  ;;  %3868 = vmatprep.subr.bf16.mxu1 %v3977_v45 }
  0x3e   : > { %v1683_v23 = vshll.u32 %v4196_v56, 16  ;;  %v1446_v42 = vsel %vm1434_vm3, %v1444_v19, %v1445_v21  ;;  %v1443_v36 = vsel %vm1434_vm3, %v1441_v25, %v1442_v26  ;;  %v1180_v44 = vor.u32 %v1179_v28, %v1175_v41  ;;  %v3982_v56 = vld [vmem:[%s5615_s3 + $0x8] sm:$0xff]   ;;  %3831 = vmatpush3.bf16.msra.mxu0 %v3977_v45  ;;  %3871 = vmatpush3.bf16.msra.mxu1 %v3977_v45  ;;  %v4322_v21 = vld [vmem:[#allocation2 + $0x24] sm:$0xe] }
  0x3f   : > { %2507 = vrot.lane.b32.xlu0 %v2461_v61, %s4050_s8  ;;  %v1184_v47 = vrot.slane %v1182_v29, 1  ;;  %v2205_v48 = vor.u32 %v2204_v31, %v2200_v30  ;;  %v2209_v50 = vrot.slane %v2207_v32, 1  ;;  %v1187_v51 = vshrl.u32 %v4273_v15, 16  ;;  %v4318_v16 = vld [vmem:[#allocation2 + $0x2c] ss:$0 sps:$4 sm:$0x11]   ;;  %3832 = vmatprep.subr.bf16.mxu0 %v3982_v56 }
  0x40   : > { %1997 = vrot.lane.b32.xlu1 %v1952_v6, %s4049_s7  ;;  %v4301_v52 = vmul.f32 %v3762_v57, %v4110_v1  ;;  %v1191_v59 = vrot.slane %v1189_v37, 1  ;;  %v1194_v61 = vshll.u32 %v4269_v7, 16  ;;  %v1681_v63 = vor.u32 %v1680_v39, %v1676_v20  ;;  %3869 = vmatprep.subr.bf16.mxu1 %v3982_v56  ;;  %v4328_v29 = vld [vmem:[#allocation2 + $0x38] ss:$0 sps:$4 sm:$0x11]  }
  0x41   : > { %v1201_v5 = vshll.u32 %v4286_v35, 16  ;;  %v1685_v57 = vrot.slane %v1683_v23, 1  ;;  %v2188_v6 = vshrl.u32 %v4194_v53, 16  ;;  %v2192_v9 = vrot.slane %v2190_v40, 1  ;;  %v973_v37 = vld [vmem:[#allocation2 + $0x30] sm:$0xf] }
  0x42   : > { %v2195_v10 = vshll.u32 %v4204_v2, 16  ;;  %v1698_v14 = vsel %vm1161_vm2, %v1693_v62, %v1697_v13  ;;  %v1185_v7 = vsel %vm1161_vm2, %v1180_v44, %v1184_v47  ;;  %v3766_v18 = vunpack.c.l.bf16 %v4304_v58  ;;  %v4334_v20 = vld [vmem:[#allocation2 + $0x34] sm:$0xf]  ;;  %3833 = vmatpush3.bf16.msra.mxu0 %v3982_v56  ;;  %3872 = vmatpush3.bf16.msra.mxu1 %v3982_v56  ;;  %v4358_v56 = vld [vmem:[#allocation2 + $0x38] ss:$0 sps:$4 sm:$0x11]  }
  0x43   : > { %2509 = vrot.lane.b32.xlu0 %v2464_v11, %s4050_s8  ;;  %v1702_v11 = vshll.u32 %v4214_v12, 16  ;;  %v1714_v19 = vshll.u32 %v4239_v38, 16  ;;  %v2210_v53 = vsel %vm1161_vm2, %v2205_v48, %v2209_v50  ;;  %v1206_v2 = vshll.u32 %v4249_v49, 16  ;;  %v4352_v48 = vld [vmem:[#allocation2 + $0x34] sm:$0xf] }
  0x44   : > { %1489 = vrot.lane.b32.xlu1 %v1446_v42, %s4045_s28  ;;  %v3767_v22 = vunpack.c.h.bf16 %v4304_v58  ;;  %v1192_v41 = vor.u32 %v1191_v59, %v1187_v51  ;;  %v1196_v25 = vrot.slane %v1194_v61, 1  ;;  %v1199_v26 = vshrl.u32 %v4286_v35, 16  ;;  %v955_v50 = vld [vmem:[#allocation2 + $0x30] sm:$0xe] }
  0x45   : > { %v1203_v28 = vrot.slane %v1201_v5, 1  ;;  %v1686_v30 = vsel %vm1161_vm2, %v1681_v63, %v1685_v57  ;;  %v2193_v31 = vor.u32 %v2192_v9, %v2188_v6  ;;  %v2197_v49 = vrot.slane %v2195_v10, 1 }
  0x46   : > { %v1700_v32 = vshrl.u32 %v4214_v12, 16  ;;  %v1704_v39 = vrot.slane %v1702_v11, 1  ;;  %v1707_v40 = vshll.u32 %v4318_v16, 16  ;;  %v467_v62 = vrot.slane %v465_v24, 7  ;;  %v848_v24 = vld [vmem:[#allocation2 + $0x30] sm:$0xf] }
  0x47   : > { %1487 = vrot.lane.b32.xlu0 %v1443_v36, %s4045_s28  ;;  %v468_v13 = vshll.u32 %v4207_v8, 16  ;;  %v3583_v23 = vcombine.low %v4322_v21, %v4202_v0  ;;  %v1208_v42 = vrot.slane %v1206_v2, 1  ;;  %v1712_v36 = vshrl.u32 %v4239_v38, 16 }
  0x48   : > { %1869 = vrot.lane.b32.xlu1 %v1698_v14, %s4051_s13  ;;  %v4345_v12 = vadd.f32 %v4116_v3, %v4258_v55  ;;  %v1716_v44 = vrot.slane %v1714_v19, 1  ;;  %v4348_v45 = vcombine.low %v973_v37, %v4334_v20  ;;  %v603_v8 = vsel %vm4147_vm6, %v467_v62, 0 }
  0x49   : > { %v470_v47 = vor.u32 %v468_v13, %v467_v62  ;;  %v1197_v0 = vsel %vm1161_vm2, %v1192_v41, %v1196_v25  ;;  %v1204_v38 = vor.u32 %v1203_v28, %v1199_v26  ;;  %v1719_v55 = vshll.u32 %v4328_v29, 16 }
  0x4a   : > { %v3467_v51 = vcombine.low %v603_v8, %v603_v8  ;;  %v2198_v59 = vsel %vm1161_vm2, %v2193_v31, %v2197_v49  ;;  %v1705_v61 = vor.u32 %v1704_v39, %v1700_v32  ;;  %v1709_v63 = vrot.slane %v1707_v40, 1 }
  0x4b   : > { %1356 = vrot.lane.b32.xlu0 %v1185_v7, %s4046_s29  ;;  %v587_v5 = vsel %vm4147_vm6, 0, %v470_v47  ;;  %v4365_v9 = vcombine.low %v848_v24, %v4352_v48  ;;  %v323_v10 = vmul.f32 %v3763_v33, %v4110_v1  ;;  %v3584_v11 = vcombine.low %v955_v50, %v4234_v34  ;;  %v1019_v7 = vld [vmem:[#allocation2 + $0x30] sm:$0xe]  ;;  %v4382_v34 = vld [vmem:[#allocation2 + $0x38] ss:$0 sps:$4 sm:$0x11]  }
  0x4c   : > { %2381 = vrot.lane.b32.xlu1 %v2210_v53, %s4052_s14  ;;  %v3465_v57 = vcombine.low %v587_v5, %v587_v5  ;;  %v3466_v6 = vcombine.high %v587_v5, %v587_v5  ;;  %806 = vst.msk [vmem:[#allocation2 + $0x44] sm:$0x1] %vm430_vm1, %v3467_v51  ;;  %v1717_v14 = vor.u32 %v1716_v44, %v1712_v36  ;;  %v2214_v19 = vshll.u32 %v4348_v45, 16 }
  0x4d   : > { %v4374_v21 = vadd.f32 %v4116_v3, %v4301_v52  ;;  %v1209_v53 = vsel %vm1161_vm2, %v1204_v38, %v1208_v42  ;;  %v2219_v27 = vshll.u32 %v4358_v56, 16  ;;  %v389_v33 = vmax.f32 %v4243_v43, 0.0 }
  0x4e   : > { %804 = vst.msk [vmem:[#allocation2 + $0x3c] sm:$0xf] %vm427_vm0, %v3465_v57  ;;  %805 = vst.msk [vmem:[#allocation2 + $0x40] sm:$0xf] %vm427_vm0, %v3466_v6  ;;  %v390_v2 = vmax.f32 %v4255_v54, 0.0  ;;  %v1721_v52 = vrot.slane %v1719_v55, 1  ;;  %v1710_v41 = vsel %vm1161_vm2, %v1705_v61, %v1709_v63  ;;  %v3631_v28 = vcombine.low %v1019_v7, %v4334_v20 }
  0x4f   : > { %1867 = vrot.lane.b32.xlu0 %v1686_v30, %s4051_s13  ;;  %v1953_v25 = vrot.slane %v3583_v23, 1  ;;  %v1954_v26 = vrot.slane %v4318_v16, 1  ;;  %v1213_v30 = vshll.u32 %v4365_v9, 16  ;;  %v362_v49 = vadd.f32 %v4116_v3, %v323_v10 }
  0x50   : > { %1358 = vrot.lane.b32.xlu1 %v1197_v0, %s4046_s29  ;;  %v416_v31 = vpack.c.bf16 %v390_v2, %v389_v33  ;;  %v1956_v32 = vrot.slane %v3584_v11, 1  ;;  %v2212_v37 = vshrl.u32 %v4348_v45, 16  ;;  %v2216_v39 = vrot.slane %v2214_v19, 1 }
  0x51   : > { %v324_v43 = vmul.f32 %v3766_v18, %v4110_v1  ;;  %v1957_v54 = vrot.slane %v4328_v29, 1  ;;  %v2221_v16 = vrot.slane %v2219_v27, 1  ;;  %v1218_v20 = vshll.u32 %v4382_v34, 16  ;;  %v4407_v29 = vld [vmem:[#allocation2 + $0x30] sm:$0xe] }
  0x52   : > { %v472_v40 = vshrl.u32 %v416_v31, 16  ;;  %v1722_v62 = vsel %vm1161_vm2, %v1717_v14, %v1721_v52  ;;  %v1955_v13 = vsel %vm1434_vm3, %v1953_v25, %v1954_v26  ;;  %v475_v42 = vshll.u32 %v416_v31, 16 }
  0x53   : > { %2379 = vrot.lane.b32.xlu0 %v2198_v59, %s4052_s14  ;;  %v4401_v23 = vld [vmem:[#allocation2 + $0x44] ss:$0 sps:$4 sm:$0x11]   ;;  %v325_v18 = vmul.f32 %v3767_v22, %v4110_v1  ;;  %v1211_v36 = vshrl.u32 %v4365_v9, 16  ;;  %v1215_v44 = vrot.slane %v1213_v30, 1  ;;  %v2465_v47 = vrot.slane %v3631_v28, 1 }
  0x54   : > { %1360 = vrot.lane.b32.xlu1 %v1209_v53, %s4046_s29  ;;  %v474_v8 = vrot.slane %v472_v40, 7  ;;  %v2217_v0 = vor.u32 %v2216_v39, %v2212_v37  ;;  %v2466_v38 = vrot.slane %v4358_v56, 1  ;;  %v391_v55 = vmax.f32 %v4265_v4, 0.0  ;;  %v4425_v7 = vld [vmem:[#allocation2 + $0x44] ss:$0 sps:$4 sm:$0x11]  }
  0x55   : > { %v975_v24 = vld [vmem:[#allocation2 + $0x3c] sm:$0xf]  ;;  %v976_v50 = vld [vmem:[#allocation2 + $0x40] sm:$0xf]  ;;  %v4412_v51 = vadd.f32 %v4116_v3, %v324_v43  ;;  %v1958_v1 = vsel %vm1434_vm3, %v1956_v32, %v1957_v54  ;;  %v392_v61 = vmax.f32 %v4345_v12, 0.0  ;;  %v393_v63 = vmax.f32 %v4374_v21, 0.0 }
  0x56   : > { %v3600_v58 = vcombine.low %v975_v24, %v976_v50  ;;  %v850_v22 = vld [vmem:[#allocation2 + $0x3c] sm:$0xf]  ;;  %v4417_v59 = vld [vmem:[#allocation2 + $0x40] sm:$0xf]  ;;  %v2231_v4 = vshll.u32 %v4401_v23, 16  ;;  %v477_v57 = vor.u32 %v475_v42, %v474_v8  ;;  %v394_v6 = vmax.f32 %v362_v49, 0.0 }
  0x57   : > { %1871 = vrot.lane.b32.xlu0 %v1710_v41, %s4051_s13  ;;  %v1020_v56 = vld [vmem:[#allocation2 + $0x3c] sm:$0xe]  ;;  %v4423_v5 = vcombine.low %v850_v22, %v4417_v59  ;;  %v1220_v14 = vrot.slane %v1218_v20, 1  ;;  %v364_v19 = vadd.f32 %v4116_v3, %v325_v18  ;;  %v2222_v53 = vsel %vm1161_vm2, %v2217_v0, %v2221_v16  ;;  %v4432_v2 = vld [vmem:[#allocation2 + $0x40] sm:$0xf] }
  0x58   : > { %1873 = vrot.lane.b32.xlu1 %v1722_v62, %s4051_s13  ;;  %v2226_v10 = vshll.u32 %v3600_v58, 16  ;;  %v2224_v11 = vshrl.u32 %v3600_v58, 16  ;;  %v1216_v12 = vor.u32 %v1215_v44, %v1211_v36  ;;  %v2467_v21 = vsel %vm1434_vm3, %v2465_v47, %v2466_v38  ;;  %v912_v33 = vld [vmem:[#allocation2 + $0x3c] sm:$0xf] }
  0x59   : > { %v3537_v27 = vcombine.low %v4407_v29, %v4352_v48  ;;  %v3632_v52 = vcombine.low %v1020_v56, %v976_v50  ;;  %v1225_v3 = vshll.u32 %v4423_v5, 16  ;;  %v588_v25 = vsel %vm4147_vm6, 0, %v477_v57  ;;  %v893_v49 = vld [vmem:[#allocation2 + $0x3c] sm:$0xe] }
  0x5a   : > { %v2228_v41 = vrot.slane %v2226_v10, 1  ;;  %v2233_v26 = vrot.slane %v2231_v4, 1  ;;  %v3468_v28 = vcombine.low %v588_v25, %v588_v25  ;;  %v417_v30 = vpack.c.bf16 %v392_v61, %v391_v55  ;;  %v956_v4 = vld [vmem:[#allocation2 + $0x3c] sm:$0xe] }
  0x5b   : > { %1999 = vrot.lane.b32.xlu0 %v1955_v13, %s4049_s7  ;;  %v418_v31 = vpack.c.bf16 %v394_v6, %v393_v63  ;;  %v3469_v32 = vcombine.high %v588_v25, %v588_v25  ;;  %v4441_v37 = vcombine.low %v912_v33, %v4432_v2  ;;  %v604_v39 = vsel %vm4147_vm6, %v474_v8, 0 }
  0x5c   : > { %2001 = vrot.lane.b32.xlu1 %v1958_v1, %s4049_s7  ;;  %v2229_v48 = vor.u32 %v2228_v41, %v2224_v11  ;;  %807 = vst.msk [vmem:[#allocation2 + $0x48] sm:$0xf] %vm427_vm0, %v3468_v28  ;;  %v3470_v43 = vcombine.low %v604_v39, %v604_v39  ;;  %v395_v54 = vmax.f32 %v4412_v51, 0.0  ;;  %v396_v16 = vmax.f32 %v364_v19, 0.0 }
  0x5d   : > { %v1223_v20 = vshrl.u32 %v4423_v5, 16  ;;  %v1227_v40 = vrot.slane %v1225_v3, 1  ;;  %v2468_v62 = vrot.slane %v3632_v52, 1  ;;  %v2469_v13 = vrot.slane %v4401_v23, 1  ;;  %808 = vst.msk [vmem:[#allocation2 + $0x4c] sm:$0xf] %vm427_vm0, %v3469_v32 }
  0x5e   : > { %v2234_v42 = vsel %vm1161_vm2, %v2229_v48, %v2233_v26  ;;  %v3538_v18 = vcombine.low %v893_v49, %v4417_v59  ;;  %809 = vst.msk [vmem:[#allocation2 + $0x50] sm:$0x1] %vm430_vm1, %v3470_v43  ;;  %v479_v36 = vshrl.u32 %v417_v30, 16  ;;  %v482_v44 = vshll.u32 %v417_v30, 16 }
  0x5f   : > { %2111 = vrot.lane.b32.xlu0 %v4348_v45, %s4048_s6  ;;  %v1230_v45 = vshll.u32 %v4425_v7, 16  ;;  %v1448_v47 = vrot.slane %v4382_v34, 1  ;;  %v1726_v29 = vshll.u32 %v4441_v37, 16  ;;  %v486_v8 = vshrl.u32 %v418_v31, 16 }
  0x60   : > { %2113 = vrot.lane.b32.xlu1 %v3600_v58, %s4048_s6  ;;  %v489_v24 = vshll.u32 %v418_v31, 16  ;;  %v1221_v50 = vsel %vm1161_vm2, %v1216_v12, %v1220_v14  ;;  %v1447_v0 = vrot.slane %v3537_v27, 1  ;;  %v4459_v23 = vld [vmem:[#allocation2 + $0x44] ss:$0 sps:$4 sm:$0x11]   ;;  %v481_v38 = vrot.slane %v479_v36, 7 }
  0x61   : > { %v4461_v55 = vpack.c.bf16 %v396_v16, %v395_v54  ;;  %v1228_v51 = vor.u32 %v1227_v40, %v1223_v20  ;;  %v1232_v1 = vrot.slane %v1230_v45, 1  ;;  %v1451_v34 = vrot.slane %v4425_v7, 1 }
  0x62   : > { %v488_v58 = vrot.slane %v486_v8, 7  ;;  %v2470_v22 = vsel %vm1434_vm3, %v2468_v62, %v2469_v13  ;;  %v1450_v59 = vrot.slane %v3538_v18, 1  ;;  %v484_v61 = vor.u32 %v482_v44, %v481_v38 }
  0x63   : > { %2383 = vrot.lane.b32.xlu0 %v2222_v53, %s4052_s14  ;;  %v605_v63 = vsel %vm4147_vm6, %v481_v38, 0  ;;  %v914_v56 = vld [vmem:[#allocation2 + $0x48] sm:$0xf]  ;;  %v1724_v57 = vshrl.u32 %v4441_v37, 16  ;;  %v1728_v6 = vrot.slane %v1726_v29, 1  ;;  %v1449_v14 = vsel %vm1434_vm3, %v1447_v0, %v1448_v47 }
  0x64   : > { %2385 = vrot.lane.b32.xlu1 %v2234_v42, %s4052_s14  ;;  %v3473_v10 = vcombine.low %v605_v63, %v605_v63  ;;  %v491_v11 = vor.u32 %v489_v24, %v488_v58  ;;  %v915_v19 = vld [vmem:[#allocation2 + $0x4c] sm:$0xf]  ;;  %v1731_v7 = vshll.u32 %v4459_v23, 16  ;;  %v589_v53 = vsel %vm4147_vm6, 0, %v484_v61  ;;  %v977_v12 = vld [vmem:[#allocation2 + $0x48] sm:$0xf] }
  0x65   : > { %v3554_v27 = vcombine.low %v914_v56, %v915_v19  ;;  %v3471_v33 = vcombine.low %v589_v53, %v589_v53  ;;  %v4477_v52 = vld [vmem:[#allocation2 + $0x4c] sm:$0xf]  ;;  %v4482_v3 = vld [vmem:[#allocation2 + $0x50] ss:$0 sps:$4 sm:$0x11]   ;;  %v3472_v25 = vcombine.high %v589_v53, %v589_v53  ;;  %v606_v30 = vsel %vm4147_vm6, %v488_v58, 0 }
  0x66   : > { %812 = vst.msk [vmem:[#allocation2 + $0x5c] sm:$0x1] %vm430_vm1, %v3473_v10  ;;  %v590_v41 = vsel %vm4147_vm6, 0, %v491_v11  ;;  %v493_v48 = vshrl.u32 %v4461_v55, 16  ;;  %v1452_v49 = vsel %vm1434_vm3, %v1450_v59, %v1451_v34  ;;  %v3585_v32 = vcombine.low %v956_v4, %v4432_v2  ;;  %v957_v39 = vld [vmem:[#allocation2 + $0x48] sm:$0xe] }
  0x67   : > { %2511 = vrot.lane.b32.xlu0 %v2467_v21, %s4050_s8  ;;  %v1233_v21 = vsel %vm1161_vm2, %v1228_v51, %v1232_v1  ;;  %v3474_v26 = vcombine.low %v590_v41, %v590_v41  ;;  %v3475_v28 = vcombine.high %v590_v41, %v590_v41  ;;  %v1738_v31 = vshll.u32 %v3554_v27, 16  ;;  %810 = vst.msk [vmem:[#allocation2 + $0x54] sm:$0xf] %vm427_vm0, %v3471_v33  ;;  %v852_v62 = vld [vmem:[#allocation2 + $0x48] sm:$0xf] }
  0x68   : > { %1362 = vrot.lane.b32.xlu1 %v1221_v50, %s4046_s29  ;;  %811 = vst.msk [vmem:[#allocation2 + $0x58] sm:$0xf] %vm427_vm0, %v3472_v25  ;;  %v1729_v45 = vor.u32 %v1728_v6, %v1724_v57  ;;  %v4496_v43 = vcombine.low %v977_v12, %v4477_v52  ;;  %v3476_v54 = vcombine.low %v606_v30, %v606_v30  ;;  %v1736_v16 = vshrl.u32 %v3554_v27, 16  ;;  %v4499_v13 = vld [vmem:[#allocation2 + $0x4c] sm:$0xf] }
  0x69   : > { %813 = vst.msk [vmem:[#allocation2 + $0x60] sm:$0xf] %vm427_vm0, %v3474_v26  ;;  %814 = vst.msk [vmem:[#allocation2 + $0x64] sm:$0xf] %vm427_vm0, %v3475_v28  ;;  %v1740_v20 = vrot.slane %v1738_v31, 1  ;;  %v1743_v2 = vshll.u32 %v4482_v3, 16  ;;  %v3586_v36 = vcombine.low %v957_v39, %v915_v19  ;;  %v4522_v61 = vcombine.low %v852_v62, %v4499_v13 }
  0x6a   : > { %v1733_v40 = vrot.slane %v1731_v7, 1  ;;  %815 = vst.msk [vmem:[#allocation2 + $0x68] sm:$0x1] %vm430_vm1, %v3476_v54  ;;  %v4502_v42 = vrot.slane %v493_v48, 7  ;;  %v496_v18 = vshll.u32 %v4461_v55, 16  ;;  %v3804_v47 = vld [vmem:[%s4105_s23 + $0x48] sm:$0xff]  }
  0x6b   : > { %2513 = vrot.lane.b32.xlu0 %v2470_v22, %s4050_s8  ;;  %v4505_v44 = vld [vmem:[#allocation2 + $0x50] ss:$0 sps:$4 sm:$0x11]   ;;  %v1959_v29 = vrot.slane %v3585_v32, 1  ;;  %v2238_v8 = vshll.u32 %v4496_v43, 16  ;;  %v1741_v24 = vor.u32 %v1740_v20, %v1736_v16  ;;  %v1745_v50 = vrot.slane %v1743_v2, 1 }
  0x6c   : > { %1364 = vrot.lane.b32.xlu1 %v1233_v21, %s4046_s29  ;;  %v1734_v0 = vsel %vm1161_vm2, %v1729_v45, %v1733_v40  ;;  %v1960_v38 = vrot.slane %v4459_v23, 1  ;;  %v498_v1 = vor.u32 %v496_v18, %v4502_v42  ;;  %v3770_v34 = vunpack.c.l.bf16 %v3804_v47  ;;  %v1021_v59 = vld [vmem:[#allocation2 + $0x48] sm:$0xe]  ;;  %v4533_v11 = vld [vmem:[#allocation2 + $0x50] ss:$0 sps:$4 sm:$0x11]  }
  0x6d   : > { %v1962_v58 = vrot.slane %v3586_v36, 1  ;;  %v1963_v22 = vrot.slane %v4482_v3, 1  ;;  %v4526_v23 = vld [vmem:[#allocation2 + $0x5c] ss:$0 sps:$4 sm:$0x11]   ;;  %v2236_v63 = vshrl.u32 %v4496_v43, 16  ;;  %v1746_v57 = vsel %vm1161_vm2, %v1741_v24, %v1745_v50 }
  0x6e   : > { %v979_v51 = vld [vmem:[#allocation2 + $0x54] sm:$0xf]  ;;  %v2240_v56 = vrot.slane %v2238_v8, 1  ;;  %v2243_v4 = vshll.u32 %v4505_v44, 16  ;;  %v1961_v6 = vsel %vm1434_vm3, %v1959_v29, %v1960_v38  ;;  %v591_v7 = vsel %vm4147_vm6, 0, %v498_v1 }
  0x6f   : > { %1491 = vrot.lane.b32.xlu0 %v1449_v14, %s4045_s28  ;;  %v4514_v55 = vld [vmem:[#allocation2 + $0x58] sm:$0xf]  ;;  %v854_v14 = vld [vmem:[#allocation2 + $0x54] sm:$0xf]  ;;  %v3771_v53 = vunpack.c.h.bf16 %v3804_v47  ;;  %v3633_v12 = vcombine.low %v1021_v59, %v4477_v52  ;;  %v1237_v21 = vshll.u32 %v4522_v61, 16  ;;  %v1964_v41 = vsel %vm1434_vm3, %v1962_v58, %v1963_v22 }
  0x70   : > { %1493 = vrot.lane.b32.xlu1 %v1452_v49, %s4045_s28  ;;  %v4535_v19 = vld [vmem:[#allocation2 + $0x58] sm:$0xf]  ;;  %v2255_v3 = vshll.u32 %v4526_v23, 16  ;;  %v2241_v25 = vor.u32 %v2240_v56, %v2236_v63  ;;  %v2245_v26 = vrot.slane %v2243_v4, 1  ;;  %v1022_v52 = vld [vmem:[#allocation2 + $0x54] sm:$0xe]  ;;  %v3477_v48 = vcombine.low %v591_v7, %v591_v7 }
  0x71   : > { %v4553_v31 = vcombine.low %v854_v14, %v4535_v19  ;;  %v3805_v49 = vld [vmem:[%s4105_s23 + $0x50] sm:$0xff]   ;;  %v1242_v32 = vshll.u32 %v4533_v11, 16  ;;  %v1235_v45 = vshrl.u32 %v4522_v61, 16  ;;  %v1239_v54 = vrot.slane %v1237_v21, 1  ;;  %v894_v2 = vld [vmem:[#allocation2 + $0x48] sm:$0xe] }
  0x72   : > { %v2471_v16 = vrot.slane %v3633_v12, 1  ;;  %v2472_v20 = vrot.slane %v4505_v44, 1  ;;  %816 = vst.msk [vmem:[#allocation2 + $0x6c] sm:$0xf] %vm427_vm0, %v3477_v48  ;;  %v3634_v40 = vcombine.low %v1022_v52, %v4514_v55  ;;  %v4570_v18 = vld [vmem:[%s5614_s2] ss:$0 sm:$0xff]  ;;  %v3774_v44 = vunpack.c.l.bf16 %v3805_v49 }
  0x73   : > { %1603 = vrot.lane.b32.xlu0 %v4441_v37, %s4047_s30  ;;  %v4519_v37 = vcombine.low %v979_v51, %v4514_v55  ;;  %v4565_v62 = vld [vmem:[#allocation2 + $0x5c] ss:$0 sps:$4 sm:$0x11]   ;;  %v2257_v29 = vrot.slane %v2255_v3, 1  ;;  %v2246_v8 = vsel %vm1161_vm2, %v2241_v25, %v2245_v26  ;;  %v1249_v24 = vshll.u32 %v4553_v31, 16 }
  0x74   : > { %1605 = vrot.lane.b32.xlu1 %v3554_v27, %s4047_s30  ;;  %v4544_v27 = vld [vmem:[%s5613_s1] ss:$0 sm:$0xff]  ;;  %v1244_v50 = vrot.slane %v1242_v32, 1  ;;  %v4576_v38 = vld [vmem:[#allocation2 + $0x58] sm:$0xf]  ;;  %v3478_v51 = vcombine.high %v591_v7, %v591_v7  ;;  %v1240_v1 = vor.u32 %v1239_v54, %v1235_v45  ;;  %v3539_v58 = vcombine.low %v894_v2, %v4499_v13 }
  0x75   : > { %v2250_v10 = vshll.u32 %v4519_v37, 16  ;;  %v326_v33 = vmul.f32 %v4544_v27, %v3770_v34  ;;  %v2248_v28 = vshrl.u32 %v4519_v37, 16  ;;  %v327_v39 = vmul.f32 %v4544_v27, %v3771_v53  ;;  %v918_v22 = vld [vmem:[#allocation2 + $0x60] sm:$0xf]  ;;  %v4581_v59 = vld [vmem:[#allocation2 + $0x64] sm:$0xf] }
  0x76   : > { %v2473_v34 = vsel %vm1434_vm3, %v2471_v16, %v2472_v20  ;;  %v3775_v63 = vunpack.c.h.bf16 %v3805_v49  ;;  %v1254_v56 = vshll.u32 %v4565_v62, 16  ;;  %v2474_v4 = vrot.slane %v3634_v40, 1  ;;  %817 = vst.msk [vmem:[#allocation2 + $0x70] sm:$0xf] %vm427_vm0, %v3478_v51  ;;  %v3806_v16 = vld [vmem:[%s4105_s23 + $0x58] sm:$0xff]  }
  0x77   : > { %1875 = vrot.lane.b32.xlu0 %v1734_v0, %s4051_s13  ;;  %v2252_v30 = vrot.slane %v2250_v10, 1  ;;  %v365_v36 = vadd.f32 %v4570_v18, %v326_v33  ;;  %v2475_v0 = vrot.slane %v4526_v23, 1  ;;  %v366_v55 = vadd.f32 %v4570_v18, %v327_v39  ;;  %v895_v10 = vld [vmem:[#allocation2 + $0x54] sm:$0xe]  ;;  %v959_v39 = vld [vmem:[#allocation2 + $0x60] sm:$0xe] }
  0x78   : > { %1877 = vrot.lane.b32.xlu1 %v1746_v57, %s4051_s13  ;;  %v1247_v23 = vshrl.u32 %v4553_v31, 16  ;;  %v607_v13 = vsel %vm4147_vm6, %v4502_v42, 0  ;;  %v4597_v7 = vcombine.low %v918_v22, %v4581_v59  ;;  %v1453_v53 = vrot.slane %v3539_v58, 1  ;;  %v4612_v32 = vld [vmem:[#allocation2 + $0x68] ss:$0 sps:$4 sm:$0x11]  }
  0x79   : > { %v2253_v47 = vor.u32 %v2252_v30, %v2248_v28  ;;  %v397_v12 = vmax.f32 %v365_v36, 0.0  ;;  %v328_v21 = vmul.f32 %v4544_v27, %v3774_v44  ;;  %v329_v33 = vmul.f32 %v4544_v27, %v3775_v63  ;;  %v4609_v30 = vld [vmem:[#allocation2 + $0x5c] ss:$0 sps:$4 sm:$0x11]   ;;  %v958_v40 = vld [vmem:[#allocation2 + $0x54] sm:$0xe] }
  0x7a   : > { %v1245_v42 = vsel %vm1161_vm2, %v1240_v1, %v1244_v50  ;;  %v3540_v3 = vcombine.low %v895_v10, %v4535_v19  ;;  %v1454_v25 = vrot.slane %v4533_v11, 1  ;;  %v2476_v52 = vsel %vm1434_vm3, %v2474_v4, %v2475_v0  ;;  %v981_v36 = vld [vmem:[#allocation2 + $0x60] sm:$0xf] }
  0x7b   : > { %2003 = vrot.lane.b32.xlu0 %v1961_v6, %s4049_s7  ;;  %v2258_v57 = vsel %vm1161_vm2, %v2253_v47, %v2257_v29  ;;  %v1251_v6 = vrot.slane %v1249_v24, 1  ;;  %v398_v48 = vmax.f32 %v366_v55, 0.0  ;;  %v1762_v49 = vshll.u32 %v4597_v7, 16  ;;  %v4624_v24 = vld [vmem:[#allocation2 + $0x64] sm:$0xf] }
  0x7c   : > { %2005 = vrot.lane.b32.xlu1 %v1964_v41, %s4049_s7  ;;  %v1256_v41 = vrot.slane %v1254_v56, 1  ;;  %v367_v54 = vadd.f32 %v4570_v18, %v328_v21  ;;  %v368_v19 = vadd.f32 %v4570_v18, %v329_v33  ;;  %v1456_v11 = vrot.slane %v3540_v3, 1  ;;  %v4630_v58 = vld [vmem:[%s4105_s23 + $0x60] sm:$0xff]  }
  0x7d   : > { %v1252_v26 = vor.u32 %v1251_v6, %v1247_v23  ;;  %v420_v45 = vpack.c.bf16 %v398_v48, %v397_v12  ;;  %v1457_v20 = vrot.slane %v4565_v62, 1  ;;  %v1455_v2 = vsel %vm1434_vm3, %v1453_v53, %v1454_v25  ;;  %v4641_v53 = vld [vmem:[#allocation2 + $0x68] ss:$0 sps:$4 sm:$0x11]  }
  0x7e   : > { %v1760_v50 = vshrl.u32 %v4597_v7, 16  ;;  %v1764_v0 = vrot.slane %v1762_v49, 1  ;;  %v3778_v62 = vunpack.c.l.bf16 %v3806_v16  ;;  %v3588_v51 = vcombine.low %v959_v39, %v4581_v59  ;;  %v983_v59 = vld [vmem:[#allocation2 + $0x6c] sm:$0xf] }
  0x7f   : > { %2115 = vrot.lane.b32.xlu0 %v4496_v43, %s4048_s6  ;;  %v916_v43 = vld [vmem:[#allocation2 + $0x54] sm:$0xf]  ;;  %v1257_v44 = vsel %vm1161_vm2, %v1252_v26, %v1256_v41  ;;  %v500_v55 = vshrl.u32 %v420_v45, 16  ;;  %v399_v1 = vmax.f32 %v367_v54, 0.0  ;;  %v3587_v22 = vcombine.low %v958_v40, %v4576_v38  ;;  %v4671_v40 = vld [vmem:[%s4105_s23 + $0x68] sm:$0xff]  }
  0x80   : > { %2117 = vrot.lane.b32.xlu1 %v4519_v37, %s4048_s6  ;;  %v4594_v14 = vcombine.low %v916_v43, %v4576_v38  ;;  %v3479_v37 = vcombine.low %v607_v13, %v607_v13  ;;  %v1767_v43 = vshll.u32 %v4612_v32, 16  ;;  %v4636_v63 = vcombine.low %v981_v36, %v4624_v24  ;;  %v3985_v54 = vld [vmem:[%s5615_s3 + $0x10] ss:$0 sps:$4 sm:$0x33]  }
  0x81   : > { %v3779_v23 = vunpack.c.h.bf16 %v3806_v16  ;;  %v1458_v56 = vsel %vm1434_vm3, %v1456_v11, %v1457_v20  ;;  %v503_v6 = vshll.u32 %v420_v45, 16  ;;  %v1765_v10 = vor.u32 %v1764_v0, %v1760_v50  ;;  %v1023_v11 = vld [vmem:[#allocation2 + $0x60] sm:$0xe]  ;;  %v858_v50 = vld [vmem:[#allocation2 + $0x6c] sm:$0xf]  ;;  %3874 = vmatprep.subr.msk.bf16.mxu0 %vm2856_vm7, %v3985_v54  ;;  %3875 = vmatprep.subr.msk.bf16.mxu1 %vm2856_vm7, %v3985_v54 }
  0x82   : > { %818 = vst.msk [vmem:[#allocation2 + $0x74] sm:$0x1] %vm430_vm1, %v3479_v37  ;;  %v1750_v28 = vshll.u32 %v4594_v14, 16  ;;  %v1748_v47 = vshrl.u32 %v4594_v14, 16  ;;  %v1769_v37 = vrot.slane %v1767_v43, 1  ;;  %v4644_v12 = vmul.f32 %v4544_v27, %v3778_v62 }
  0x83   : > { %2387 = vrot.lane.b32.xlu0 %v2246_v8, %s4052_s14  ;;  %v1755_v8 = vshll.u32 %v4609_v30, 16  ;;  %v3782_v38 = vunpack.c.l.bf16 %v4630_v58  ;;  %v1968_v21 = vrot.slane %v3588_v51, 1  ;;  %v502_v33 = vrot.slane %v500_v55, 7  ;;  %v4685_v0 = vld [vmem:[#allocation2 + $0x70] sm:$0xf] }
  0x84   : > { %2389 = vrot.lane.b32.xlu1 %v2258_v57, %s4052_s14  ;;  %v1752_v29 = vrot.slane %v1750_v28, 1  ;;  %v4639_v57 = vld [vmem:[#allocation2 + $0x70] sm:$0xf]  ;;  %v3783_v41 = vunpack.c.h.bf16 %v4630_v58  ;;  %v1965_v3 = vrot.slane %v3587_v22, 1  ;;  %v2262_v26 = vshll.u32 %v4636_v63, 16 }
  0x85   : > { %v1757_v13 = vrot.slane %v1755_v8, 1  ;;  %v4652_v25 = vcombine.low %v983_v59, %v4639_v57  ;;  %v4655_v28 = vld [vmem:[#allocation2 + $0x64] sm:$0xf]  ;;  %v4658_v48 = vmul.f32 %v4544_v27, %v3779_v23  ;;  %v1966_v39 = vrot.slane %v4609_v30, 1  ;;  %v896_v59 = vld [vmem:[#allocation2 + $0x60] sm:$0xe] }
  0x86   : > { %v1753_v4 = vor.u32 %v1752_v29, %v1748_v47  ;;  %v505_v45 = vor.u32 %v503_v6, %v502_v33  ;;  %v1969_v16 = vrot.slane %v4612_v32, 1  ;;  %v2267_v20 = vshll.u32 %v4641_v53, 16 }
  0x87   : > { %2515 = vrot.lane.b32.xlu0 %v2473_v34, %s4050_s8  ;;  %v400_v34 = vmax.f32 %v368_v19, 0.0  ;;  %v1770_v19 = vsel %vm1161_vm2, %v1765_v10, %v1769_v37  ;;  %v2260_v30 = vshrl.u32 %v4636_v63, 16  ;;  %v2274_v32 = vshll.u32 %v4652_v25, 16 }
  0x88   : > { %1366 = vrot.lane.b32.xlu1 %v1245_v42, %s4046_s29  ;;  %v1758_v49 = vsel %vm1161_vm2, %v1753_v4, %v1757_v13  ;;  %v592_v47 = vsel %vm4147_vm6, 0, %v505_v45  ;;  %v2264_v8 = vrot.slane %v2262_v26, 1  ;;  %v1967_v51 = vsel %vm1434_vm3, %v1965_v3, %v1966_v39  ;;  %v920_v26 = vld [vmem:[#allocation2 + $0x6c] sm:$0xf] }
  0x89   : > { %v421_v42 = vpack.c.bf16 %v400_v34, %v399_v1  ;;  %v3480_v43 = vcombine.low %v592_v47, %v592_v47  ;;  %v3481_v62 = vcombine.high %v592_v47, %v592_v47  ;;  %v4689_v55 = vld [vmem:[#allocation2 + $0x74] ss:$0 sps:$4 sm:$0x11]   ;;  %v3635_v22 = vcombine.low %v1023_v11, %v4624_v24  ;;  %v4701_v24 = vpop.permute.xlu1 %1483 }
  0x8a   : > { %v2858_v23 = vsel %vm2856_vm7, %v3985_v54, 0  ;;  %v2269_v4 = vrot.slane %v2267_v20, 1  ;;  %v4707_v3 = vcombine.low %v858_v50, %v4685_v0  ;;  %v2276_v39 = vrot.slane %v2274_v32, 1 }
  0x8b   : > { %2517 = vrot.lane.b32.xlu0 %v2476_v52, %s4050_s8  ;;  %v856_v52 = vld [vmem:[#allocation2 + $0x60] sm:$0xf]  ;;  %v507_v29 = vshrl.u32 %v421_v42, 16  ;;  %v510_v34 = vshll.u32 %v421_v42, 16  ;;  %819 = vst.msk [vmem:[#allocation2 + $0x78] sm:$0xf] %vm427_vm0, %v3480_v43  ;;  %3835 = vmatpush3.bf16.msra.mxu0 %v2858_v23  ;;  %v4703_v37 = vpop.permute.xlu0 %1354  ;;  %v3541_v47 = vcombine.low %v896_v59, %v4655_v28  ;;  %v3787_v32 = vunpack.c.h.bf16 %v4671_v40 }
  0x8c   : > { %1368 = vrot.lane.b32.xlu1 %v1257_v44, %s4046_s29  ;;  %v4675_v36 = vcombine.low %v856_v52, %v4655_v28  ;;  %v4677_v44 = vld [vmem:[#allocation2 + $0x68] ss:$0 sps:$4 sm:$0x11]   ;;  %820 = vst.msk [vmem:[#allocation2 + $0x7c] sm:$0xf] %vm427_vm0, %v3481_v62  ;;  %3873 = vmatpush3.bf16.msra.mxu1 %v2858_v23  ;;  %v2279_v45 = vshll.u32 %v4689_v55, 16  ;;  %v333_v23 = vmul.f32 %v4544_v27, %v3783_v41 }
  0x8d   : > { %v509_v1 = vrot.slane %v507_v29, 7  ;;  %v1266_v13 = vshll.u32 %v4677_v44, 16  ;;  %v369_v29 = vadd.f32 %v4570_v18, %v4644_v12  ;;  %v1273_v50 = vshll.u32 %v4707_v3, 16  ;;  %v4755_v41 = vld [vmem:[#allocation2 + $0x74] ss:$0 sps:$4 sm:$0x11]  }
  0x8e   : > { %v1261_v42 = vshll.u32 %v4675_v36, 16  ;;  %v2281_v28 = vrot.slane %v2279_v45, 1 }
  0x8f   : > { %1495 = vrot.lane.b32.xlu0 %v1455_v2, %s4045_s28  ;;  %v512_v6 = vor.u32 %v510_v34, %v509_v1  ;;  %v609_v10 = vsel %vm4147_vm6, %v509_v1, 0  ;;  %v1268_v1 = vrot.slane %v1266_v13, 1  ;;  %v897_v34 = vld [vmem:[#allocation2 + $0x6c] sm:$0xe] }
  0x90   : > { %1497 = vrot.lane.b32.xlu1 %v1458_v56, %s4045_s28  ;;  %v3786_v56 = vunpack.c.l.bf16 %v4671_v40  ;;  %v3485_v52 = vcombine.low %v609_v10, %v609_v10  ;;  %v960_v10 = vld [vmem:[#allocation2 + $0x6c] sm:$0xe] }
  0x91   : > { %v593_v54 = vsel %vm4147_vm6, 0, %v512_v6  ;;  %v1459_v6 = vrot.slane %v3541_v47, 1 }
  0x92   : > { %v3483_v11 = vcombine.low %v593_v54, %v593_v54  ;;  %v3484_v20 = vcombine.high %v593_v54, %v593_v54  ;;  %824 = vst.msk [vmem:[#allocation2 + $0x8c] sm:$0x1] %vm430_vm1, %v3485_v52  ;;  %v334_v45 = vmul.f32 %v4544_v27, %v3786_v56  ;;  %v335_v54 = vmul.f32 %v4544_v27, %v3787_v32 }
  0x93   : > { %1607 = vrot.lane.b32.xlu0 %v4594_v14, %s4047_s30  ;;  %v608_v14 = vsel %vm4147_vm6, %v502_v33, 0  ;;  %v2265_v33 = vor.u32 %v2264_v8, %v2260_v30  ;;  %v4718_v30 = vld [vmem:[#allocation2 + $0x74] ss:$0 sps:$4 sm:$0x11]   ;;  %v1263_v8 = vrot.slane %v1261_v42, 1  ;;  %v401_v42 = vmax.f32 %v369_v29, 0.0 }
  0x94   : > { %v3482_v2 = vcombine.low %v608_v14, %v608_v14  ;;  %1609 = vrot.lane.b32.xlu1 %v4597_v7, %s4047_s30  ;;  %v1970_v7 = vsel %vm1434_vm3, %v1968_v21, %v1969_v16  ;;  %v1024_v21 = vld [vmem:[#allocation2 + $0x6c] sm:$0xe]  ;;  %v4711_v14 = vld [vmem:[#allocation2 + $0x70] sm:$0xf]  ;;  %v2478_v16 = vrot.slane %v4641_v53, 1  ;;  %v1278_v59 = vshll.u32 %v4718_v30, 16 }
  0x95   : > { %v3636_v53 = vcombine.low %v1024_v21, %v4639_v57  ;;  %v4730_v43 = vcombine.low %v920_v26, %v4711_v14  ;;  %822 = vst.msk [vmem:[#allocation2 + $0x84] sm:$0xf] %vm427_vm0, %v3483_v11  ;;  %823 = vst.msk [vmem:[#allocation2 + $0x88] sm:$0xf] %vm427_vm0, %v3484_v20  ;;  %v2270_v62 = vsel %vm1161_vm2, %v2265_v33, %v2269_v4  ;;  %v2481_v33 = vrot.slane %v4689_v55, 1  ;;  %v4776_v20 = vld [vmem:[%s4105_s23 + $0x70] sm:$0xff]  }
  0x96   : > { %821 = vst.msk [vmem:[#allocation2 + $0x80] sm:$0x1] %vm430_vm1, %v3482_v2  ;;  %v1259_v2 = vshrl.u32 %v4675_v36, 16  ;;  %v370_v57 = vadd.f32 %v4570_v18, %v4658_v48  ;;  %v1271_v48 = vshrl.u32 %v4707_v3, 16  ;;  %v3589_v55 = vcombine.low %v960_v10, %v4711_v14  ;;  %v985_v10 = vld [vmem:[#allocation2 + $0x78] sm:$0xf] }
  0x97   : > { %1879 = vrot.lane.b32.xlu0 %v1758_v49, %s4051_s13  ;;  %v2272_v49 = vshrl.u32 %v4652_v25, 16  ;;  %v2480_v13 = vrot.slane %v3636_v53, 1  ;;  %v1774_v58 = vshll.u32 %v4730_v43, 16  ;;  %v4773_v11 = vadd.f32 %v4570_v18, %v333_v23 }
  0x98   : > { %1881 = vrot.lane.b32.xlu1 %v1770_v19, %s4051_s13  ;;  %v2477_v19 = vrot.slane %v3635_v22, 1  ;;  %v332_v22 = vmul.f32 %v4544_v27, %v3782_v38  ;;  %v1275_v38 = vrot.slane %v1273_v50, 1  ;;  %v402_v26 = vmax.f32 %v370_v57, 0.0 }
  0x99   : > { %v2277_v12 = vor.u32 %v2276_v39, %v2272_v49  ;;  %v4761_v49 = vld [vmem:[#allocation2 + $0x7c] sm:$0xf]  ;;  %v1772_v56 = vshrl.u32 %v4730_v43, 16  ;;  %v1776_v47 = vrot.slane %v1774_v58, 1  ;;  %v1779_v29 = vshll.u32 %v4755_v41, 16 }
  0x9a   : > { %v2479_v4 = vsel %vm1434_vm3, %v2477_v19, %v2478_v16  ;;  %v4764_v39 = vadd.f32 %v4570_v18, %v332_v22  ;;  %v1280_v19 = vrot.slane %v1278_v59, 1  ;;  %v3542_v16 = vcombine.low %v897_v34, %v4685_v0 }
  0x9b   : > { %2007 = vrot.lane.b32.xlu0 %v1967_v51, %s4049_s7  ;;  %v2282_v21 = vsel %vm1161_vm2, %v2277_v12, %v2281_v28  ;;  %v1276_v40 = vor.u32 %v1275_v38, %v1271_v48  ;;  %v2482_v14 = vsel %vm1434_vm3, %v2480_v13, %v2481_v33  ;;  %v422_v53 = vpack.c.bf16 %v402_v26, %v401_v42  ;;  %v961_v12 = vld [vmem:[#allocation2 + $0x78] sm:$0xe] }
  0x9c   : > { %2009 = vrot.lane.b32.xlu1 %v1970_v7, %s4049_s7  ;;  %v1460_v7 = vrot.slane %v4677_v44, 1  ;;  %v1264_v44 = vor.u32 %v1263_v8, %v1259_v2  ;;  %v373_v28 = vadd.f32 %v4570_v18, %v334_v45  ;;  %v3790_v57 = vunpack.c.l.bf16 %v4776_v20 }
  0x9d   : > { %v1462_v34 = vrot.slane %v3542_v16, 1  ;;  %v1463_v22 = vrot.slane %v4718_v30, 1  ;;  %v3975_v23 = vld [vmem:[#allocation2 + $0x80] ss:$0 sps:$4 sm:$0x11]   ;;  %v1777_v48 = vor.u32 %v1776_v47, %v1772_v56  ;;  %v1781_v59 = vrot.slane %v1779_v29, 1 }
  0x9e   : > { %v1269_v0 = vsel %vm1161_vm2, %v1264_v44, %v1268_v1  ;;  %v1461_v50 = vsel %vm1434_vm3, %v1459_v6, %v1460_v7  ;;  %v2541_v1 = vsel %vm2539_vm8, %v4120_v17, %v4703_v37  ;;  %v1281_v7 = vsel %vm1161_vm2, %v1276_v40, %v1280_v19  ;;  %v4803_v44 = vld [vmem:[#allocation2 + $0x7c] sm:$0xf] }
  0x9f   : > { %2119 = vrot.lane.b32.xlu0 %v4636_v63, %s4048_s6  ;;  %v1972_v6 = vrot.slane %v4755_v41, 1  ;;  %v3590_v37 = vcombine.low %v961_v12, %v4761_v49  ;;  %v514_v30 = vshrl.u32 %v422_v53, 16  ;;  %v403_v38 = vmax.f32 %v4764_v39, 0.0  ;;  %v4822_v39 = vld [vmem:[#allocation2 + $0x80] ss:$0 sps:$4 sm:$0x11]  }
  0xa0   : > { %v4737_v51 = vpop.permute.xlu1 %1597  ;;  %2121 = vrot.lane.b32.xlu1 %v4652_v25, %s4048_s6  ;;  %v922_v25 = vld [vmem:[#allocation2 + $0x78] sm:$0xf]  ;;  %v405_v33 = vmax.f32 %v373_v28, 0.0  ;;  %v3791_v41 = vunpack.c.h.bf16 %v4776_v20  ;;  %v4816_v26 = vsel %vm2572_vm9, %v2541_v1, %v4701_v24  ;;  %v4820_v45 = vcombine.low %v985_v10, %v4803_v44  ;;  %v4833_v56 = vld [vmem:[#allocation2 + $0x7c] sm:$0xf] }
  0xa1   : > { %v4739_v63 = vpop.permute.xlu0 %1595  ;;  %v4787_v32 = vcombine.low %v922_v25, %v4761_v49  ;;  %v1464_v25 = vsel %vm1434_vm3, %v1462_v34, %v1463_v22  ;;  %v1791_v49 = vshll.u32 %v3975_v23, 16  ;;  %v1782_v19 = vsel %vm1161_vm2, %v1777_v48, %v1781_v59  ;;  %v4839_v12 = vld [vmem:[#allocation2 + $0x88] sm:$0xf]  ;;  %v4856_v48 = vld [vmem:[#allocation2 + $0x8c] ss:$0 sps:$4 sm:$0x11]  }
  0xa2   : > { %v1975_v16 = vrot.slane %v3975_v23, 1  ;;  %v1974_v40 = vrot.slane %v3590_v37, 1  ;;  %v516_v47 = vrot.slane %v514_v30, 7  ;;  %v517_v29 = vshll.u32 %v422_v53, 16 }
  0xa3   : > { %2391 = vrot.lane.b32.xlu0 %v2270_v62, %s4052_s14  ;;  %v374_v62 = vadd.f32 %v4570_v18, %v335_v54  ;;  %v1786_v17 = vshll.u32 %v4787_v32, 16  ;;  %v1784_v54 = vshrl.u32 %v4787_v32, 16  ;;  %v4842_v1 = vmul.f32 %v4544_v27, %v3790_v57 }
  0xa4   : > { %2393 = vrot.lane.b32.xlu1 %v2282_v21, %s4052_s14  ;;  %v4779_v2 = vpop.permute.xlu1 %2109  ;;  %v404_v21 = vmax.f32 %v4773_v11, 0.0  ;;  %v860_v11 = vld [vmem:[#allocation2 + $0x78] sm:$0xf]  ;;  %v4845_v34 = vmul.f32 %v4544_v27, %v3791_v41  ;;  %v2286_v22 = vshll.u32 %v4820_v45, 16  ;;  %v2291_v23 = vshll.u32 %v4822_v39, 16 }
  0xa5   : > { %v4759_v52 = vpop.permute.xlu0 %2107  ;;  %v406_v42 = vmax.f32 %v374_v62, 0.0  ;;  %v1788_v20 = vrot.slane %v1786_v17, 1  ;;  %v519_v53 = vor.u32 %v517_v29, %v516_v47  ;;  %v4859_v59 = vcombine.low %v860_v11, %v4833_v56 }
  0xa6   : > { %v423_v28 = vpack.c.bf16 %v404_v21, %v403_v38  ;;  %v4862_v17 = vsel %vm1434_vm3, %v1974_v40, %v1975_v16  ;;  %v4873_v21 = vld [vmem:[#allocation2 + $0x84] sm:$0xe]  ;;  %v4881_v40 = vrot.slane %v2291_v23, 1 }
  0xa7   : > { %2519 = vrot.lane.b32.xlu0 %v2479_v4, %s4050_s8  ;;  %v1971_v4 = vrot.slane %v3589_v55, 1  ;;  %v4831_v55 = vld [vmem:[#allocation2 + $0x78] sm:$0xe]  ;;  %v424_v62 = vpack.c.bf16 %v406_v42, %v405_v33  ;;  %v1789_v10 = vor.u32 %v1788_v20, %v1784_v54  ;;  %v2284_v33 = vshrl.u32 %v4820_v45, 16 }
  0xa8   : > { %1370 = vrot.lane.b32.xlu1 %v1269_v0, %s4046_s29  ;;  %v524_v54 = vshll.u32 %v423_v28, 16  ;;  %v2303_v20 = vshll.u32 %v4856_v48, 16 }
  0xa9   : > { %v4789_v8 = vpop.permute.xlu0 %1599  ;;  %v4829_v24 = vsel %vm1434_vm3, %v1971_v4, %v1972_v6  ;;  %v610_v4 = vsel %vm4147_vm6, %v516_v47, 0  ;;  %v528_v16 = vshrl.u32 %v424_v62, 16  ;;  %v531_v11 = vshll.u32 %v424_v62, 16  ;;  %v4890_v62 = vld [vmem:[#allocation2 + $0x88] sm:$0xf] }
  0xaa   : > { %v4808_v13 = vpop.permute.xlu1 %1601  ;;  %v3488_v6 = vcombine.low %v610_v4, %v610_v4  ;;  %v1285_v47 = vshll.u32 %v4859_v59, 16 }
  0xab   : > { %2521 = vrot.lane.b32.xlu0 %v2482_v14, %s4050_s8 }
  0xac   : > { %1372 = vrot.lane.b32.xlu1 %v1281_v7, %s4046_s29  ;;  %v1793_v7 = vrot.slane %v1791_v49, 1  ;;  %827 = vst.msk [vmem:[#allocation2 + $0x98] sm:$0x1] %vm430_vm1, %v3488_v6  ;;  %v2288_v49 = vrot.slane %v2286_v22, 1  ;;  %v530_v22 = vrot.slane %v528_v16, 7 }
  0xad   : > { %v4810_v58 = vpop.permute.xlu0 %1995  ;;  %v4897_v6 = vld [vmem:[#allocation2 + $0x80] ss:$0 sps:$4 sm:$0x11]  }
  0xae   : > { %v4835_v0 = vpop.permute.xlu1 %1485 }
  0xaf   : > { %1499 = vrot.lane.b32.xlu0 %v1461_v50, %s4045_s28  ;;  %v987_v50 = vld [vmem:[#allocation2 + $0x84] sm:$0xf] }
  0xb0   : > { %1501 = vrot.lane.b32.xlu1 %v1464_v25, %s4045_s28  ;;  %v4865_v37 = vcombine.low %v987_v50, %v4839_v12  ;;  %v521_v25 = vshrl.u32 %v423_v28, 16  ;;  %v1794_v50 = vsel %vm1161_vm2, %v1789_v10, %v1793_v7  ;;  %v1283_v7 = vshrl.u32 %v4859_v59, 16 }
  0xb1   : > { %v4837_v14 = vpop.permute.xlu0 %2507 }
  0xb2   : > { %v4869_v30 = vpop.permute.xlu1 %1997  ;;  %v523_v29 = vrot.slane %v521_v25, 7  ;;  %v2298_v28 = vshll.u32 %v4865_v37, 16  ;;  %v2296_v4 = vshrl.u32 %v4865_v37, 16  ;;  %v1287_v25 = vrot.slane %v1285_v47, 1 }
  0xb3   : > { %1611 = vrot.lane.b32.xlu0 %v4730_v43, %s4047_s30  ;;  %v594_v43 = vsel %vm4147_vm6, 0, %v519_v53  ;;  %v4916_v47 = vld [vmem:[#allocation2 + $0x8c] ss:$0 sps:$4 sm:$0x11]  }
  0xb4   : > { %v3486_v42 = vcombine.low %v594_v43, %v594_v43  ;;  %v3487_v41 = vcombine.high %v594_v43, %v594_v43  ;;  %1613 = vrot.lane.b32.xlu1 %v4787_v32, %s4047_s30  ;;  %v3638_v32 = vcombine.low %v4873_v21, %v4839_v12  ;;  %v526_v10 = vor.u32 %v524_v54, %v523_v29 }
  0xb5   : > { %v4871_v38 = vpop.permute.xlu0 %2509  ;;  %v611_v43 = vsel %vm4147_vm6, %v523_v29, 0  ;;  %v2289_v12 = vor.u32 %v2288_v49, %v2284_v33  ;;  %v2300_v33 = vrot.slane %v2298_v28, 1  ;;  %v4921_v28 = vadd.f32 %v4570_v18, %v4842_v1 }
  0xb6   : > { %825 = vst.msk [vmem:[#allocation2 + $0x90] sm:$0xf] %vm427_vm0, %v3486_v42  ;;  %826 = vst.msk [vmem:[#allocation2 + $0x94] sm:$0xf] %vm427_vm0, %v3487_v41  ;;  %v4892_v23 = vpop.permute.xlu1 %1489  ;;  %v3491_v21 = vcombine.low %v611_v43, %v611_v43  ;;  %v533_v42 = vor.u32 %v531_v11, %v530_v22  ;;  %v612_v41 = vsel %vm4147_vm6, %v530_v22, 0  ;;  %v595_v54 = vsel %vm4147_vm6, 0, %v526_v10 }
  0xb7   : > { %1883 = vrot.lane.b32.xlu0 %v1782_v19, %s4051_s13  ;;  %v862_v19 = vld [vmem:[#allocation2 + $0x84] sm:$0xf]  ;;  %v3494_v29 = vcombine.low %v612_v41, %v612_v41  ;;  %v3489_v49 = vcombine.low %v595_v54, %v595_v54  ;;  %v3490_v43 = vcombine.high %v595_v54, %v595_v54  ;;  %v2607_v10 = vsel %vm2605_vm10, %v4816_v26, %v4739_v63  ;;  %v898_v26 = vld [vmem:[#allocation2 + $0x78] sm:$0xe] }
  0xb8   : > { %1885 = vrot.lane.b32.xlu1 %v1794_v50, %s4051_s13  ;;  %v4908_v16 = vcombine.low %v862_v19, %v4890_v62  ;;  %830 = vst.msk [vmem:[#allocation2 + $0xa4] sm:$0x1] %vm430_vm1, %v3491_v21  ;;  %v596_v11 = vsel %vm4147_vm6, 0, %v533_v42  ;;  %v5620_v42 = vcombine.low %v4831_v55, %v4803_v44  ;;  %v2484_v54 = vrot.slane %v4822_v39, 1 }
  0xb9   : > { %v4894_v53 = vpop.permute.xlu0 %1487  ;;  %v3492_v19 = vcombine.low %v596_v11, %v596_v11  ;;  %v3493_v57 = vcombine.high %v596_v11, %v596_v11  ;;  %833 = vst.msk [vmem:[#allocation2 + $0xb0] sm:$0x1] %vm430_vm1, %v3494_v29  ;;  %v2486_v44 = vrot.slane %v3638_v32, 1  ;;  %v2301_v55 = vor.u32 %v2300_v33, %v2296_v4  ;;  %v3810_v33 = vld [vmem:[%s4105_s23 + $0x78] sm:$0xff]  }
  0xba   : > { %v1870_v50 = vpop.permute.xlu1 %1869  ;;  %v2483_v41 = vrot.slane %v5620_v42, 1  ;;  %828 = vst.msk [vmem:[#allocation2 + $0x9c] sm:$0xf] %vm427_vm0, %v3489_v49  ;;  %829 = vst.msk [vmem:[#allocation2 + $0xa0] sm:$0xf] %vm427_vm0, %v3490_v43  ;;  %v1297_v63 = vshll.u32 %v4908_v16, 16  ;;  %v1288_v43 = vor.u32 %v1287_v25, %v1283_v7 }
  0xbb   : > { %2011 = vrot.lane.b32.xlu0 %v4829_v24, %s4049_s7  ;;  %v1290_v24 = vshll.u32 %v4897_v6, 16  ;;  %831 = vst.msk [vmem:[#allocation2 + $0xa8] sm:$0xf] %vm427_vm0, %v3492_v19  ;;  %832 = vst.msk [vmem:[#allocation2 + $0xac] sm:$0xf] %vm427_vm0, %v3493_v57  ;;  %v1302_v57 = vshll.u32 %v4916_v47, 16 }
  0xbc   : > { %2013 = vrot.lane.b32.xlu1 %v4862_v17, %s4049_s7  ;;  %v2487_v17 = vrot.slane %v4856_v48, 1  ;;  %v3543_v48 = vcombine.low %v898_v26, %v4833_v56 }
  0xbd   : > { %v1357_v22 = vpop.permute.xlu0 %1356  ;;  %v1292_v11 = vrot.slane %v1290_v24, 1  ;;  %v2485_v24 = vsel %vm1434_vm3, %v2483_v41, %v2484_v54  ;;  %v926_v42 = vld [vmem:[#allocation2 + $0x90] sm:$0xf]  ;;  %v1304_v41 = vrot.slane %v1302_v57, 1  ;;  %v1466_v54 = vrot.slane %v4897_v6, 1 }
  0xbe   : > { %v2543_v21 = vsel %vm2539_vm8, %v4246_v46, %v1357_v22  ;;  %v2305_v46 = vrot.slane %v2303_v20, 1  ;;  %v4948_v20 = vld [vmem:[#allocation2 + $0x88] sm:$0xf]  ;;  %v2382_v29 = vpop.permute.xlu1 %2381  ;;  %v1465_v26 = vrot.slane %v3543_v48, 1 }
  0xbf   : > { %v2576_v1 = vsel %vm2572_vm9, %v2543_v21, %v4835_v0  ;;  %2123 = vrot.lane.b32.xlu0 %v4820_v45, %s4048_s6  ;;  %v2294_v0 = vsel %vm1161_vm2, %v2289_v12, %v4881_v40  ;;  %v924_v45 = vld [vmem:[#allocation2 + $0x84] sm:$0xf]  ;;  %v1295_v40 = vshrl.u32 %v4908_v16, 16 }
  0xc0   : > { %v2609_v39 = vsel %vm2605_vm10, %v2576_v1, %v4737_v51  ;;  %v899_v12 = vld [vmem:[#allocation2 + $0x84] sm:$0xe]  ;;  %2125 = vrot.lane.b32.xlu1 %v4865_v37, %s4048_s6  ;;  %v2306_v22 = vsel %vm1161_vm2, %v2301_v55, %v2305_v46  ;;  %v376_v37 = vadd.f32 %v4570_v18, %v4845_v34  ;;  %v4977_v1 = vld [vmem:[#allocation2 + $0x94] sm:$0xf]  ;;  %v3794_v46 = vunpack.c.l.bf16 %v3810_v33 }
  0xc1   : > { %v2642_v32 = vsel %vm2638_vm11, %v2609_v39, %v1870_v50  ;;  %v1868_v49 = vpop.permute.xlu0 %1867  ;;  %v1299_v50 = vrot.slane %v1297_v63, 1  ;;  %v3544_v21 = vcombine.low %v899_v12, %v4890_v62  ;;  %v4982_v34 = vld [vmem:[#allocation2 + $0x8c] ss:$0 sps:$4 sm:$0x11]   ;;  %v962_v39 = vld [vmem:[#allocation2 + $0x84] sm:$0xe]  ;;  %v4993_v6 = vcombine.low %v926_v42, %v4977_v1 }
  0xc2   : > { %v2640_v51 = vsel %vm2638_vm11, %v2607_v10, %v1868_v49  ;;  %v2675_v4 = vsel %vm2671_vm12, %v2642_v32, %v4869_v30  ;;  %v4966_v30 = vcombine.low %v924_v45, %v4948_v20  ;;  %v408_v45 = vmax.f32 %v376_v37, 0.0  ;;  %v989_v12 = vld [vmem:[#allocation2 + $0x90] sm:$0xf] }
  0xc3   : > { %v2673_v7 = vsel %vm2671_vm12, %v2640_v51, %v4810_v58  ;;  %2395 = vrot.lane.b32.xlu0 %v2294_v0, %s4052_s14  ;;  %v2708_v25 = vsel %vm2704_vm13, %v2675_v4, %v4779_v2  ;;  %v1359_v58 = vpop.permute.xlu1 %1358  ;;  %v2488_v2 = vsel %vm1434_vm3, %v2486_v44, %v2487_v17  ;;  %v1300_v44 = vor.u32 %v1299_v50, %v1295_v40 }
  0xc4   : > { %v2706_v56 = vsel %vm2704_vm13, %v2673_v7, %v4759_v52  ;;  %v2741_v10 = vsel %vm2737_vm14, %v2708_v25, %v2382_v29  ;;  %v1293_v52 = vsel %vm1161_vm2, %v1288_v43, %v1292_v11  ;;  %2397 = vrot.lane.b32.xlu1 %v2306_v22, %s4052_s14  ;;  %v1798_v55 = vshll.u32 %v4966_v30, 16 }
  0xc5   : > { %v2380_v19 = vpop.permute.xlu0 %2379  ;;  %v2774_v0 = vsel %vm2770_vm15, %v2741_v10, %v4871_v38  ;;  %v407_v17 = vmax.f32 %v4921_v28, 0.0  ;;  %v1468_v32 = vrot.slane %v3544_v21, 1  ;;  %v1469_v49 = vrot.slane %v4916_v47, 1  ;;  %v5002_v38 = vld [vmem:[#allocation2 + $0x98] ss:$0 sps:$4 sm:$0x11]  }
  0xc6   : > { %v2739_v63 = vsel %vm2737_vm14, %v2706_v56, %v2380_v19  ;;  %v3795_v43 = vunpack.c.h.bf16 %v3810_v33  ;;  %v338_v11 = vmul.f32 %v4544_v27, %v3794_v46  ;;  %v3591_v57 = vcombine.low %v962_v39, %v4948_v20  ;;  %v963_v28 = vld [vmem:[#allocation2 + $0x90] sm:$0xe]  ;;  %v5011_v20 = vld [vmem:[#allocation2 + $0x94] sm:$0xf]  ;;  %v5028_v46 = vld [vmem:[#allocation2 + $0xa0] sm:$0xf] }
  0xc7   : > { %2523 = vrot.lane.b32.xlu0 %v2485_v24, %s4050_s8  ;;  %v2772_v62 = vsel %vm2770_vm15, %v2739_v63, %v4837_v14  ;;  %v1361_v29 = vpop.permute.xlu1 %1360  ;;  %v1803_v51 = vshll.u32 %v4982_v34, 16  ;;  %v1796_v4 = vshrl.u32 %v4966_v30, 16  ;;  %v1800_v40 = vrot.slane %v1798_v55, 1 }
  0xc8   : > { %3836 = vmatprep.mubr.msk.bf16.mxu0 %vm2823_vm5, %v2772_v62  ;;  %1374 = vrot.lane.b32.xlu1 %v1293_v52, %s4046_s29  ;;  %v1305_v47 = vsel %vm1161_vm2, %v1300_v44, %v1304_v41  ;;  %v1467_v48 = vsel %vm1434_vm3, %v1465_v26, %v1466_v54  ;;  %v1810_v33 = vshll.u32 %v4993_v6, 16  ;;  %v5013_v7 = vpack.c.bf16 %v408_v45, %v407_v17  ;;  %v5038_v44 = vld [vmem:[#allocation2 + $0x98] ss:$0 sps:$4 sm:$0x11]   ;;  %v5050_v45 = vld [vmem:[#allocation2 + $0x90] sm:$0xe] }
  0xc9   : > { %3837 = vmatmul.mubr.msk.bf16.vlgmr.msra.gmra.mrb[0].mxu0 %vm2823_vm5, %v2774_v0  ;;  %v4997_v14 = vpop.permute.xlu0 %1871  ;;  %v339_v22 = vmul.f32 %v4544_v27, %v3795_v43  ;;  %v5019_v56 = vadd.f32 %v4570_v18, %v338_v11  ;;  %v1470_v24 = vsel %vm1434_vm3, %v1468_v32, %v1469_v49  ;;  %v3592_v37 = vcombine.low %v963_v28, %v4977_v1  ;;  %v991_v27 = vld [vmem:[#allocation2 + $0x9c] sm:$0xf]  ;;  %v5058_v32 = vld [vmem:[#allocation2 + $0x94] sm:$0xf] }
  0xca   : > { %v1805_v19 = vrot.slane %v1803_v51, 1  ;;  %v1977_v10 = vrot.slane %v3591_v57, 1  ;;  %v1801_v21 = vor.u32 %v1800_v40, %v1796_v4  ;;  %v1978_v42 = vrot.slane %v4982_v34, 1 }
  0xcb   : > { %2525 = vrot.lane.b32.xlu0 %v2488_v2, %s4050_s8  ;;  %v5015_v25 = vpop.permute.xlu1 %1873  ;;  %v2545_v2 = vsel %vm2539_vm8, %v4273_v15, %v1359_v58  ;;  %v5031_v63 = vcombine.low %v989_v12, %v5011_v20  ;;  %v1808_v1 = vshrl.u32 %v4993_v6, 16  ;;  %v1812_v52 = vrot.slane %v1810_v33, 1 }
  0xcc   : > { %1376 = vrot.lane.b32.xlu1 %v1305_v47, %s4046_s29  ;;  %v1815_v41 = vshll.u32 %v5002_v38, 16  ;;  %v535_v15 = vshrl.u32 %v5013_v7, 16  ;;  %v2547_v58 = vsel %vm2539_vm8, %v4286_v35, %v1361_v29  ;;  %v5041_v34 = vadd.f32 %v4570_v18, %v339_v22 }
  0xcd   : > { %v2000_v50 = vpop.permute.xlu0 %1999  ;;  %v409_v26 = vmax.f32 %v5019_v56, 0.0  ;;  %v2578_v39 = vsel %vm2572_vm9, %v2545_v2, %v4894_v53  ;;  %v1980_v55 = vrot.slane %v3592_v37, 1  ;;  %v1981_v0 = vrot.slane %v5002_v38, 1  ;;  %v864_v53 = vld [vmem:[#allocation2 + $0x90] sm:$0xf] }
  0xce   : > { %v5048_v17 = vcombine.low %v991_v27, %v5028_v46  ;;  %v1806_v35 = vsel %vm1161_vm2, %v1801_v21, %v1805_v19  ;;  %v1979_v18 = vsel %vm1434_vm3, %v1977_v10, %v1978_v42  ;;  %v2310_v29 = vshll.u32 %v5031_v63, 16  ;;  %v5063_v38 = vld [vmem:[#allocation2 + $0xa4] ss:$0 sps:$4 sm:$0x11]   ;;  %v866_v10 = vld [vmem:[#allocation2 + $0x9c] sm:$0xf] }
  0xcf   : > { %1503 = vrot.lane.b32.xlu0 %v1467_v48, %s4045_s28  ;;  %v2002_v54 = vpop.permute.xlu1 %2001  ;;  %v538_v49 = vshll.u32 %v5013_v7, 16  ;;  %v2580_v43 = vsel %vm2572_vm9, %v2547_v58, %v4892_v23  ;;  %v1813_v11 = vor.u32 %v1812_v52, %v1808_v1  ;;  %v1817_v57 = vrot.slane %v1815_v41, 1  ;;  %v5090_v27 = vld [vmem:[#allocation2 + $0xa0] sm:$0xf] }
  0xd0   : > { %1505 = vrot.lane.b32.xlu1 %v1470_v24, %s4045_s28  ;;  %v537_v51 = vrot.slane %v535_v15, 7  ;;  %v3639_v40 = vcombine.low %v5050_v45, %v5011_v20  ;;  %v2315_v12 = vshll.u32 %v5038_v44, 16  ;;  %v410_v47 = vmax.f32 %v5041_v34, 0.0  ;;  %v5097_v58 = vld [vmem:[#allocation2 + $0x98] ss:$0 sps:$4 sm:$0x11]  }
  0xd1   : > { %v2112_v62 = vpop.permute.xlu0 %2111  ;;  %v1982_v48 = vsel %vm1434_vm3, %v1980_v55, %v1981_v0  ;;  %v2322_v33 = vshll.u32 %v5048_v17, 16  ;;  %v5076_v7 = vcombine.low %v864_v53, %v5058_v32  ;;  %v2308_v20 = vshrl.u32 %v5031_v63, 16  ;;  %v1028_v45 = vld [vmem:[#allocation2 + $0x9c] sm:$0xe] }
  0xd2   : > { %v1818_v37 = vsel %vm1161_vm2, %v1813_v11, %v1817_v57  ;;  %v2327_v19 = vshll.u32 %v5063_v38, 16  ;;  %v540_v2 = vor.u32 %v538_v49, %v537_v51  ;;  %v2320_v42 = vshrl.u32 %v5048_v17, 16  ;;  %v900_v57 = vld [vmem:[#allocation2 + $0x90] sm:$0xe] }
  0xd3   : > { %1615 = vrot.lane.b32.xlu0 %v4966_v30, %s4047_s30  ;;  %v2611_v30 = vsel %vm2605_vm10, %v2578_v39, %v4789_v8  ;;  %v2114_v28 = vpop.permute.xlu1 %2113  ;;  %v2613_v8 = vsel %vm2605_vm10, %v2580_v43, %v4808_v13  ;;  %v613_v1 = vsel %vm4147_vm6, %v537_v51, 0  ;;  %v2324_v15 = vrot.slane %v2322_v33, 1 }
  0xd4   : > { %v2644_v23 = vsel %vm2638_vm11, %v2611_v30, %v4997_v14  ;;  %1617 = vrot.lane.b32.xlu1 %v4993_v6, %s4047_s30  ;;  %v2312_v14 = vrot.slane %v2310_v29, 1  ;;  %v2317_v6 = vrot.slane %v2315_v12, 1  ;;  %v2646_v52 = vsel %vm2638_vm11, %v2613_v8, %v5015_v25 }
  0xd5   : > { %v2384_v4 = vpop.permute.xlu0 %2383  ;;  %v2677_v22 = vsel %vm2671_vm12, %v2644_v23, %v2000_v50  ;;  %v2679_v34 = vsel %vm2671_vm12, %v2646_v52, %v2002_v54  ;;  %v597_v55 = vsel %vm4147_vm6, 0, %v540_v2  ;;  %v3497_v0 = vcombine.low %v613_v1, %v613_v1  ;;  %v5119_v23 = vld [vmem:[#allocation2 + $0xa4] ss:$0 sps:$4 sm:$0x11]  }
  0xd6   : > { %v2710_v24 = vsel %vm2704_vm13, %v2677_v22, %v2112_v62  ;;  %v1309_v62 = vshll.u32 %v5076_v7, 16  ;;  %v2313_v39 = vor.u32 %v2312_v14, %v2308_v20  ;;  %v2712_v25 = vsel %vm2704_vm13, %v2679_v34, %v2114_v28  ;;  %v928_v14 = vld [vmem:[#allocation2 + $0x9c] sm:$0xf] }
  0xd7   : > { %1887 = vrot.lane.b32.xlu0 %v1806_v35, %s4051_s13  ;;  %v2386_v21 = vpop.permute.xlu1 %2385  ;;  %v2743_v13 = vsel %vm2737_vm14, %v2710_v24, %v2384_v4  ;;  %v5108_v35 = vcombine.low %v866_v10, %v5090_v27  ;;  %v3495_v29 = vcombine.low %v597_v55, %v597_v55  ;;  %v3496_v53 = vcombine.high %v597_v55, %v597_v55  ;;  %v930_v10 = vld [vmem:[#allocation2 + $0xa8] sm:$0xf] }
  0xd8   : > { %1889 = vrot.lane.b32.xlu1 %v1818_v37, %s4051_s13  ;;  %v2745_v54 = vsel %vm2737_vm14, %v2712_v25, %v2386_v21  ;;  %v2329_v43 = vrot.slane %v2327_v19, 1  ;;  %v1307_v11 = vshrl.u32 %v5076_v7, 16  ;;  %836 = vst.msk [vmem:[#allocation2 + $0xbc] sm:$0x1] %vm430_vm1, %v3497_v0  ;;  %v426_v51 = vpack.c.bf16 %v410_v47, %v409_v26  ;;  %v901_v19 = vld [vmem:[#allocation2 + $0x9c] sm:$0xe] }
  0xd9   : > { %v2512_v50 = vpop.permute.xlu0 %2511  ;;  %v2325_v28 = vor.u32 %v2324_v15, %v2320_v42  ;;  %v1311_v4 = vrot.slane %v1309_v62, 1  ;;  %v1314_v12 = vshll.u32 %v5097_v58, 16  ;;  %834 = vst.msk [vmem:[#allocation2 + $0xb4] sm:$0xf] %vm427_vm0, %v3495_v29  ;;  %835 = vst.msk [vmem:[#allocation2 + $0xb8] sm:$0xf] %vm427_vm0, %v3496_v53  ;;  %v3640_v33 = vcombine.low %v1028_v45, %v5028_v46 }
  0xda   : > { %v2776_v41 = vsel %vm2770_vm15, %v2743_v13, %v2512_v50  ;;  %v2489_v56 = vrot.slane %v3639_v40, 1  ;;  %v2490_v26 = vrot.slane %v5038_v44, 1  ;;  %v2318_v47 = vsel %vm1161_vm2, %v2313_v39, %v2317_v6  ;;  %v5136_v46 = vld [vmem:[#allocation2 + $0xa0] sm:$0xf]  ;;  %v5146_v50 = vld [vmem:[#allocation2 + $0xac] sm:$0xf] }
  0xdb   : > { %2015 = vrot.lane.b32.xlu0 %v1979_v18, %s4049_s7  ;;  %3840 = vmatprep.mubr.msk.bf16.mxu0 %vm2823_vm5, %v2776_v41  ;;  %v5111_v49 = vpop.permute.xlu1 %1362  ;;  %v1321_v8 = vshll.u32 %v5108_v35, 16  ;;  %v542_v24 = vshrl.u32 %v426_v51, 16  ;;  %v1312_v40 = vor.u32 %v1311_v4, %v1307_v11  ;;  %v1316_v44 = vrot.slane %v1314_v12, 1  ;;  %v5163_v0 = vld [vmem:[#allocation2 + $0xa4] ss:$0 sps:$4 sm:$0x11]  }
  0xdc   : > { %2017 = vrot.lane.b32.xlu1 %v1982_v48, %s4049_s7  ;;  %v3545_v48 = vcombine.low %v900_v57, %v5058_v32  ;;  %v1326_v37 = vshll.u32 %v5119_v23, 16  ;;  %v2491_v2 = vsel %vm1434_vm3, %v2489_v56, %v2490_v26  ;;  %v1319_v32 = vshrl.u32 %v5108_v35, 16 }
  0xdd   : > { %v2514_v18 = vpop.permute.xlu0 %2513  ;;  %v2492_v21 = vrot.slane %v3640_v33, 1  ;;  %v2493_v13 = vrot.slane %v5063_v38, 1  ;;  %v1323_v42 = vrot.slane %v1321_v8, 1  ;;  %v5149_v6 = vcombine.low %v928_v14, %v5136_v46  ;;  %v5179_v33 = vld [vmem:[#allocation2 + $0xac] sm:$0xf] }
  0xde   : > { %v2778_v30 = vsel %vm2770_vm15, %v2745_v54, %v2514_v18  ;;  %v544_v1 = vrot.slane %v542_v24, 7  ;;  %v545_v52 = vshll.u32 %v426_v51, 16  ;;  %v1317_v15 = vsel %vm1161_vm2, %v1312_v40, %v1316_v44  ;;  %v964_v8 = vld [vmem:[#allocation2 + $0x9c] sm:$0xe]  ;;  %v965_v40 = vld [vmem:[#allocation2 + $0xa8] sm:$0xe] }
  0xdf   : > { %2127 = vrot.lane.b32.xlu0 %v5031_v63, %s4048_s6  ;;  %3841 = vmatmul.mubr.msk.bf16.gmra.mrb[4].mxu0 %vm2823_vm5, %v2778_v30  ;;  %v5131_v22 = vpop.permute.xlu1 %1364  ;;  %v2330_v63 = vsel %vm1161_vm2, %v2325_v28, %v2329_v43  ;;  %v5157_v62 = vcombine.low %v930_v10, %v5146_v50  ;;  %v1328_v38 = vrot.slane %v1326_v37, 1  ;;  %v3546_v34 = vcombine.low %v901_v19, %v5090_v27  ;;  %v5169_v43 = vld [vmem:[#allocation2 + $0xb0] ss:$0 sps:$4 sm:$0x11]   ;;  %v993_v30 = vld [vmem:[#allocation2 + $0xa8] sm:$0xf] }
  0xe0   : > { %2129 = vrot.lane.b32.xlu1 %v5048_v17, %s4048_s6  ;;  %v1471_v39 = vrot.slane %v3545_v48, 1  ;;  %v1472_v55 = vrot.slane %v5097_v58, 1  ;;  %v1324_v25 = vor.u32 %v1323_v42, %v1319_v32  ;;  %v2494_v45 = vsel %vm1434_vm3, %v2492_v21, %v2493_v13 }
  0xe1   : > { %v5133_v20 = vpop.permute.xlu0 %1491  ;;  %v1822_v29 = vshll.u32 %v5149_v6, 16  ;;  %v547_v53 = vor.u32 %v545_v52, %v544_v1  ;;  %v1834_v11 = vshll.u32 %v5157_v62, 16  ;;  %v1474_v27 = vrot.slane %v3546_v34, 1  ;;  %v5199_v52 = vld [vmem:[#allocation2 + $0xb8] sm:$0xf] }
  0xe2   : > { %v1475_v58 = vrot.slane %v5119_v23, 1  ;;  %v1473_v57 = vsel %vm1434_vm3, %v1471_v39, %v1472_v55  ;;  %v1827_v51 = vshll.u32 %v5163_v0, 16  ;;  %v1329_v28 = vsel %vm1161_vm2, %v1324_v25, %v1328_v38  ;;  %v5202_v34 = vld [vmem:[#allocation2 + $0xb0] ss:$0 sps:$4 sm:$0x11]  }
  0xe3   : > { %2399 = vrot.lane.b32.xlu0 %v2318_v47, %s4052_s14  ;;  %v5151_v41 = vpop.permute.xlu1 %1493  ;;  %v1820_v4 = vshrl.u32 %v5149_v6, 16  ;;  %v1824_v12 = vrot.slane %v1822_v29, 1  ;;  %v598_v56 = vsel %vm4147_vm6, 0, %v547_v53  ;;  %v1832_v14 = vshrl.u32 %v5157_v62, 16  ;;  %v868_v53 = vld [vmem:[#allocation2 + $0xa8] sm:$0xf] }
  0xe4   : > { %2401 = vrot.lane.b32.xlu1 %v2330_v63, %s4052_s14  ;;  %v3498_v23 = vcombine.low %v598_v56, %v598_v56  ;;  %v3499_v48 = vcombine.high %v598_v56, %v598_v56  ;;  %v1836_v24 = vrot.slane %v1834_v11, 1  ;;  %v1839_v63 = vshll.u32 %v5169_v43, 16 }
  0xe5   : > { %v5153_v17 = vpop.permute.xlu0 %1603  ;;  %v614_v44 = vsel %vm4147_vm6, %v544_v1, 0  ;;  %v5192_v37 = vcombine.low %v993_v30, %v5179_v33  ;;  %v1476_v10 = vsel %vm1434_vm3, %v1474_v27, %v1475_v58  ;;  %v1829_v32 = vrot.slane %v1827_v51, 1  ;;  %v995_v1 = vld [vmem:[#allocation2 + $0xb4] sm:$0xf] }
  0xe6   : > { %837 = vst.msk [vmem:[#allocation2 + $0xc0] sm:$0xf] %vm427_vm0, %v3498_v23  ;;  %838 = vst.msk [vmem:[#allocation2 + $0xc4] sm:$0xf] %vm427_vm0, %v3499_v48  ;;  %v3500_v19 = vcombine.low %v614_v44, %v614_v44  ;;  %v3593_v21 = vcombine.low %v964_v8, %v5136_v46  ;;  %v3594_v42 = vcombine.low %v965_v40, %v5146_v50  ;;  %v1841_v38 = vrot.slane %v1839_v63, 1 }
  0xe7   : > { %2527 = vrot.lane.b32.xlu0 %v2491_v2, %s4050_s8  ;;  %v5167_v54 = vpop.permute.xlu1 %1605  ;;  %v1825_v2 = vor.u32 %v1824_v12, %v1820_v4  ;;  %v2549_v39 = vsel %vm2539_vm8, %v4365_v9, %v5111_v49  ;;  %v1984_v46 = vrot.slane %v5163_v0, 1  ;;  %v2334_v50 = vshll.u32 %v5192_v37, 16  ;;  %v5218_v9 = vld [vmem:[#allocation2 + $0xac] sm:$0xf]  ;;  %v1029_v4 = vld [vmem:[#allocation2 + $0xa8] sm:$0xe] }
  0xe8   : > { %1378 = vrot.lane.b32.xlu1 %v1317_v15, %s4046_s29  ;;  %839 = vst.msk [vmem:[#allocation2 + $0xc8] sm:$0x1] %vm430_vm1, %v3500_v19  ;;  %v1837_v15 = vor.u32 %v1836_v24, %v1832_v14  ;;  %v2582_v55 = vsel %vm2572_vm9, %v2549_v39, %v5133_v20  ;;  %v5216_v29 = vcombine.low %v995_v1, %v5199_v52  ;;  %v1986_v0 = vrot.slane %v3594_v42, 1  ;;  %v870_v14 = vld [vmem:[#allocation2 + $0xb4] sm:$0xf] }
  0xe9   : > { %v1876_v18 = vpop.permute.xlu0 %1875  ;;  %v1830_v25 = vsel %vm1161_vm2, %v1825_v2, %v1829_v32  ;;  %v2615_v49 = vsel %vm2605_vm10, %v2582_v55, %v5153_v17  ;;  %v1987_v27 = vrot.slane %v5169_v43, 1  ;;  %v2339_v51 = vshll.u32 %v5202_v34, 16  ;;  %v5234_v17 = vld [vmem:[#allocation2 + $0xbc] ss:$0 sps:$4 sm:$0x11]  }
  0xea   : > { %v2648_v58 = vsel %vm2638_vm11, %v2615_v49, %v1876_v18  ;;  %v1842_v20 = vsel %vm1161_vm2, %v1837_v15, %v1841_v38  ;;  %v2551_v30 = vsel %vm2539_vm8, %v4423_v5, %v5131_v22  ;;  %v2336_v18 = vrot.slane %v2334_v50, 1  ;;  %v5248_v24 = vld [vmem:[#allocation2 + $0xb8] sm:$0xf]  ;;  %v5253_v44 = vld [vmem:[#allocation2 + $0xb0] ss:$0 sps:$4 sm:$0x11]  }
  0xeb   : > { %2529 = vrot.lane.b32.xlu0 %v2494_v45, %s4050_s8  ;;  %v5183_v26 = vpop.permute.xlu1 %1877  ;;  %v1983_v45 = vrot.slane %v3593_v21, 1  ;;  %v5237_v43 = vcombine.low %v868_v53, %v5218_v9  ;;  %v2584_v12 = vsel %vm2572_vm9, %v2551_v30, %v5151_v41  ;;  %v2346_v22 = vshll.u32 %v5216_v29, 16  ;;  %v1030_v15 = vld [vmem:[#allocation2 + $0xb4] sm:$0xe]  ;;  %v902_v55 = vld [vmem:[#allocation2 + $0xa8] sm:$0xe] }
  0xec   : > { %1380 = vrot.lane.b32.xlu1 %v1329_v28, %s4046_s29  ;;  %v1988_v48 = vsel %vm1434_vm3, %v1986_v0, %v1987_v27  ;;  %v2341_v40 = vrot.slane %v2339_v51, 1  ;;  %v3641_v19 = vcombine.low %v1029_v4, %v5179_v33  ;;  %v2344_v21 = vshrl.u32 %v5216_v29, 16  ;;  %v5278_v49 = vld [vmem:[#allocation2 + $0xbc] ss:$0 sps:$4 sm:$0x11]  }
  0xed   : > { %v2004_v47 = vpop.permute.xlu0 %2003  ;;  %v1985_v5 = vsel %vm1434_vm3, %v1983_v45, %v1984_v46  ;;  %v1333_v32 = vshll.u32 %v5237_v43, 16  ;;  %v5265_v33 = vcombine.low %v870_v14, %v5248_v24  ;;  %v1338_v39 = vshll.u32 %v5253_v44, 16  ;;  %v932_v27 = vld [vmem:[#allocation2 + $0xb4] sm:$0xf] }
  0xee   : > { %v2681_v28 = vsel %vm2671_vm12, %v2648_v58, %v2004_v47  ;;  %v2495_v46 = vrot.slane %v3641_v19, 1  ;;  %v2496_v50 = vrot.slane %v5202_v34, 1  ;;  %v1331_v45 = vshrl.u32 %v5237_v43, 16  ;;  %v5283_v58 = vld [vmem:[#allocation2 + $0xb8] sm:$0xf] }
  0xef   : > { %1507 = vrot.lane.b32.xlu0 %v1473_v57, %s4045_s28  ;;  %v2006_v60 = vpop.permute.xlu1 %2005  ;;  %v2332_v57 = vshrl.u32 %v5192_v37, 16  ;;  %v1335_v53 = vrot.slane %v1333_v32, 1  ;;  %v1345_v0 = vshll.u32 %v5265_v33, 16  ;;  %v3642_v34 = vcombine.low %v1030_v15, %v5199_v52  ;;  %v903_v4 = vld [vmem:[#allocation2 + $0xb4] sm:$0xe] }
  0xf0   : > { %1509 = vrot.lane.b32.xlu1 %v1476_v10, %s4045_s28  ;;  %v2351_v10 = vshll.u32 %v5234_v17, 16  ;;  %v2497_v51 = vsel %vm1434_vm3, %v2495_v46, %v2496_v50  ;;  %v3547_v30 = vcombine.low %v902_v55, %v5218_v9  ;;  %v1343_v52 = vshrl.u32 %v5265_v33, 16  ;;  %v997_v55 = vld [vmem:[#allocation2 + $0xc0] sm:$0xf] }
  0xf1   : > { %v2116_v13 = vpop.permute.xlu0 %2115  ;;  %v2337_v2 = vor.u32 %v2336_v18, %v2332_v57  ;;  %v1340_v57 = vrot.slane %v1338_v39, 1  ;;  %v2499_v18 = vrot.slane %v5234_v17, 1  ;;  %v1478_v14 = vrot.slane %v5253_v44, 1 }
  0xf2   : > { %v2714_v56 = vsel %vm2704_vm13, %v2681_v28, %v2116_v13  ;;  %v2348_v13 = vrot.slane %v2346_v22, 1  ;;  %v1336_v28 = vor.u32 %v1335_v53, %v1331_v45  ;;  %v1350_v22 = vshll.u32 %v5278_v49, 16  ;;  %v999_v53 = vld [vmem:[#allocation2 + $0xcc] sm:$0xf] }
  0xf3   : > { %1619 = vrot.lane.b32.xlu0 %v5149_v6, %s4047_s30  ;;  %v2118_v6 = vpop.permute.xlu1 %2117 }
  0xf4   : > { %1621 = vrot.lane.b32.xlu1 %v5157_v62, %s4047_s30  ;;  %v2617_v62 = vsel %vm2605_vm10, %v2584_v12, %v5167_v54  ;;  %v3563_v12 = vcombine.low %v932_v27, %v5283_v58  ;;  %v1341_v17 = vsel %vm1161_vm2, %v1336_v28, %v1340_v57  ;;  %v1352_v19 = vrot.slane %v1350_v22, 1 }
  0xf5   : > { %v2388_v11 = vpop.permute.xlu0 %2387  ;;  %v2650_v41 = vsel %vm2638_vm11, %v2617_v62, %v5183_v26  ;;  %v2498_v62 = vrot.slane %v3642_v34, 1  ;;  %v967_v34 = vld [vmem:[#allocation2 + $0xc0] sm:$0xe] }
  0xf6   : > { %v2747_v8 = vsel %vm2737_vm14, %v2714_v56, %v2388_v11  ;;  %v2683_v54 = vsel %vm2671_vm12, %v2650_v41, %v2006_v60  ;;  %v2353_v11 = vrot.slane %v2351_v10, 1  ;;  %v4027_v41 = vld [vmem:[#allocation2 + $0xbc] ss:$0 sps:$4 sm:$0x11]  }
  0xf7   : > { %1891 = vrot.lane.b32.xlu0 %v1830_v25, %s4051_s13  ;;  %v2390_v47 = vpop.permute.xlu1 %2389  ;;  %v2716_v26 = vsel %vm2704_vm13, %v2683_v54, %v2118_v6  ;;  %v2342_v25 = vsel %vm1161_vm2, %v2337_v2, %v2341_v40  ;;  %v2349_v6 = vor.u32 %v2348_v13, %v2344_v21  ;;  %v2500_v54 = vsel %vm1434_vm3, %v2498_v62, %v2499_v18  ;;  %v5339_v62 = vld [vmem:[#allocation2 + $0xc8] ss:$0 sps:$4 sm:$0x11]  }
  0xf8   : > { %1893 = vrot.lane.b32.xlu1 %v1842_v20, %s4051_s13  ;;  %v2749_v60 = vsel %vm2737_vm14, %v2716_v26, %v2390_v47  ;;  %v1481_v26 = vrot.slane %v5278_v49, 1  ;;  %v1844_v21 = vshrl.u32 %v3563_v12, 16  ;;  %v1851_v13 = vshll.u32 %v4027_v41, 16  ;;  %v5322_v49 = vld [vmem:[#allocation2 + $0xd0] sm:$0xf] }
  0xf9   : > { %v2516_v23 = vpop.permute.xlu0 %2515  ;;  %v2354_v56 = vsel %vm1161_vm2, %v2349_v6, %v2353_v11 }
  0xfa   : > { %v2780_v63 = vsel %vm2770_vm15, %v2747_v8, %v2516_v23  ;;  %v5301_v8 = vld [vmem:[#allocation2 + $0xc4] sm:$0xf]  ;;  %v3548_v23 = vcombine.low %v903_v4, %v5248_v24 }
  0xfb   : > { %2019 = vrot.lane.b32.xlu0 %v1985_v5, %s4049_s7  ;;  %3844 = vmatprep.mubr.msk.bf16.mxu0 %vm2823_vm5, %v2780_v63  ;;  %v5268_v42 = vpop.permute.xlu1 %1366  ;;  %v1347_v5 = vrot.slane %v1345_v0, 1  ;;  %v1846_v63 = vshll.u32 %v3563_v12, 16  ;;  %v1853_v0 = vrot.slane %v1851_v13, 1  ;;  %v3596_v18 = vcombine.low %v967_v34, %v5301_v8  ;;  %v1031_v13 = vld [vmem:[#allocation2 + $0xc0] sm:$0xe] }
  0xfc   : > { %2021 = vrot.lane.b32.xlu1 %v1988_v48, %s4049_s7  ;;  %v1477_v48 = vrot.slane %v3547_v30, 1  ;;  %v1480_v32 = vrot.slane %v3548_v23, 1 }
  0xfd   : > { %v2518_v1 = vpop.permute.xlu0 %2517  ;;  %v1348_v40 = vor.u32 %v1347_v5, %v1343_v52  ;;  %v1848_v44 = vrot.slane %v1846_v63, 1  ;;  %v5330_v52 = vcombine.low %v999_v53, %v5322_v49  ;;  %v2553_v5 = vsel %vm2539_vm8, %v4522_v61, %v5268_v42 }
  0xfe   : > { %v2782_v38 = vsel %vm2770_vm15, %v2749_v60, %v2518_v1  ;;  %v966_v60 = vld [vmem:[#allocation2 + $0xb4] sm:$0xe]  ;;  %v1479_v15 = vsel %vm1434_vm3, %v1477_v48, %v1478_v14  ;;  %v1482_v6 = vsel %vm1434_vm3, %v1480_v32, %v1481_v26  ;;  %v1992_v63 = vrot.slane %v3596_v18, 1 }
  0xff   : > { %2131 = vrot.lane.b32.xlu0 %v5192_v37, %s4048_s6  ;;  %3845 = vmatmul.mubr.msk.bf16.gmra.mrb[8].mxu0 %vm2823_vm5, %v2782_v38  ;;  %v5285_v20 = vpop.permute.xlu1 %1368  ;;  %v1353_v1 = vsel %vm1161_vm2, %v1348_v40, %v1352_v19  ;;  %v5317_v38 = vld [vmem:[#allocation2 + $0xc8] ss:$0 sps:$4 sm:$0x11]   ;;  %v3595_v45 = vcombine.low %v966_v60, %v5283_v58  ;;  %v1849_v11 = vor.u32 %v1848_v44, %v1844_v21  ;;  %v2370_v61 = vshll.u32 %v5330_v52, 16 }
 0x100   : > { %2133 = vrot.lane.b32.xlu1 %v5216_v29, %s4048_s6  ;;  %v934_v29 = vld [vmem:[#allocation2 + $0xc0] sm:$0xf]  ;;  %v2363_v32 = vshll.u32 %v5339_v62, 16  ;;  %v2502_v18 = vrot.slane %v5339_v62, 1 }
 0x101   : > { %v5287_v37 = vpop.permute.xlu0 %1495  ;;  %v3564_v10 = vcombine.low %v934_v29, %v5301_v8  ;;  %v1989_v4 = vrot.slane %v3595_v45, 1  ;;  %v1854_v22 = vsel %vm1161_vm2, %v1849_v11, %v1853_v0 }
 0x102   : > { %v2586_v29 = vsel %vm2572_vm9, %v2553_v5, %v5287_v37  ;;  %v2555_v37 = vsel %vm2539_vm8, %v4553_v31, %v5285_v20  ;;  %v2365_v53 = vrot.slane %v2363_v32, 1 }
 0x103   : > { %2403 = vrot.lane.b32.xlu0 %v2342_v25, %s4052_s14  ;;  %v5299_v9 = vpop.permute.xlu1 %1497  ;;  %v1858_v39 = vshll.u32 %v3564_v10, 16  ;;  %v5319_v25 = vld [vmem:[#allocation2 + $0xc4] sm:$0xf]  ;;  %v1856_v27 = vshrl.u32 %v3564_v10, 16 }
 0x104   : > { %2405 = vrot.lane.b32.xlu1 %v2354_v56, %s4052_s14  ;;  %v3611_v30 = vcombine.low %v997_v55, %v5319_v25  ;;  %v1990_v56 = vrot.slane %v4027_v41, 1 }
 0x105   : > { %v1608_v47 = vpop.permute.xlu0 %1607  ;;  %v1860_v57 = vrot.slane %v1858_v39, 1  ;;  %v2372_v39 = vrot.slane %v2370_v61, 1 }
 0x106   : > { %v2358_v8 = vshll.u32 %v3611_v30, 16  ;;  %v2619_v48 = vsel %vm2605_vm10, %v2586_v29, %v1608_v47  ;;  %v1991_v40 = vsel %vm1434_vm3, %v1989_v4, %v1990_v56  ;;  %v4030_v47 = vld [vmem:[#allocation2 + $0xd4] ss:$0 sps:$4 sm:$0x11]  }
 0x107   : > { %2531 = vrot.lane.b32.xlu0 %v2497_v51, %s4050_s8  ;;  %v5310_v2 = vpop.permute.xlu1 %1609  ;;  %v1863_v51 = vshll.u32 %v5317_v38, 16  ;;  %v1861_v23 = vor.u32 %v1860_v57, %v1856_v27 }
 0x108   : > { %1382 = vrot.lane.b32.xlu1 %v1341_v17, %s4046_s29  ;;  %v2360_v44 = vrot.slane %v2358_v8, 1 }
 0x109   : > { %v1880_v24 = vpop.permute.xlu0 %1879  ;;  %v1865_v17 = vrot.slane %v1863_v51, 1 }
 0x10a   : > { %v2652_v42 = vsel %vm2638_vm11, %v2619_v48, %v1880_v24  ;;  %v2588_v24 = vsel %vm2572_vm9, %v2555_v37, %v5299_v9 }
 0x10b   : > { %2533 = vrot.lane.b32.xlu0 %v2500_v54, %s4050_s8  ;;  %v1882_v46 = vpop.permute.xlu1 %1881  ;;  %v2356_v54 = vshrl.u32 %v3611_v30, 16  ;;  %v1866_v21 = vsel %vm1161_vm2, %v1861_v23, %v1865_v17  ;;  %v2621_v31 = vsel %vm2605_vm10, %v2588_v24, %v5310_v2  ;;  %v3643_v2 = vcombine.low %v1031_v13, %v5319_v25 }
 0x10c   : > { %1384 = vrot.lane.b32.xlu1 %v1353_v1, %s4046_s29  ;;  %v2654_v1 = vsel %vm2638_vm11, %v2621_v31, %v1882_v46  ;;  %s235_s29 = scalar_lea.vmem %s5617_s5, %s3450_s20 }
 0x10d   : > { %v2008_v50 = vpop.permute.xlu0 %2007  ;;  %v2361_v46 = vor.u32 %v2360_v44, %v2356_v54 }
 0x10e   : > { %v2685_v19 = vsel %vm2671_vm12, %v2652_v42, %v2008_v50  ;;  %v2375_v50 = vshll.u32 %v4030_v47, 16 }
 0x10f   : > { %1511 = vrot.lane.b32.xlu0 %v1479_v15, %s4045_s28  ;;  %v2010_v28 = vpop.permute.xlu1 %2009 }
 0x110   : > { %1513 = vrot.lane.b32.xlu1 %v1482_v6, %s4045_s28  ;;  %v2687_v9 = vsel %vm2671_vm12, %v2654_v1, %v2010_v28  ;;  %v1032_v6 = vld [vmem:[#allocation2 + $0xcc] sm:$0xe]  ;;  %v2377_v51 = vrot.slane %v2375_v50, 1  ;;  %v2366_v28 = vsel %vm1161_vm2, %v2361_v46, %v2365_v53 }
 0x111   : > { %v2120_v58 = vpop.permute.xlu0 %2119  ;;  %v3644_v57 = vcombine.low %v1032_v6, %v5322_v49 }
 0x112   : > { %v2718_v26 = vsel %vm2704_vm13, %v2685_v19, %v2120_v58  ;;  %v2501_v58 = vrot.slane %v3643_v2, 1 }
 0x113   : > { %1623 = vrot.lane.b32.xlu0 %v3563_v12, %s4047_s30  ;;  %v2122_v14 = vpop.permute.xlu1 %2121  ;;  %v1993_v12 = vrot.slane %v5317_v38, 1  ;;  %v2368_v38 = vshrl.u32 %v5330_v52, 16  ;;  %v2504_v5 = vrot.slane %v3644_v57, 1 }
 0x114   : > { %1625 = vrot.lane.b32.xlu1 %v3564_v10, %s4047_s30  ;;  %v2720_v55 = vsel %vm2704_vm13, %v2687_v9, %v2122_v14  ;;  %v2503_v49 = vsel %vm1434_vm3, %v2501_v58, %v2502_v18 }
 0x115   : > { %v2392_v41 = vpop.permute.xlu0 %2391  ;;  %v1994_v45 = vsel %vm1434_vm3, %v1992_v63, %v1993_v12  ;;  %v2373_v25 = vor.u32 %v2372_v39, %v2368_v38 }
 0x116   : > { %v2751_v10 = vsel %vm2737_vm14, %v2718_v26, %v2392_v41 }
 0x117   : > { %1895 = vrot.lane.b32.xlu0 %v1854_v22, %s4051_s13  ;;  %v2394_v20 = vpop.permute.xlu1 %2393  ;;  %v2505_v22 = vrot.slane %v4030_v47, 1 }
 0x118   : > { %1897 = vrot.lane.b32.xlu1 %v1866_v21, %s4051_s13  ;;  %v2753_v11 = vsel %vm2737_vm14, %v2720_v55, %v2394_v20 }
 0x119   : > { %v2520_v60 = vpop.permute.xlu0 %2519  ;;  %v2506_v62 = vsel %vm1434_vm3, %v2504_v5, %v2505_v22 }
 0x11a   : > { %v2784_v15 = vsel %vm2770_vm15, %v2751_v10, %v2520_v60 }
 0x11b   : > { %2023 = vrot.lane.b32.xlu0 %v1991_v40, %s4049_s7  ;;  %3848 = vmatprep.mubr.msk.bf16.mxu0 %vm2823_vm5, %v2784_v15  ;;  %v1371_v0 = vpop.permute.xlu1 %1370 }
 0x11c   : > { %2025 = vrot.lane.b32.xlu1 %v1994_v45, %s4049_s7  ;;  %v2557_v61 = vsel %vm2539_vm8, %v4675_v36, %v1371_v0 }
 0x11d   : > { %v2522_v34 = vpop.permute.xlu0 %2521 }
 0x11e   : > { %v2786_v27 = vsel %vm2770_vm15, %v2753_v11, %v2522_v34 }
 0x11f   : > { %2135 = vrot.lane.b32.xlu0 %v3611_v30, %s4048_s6  ;;  %3849 = vmatmul.mubr.msk.bf16.gmra.mrb[12].mxu0 %vm2823_vm5, %v2786_v27  ;;  %v1373_v4 = vpop.permute.xlu1 %1372  ;;  %v2378_v30 = vsel %vm1161_vm2, %v2373_v25, %v2377_v51 }
 0x120   : > { %2137 = vrot.lane.b32.xlu1 %v5330_v52, %s4048_s6  ;;  %v2559_v19 = vsel %vm2539_vm8, %v4707_v3, %v1373_v4 }
 0x121   : > { %v1500_v56 = vpop.permute.xlu0 %1499 }
 0x122   : > { %v2590_v42 = vsel %vm2572_vm9, %v2557_v61, %v1500_v56 }
 0x123   : > { %2407 = vrot.lane.b32.xlu0 %v2366_v28, %s4052_s14  ;;  %v1502_v29 = vpop.permute.xlu1 %1501 }
 0x124   : > { %2409 = vrot.lane.b32.xlu1 %v2378_v30, %s4052_s14  ;;  %v2592_v54 = vsel %vm2572_vm9, %v2559_v19, %v1502_v29 }
 0x125   : > { %v1612_v23 = vpop.permute.xlu0 %1611 }
 0x126   : > { %v2623_v63 = vsel %vm2605_vm10, %v2590_v42, %v1612_v23 }
 0x127   : > { %2535 = vrot.lane.b32.xlu0 %v2503_v49, %s4050_s8  ;;  %v1614_v17 = vpop.permute.xlu1 %1613 }
 0x128   : > { %2537 = vrot.lane.b32.xlu1 %v2506_v62, %s4050_s8  ;;  %v2625_v24 = vsel %vm2605_vm10, %v2592_v54, %v1614_v17 }
 0x129   : > { %v1884_v8 = vpop.permute.xlu0 %1883 }
 0x12a   : > { %v2656_v37 = vsel %vm2638_vm11, %v2623_v63, %v1884_v8 }
 0x12b   : > { %v1886_v52 = vpop.permute.xlu1 %1885 }
 0x12c   : > { %v2658_v44 = vsel %vm2638_vm11, %v2625_v24, %v1886_v52 }
 0x12d   : > { %v2012_v48 = vpop.permute.xlu0 %2011 }
 0x12e   : > { %v2689_v47 = vsel %vm2671_vm12, %v2656_v37, %v2012_v48 }
 0x12f   : > { %v2014_v14 = vpop.permute.xlu1 %2013 }
 0x130   : > { %v2691_v31 = vsel %vm2671_vm12, %v2658_v44, %v2014_v14 }
 0x131   : > { %v2124_v41 = vpop.permute.xlu0 %2123 }
 0x132   : > { %v2722_v32 = vsel %vm2704_vm13, %v2689_v47, %v2124_v41 }
 0x133   : > { %v2126_v12 = vpop.permute.xlu1 %2125 }
 0x134   : > { %v2724_v3 = vsel %vm2704_vm13, %v2691_v31, %v2126_v12 }
 0x135   : > { %v2396_v40 = vpop.permute.xlu0 %2395 }
 0x136   : > { %v2755_v26 = vsel %vm2737_vm14, %v2722_v32, %v2396_v40 }
 0x137   : > { %v2398_v36 = vpop.permute.xlu1 %2397 }
 0x138   : > { %v2757_v20 = vsel %vm2737_vm14, %v2724_v3, %v2398_v36 }
 0x139   : > { %v2524_v21 = vpop.permute.xlu0 %2523 }
 0x13a   : > { %v2788_v13 = vsel %vm2770_vm15, %v2755_v26, %v2524_v21 }
 0x13b   : > { %3852 = vmatprep.mubr.msk.bf16.mxu1 %vm2823_vm5, %v2788_v13  ;;  %v1375_v10 = vpop.permute.xlu1 %1374 }
 0x13c   : > { %v2561_v6 = vsel %vm2539_vm8, %v4859_v59, %v1375_v10 }
 0x13d   : > { %v2526_v60 = vpop.permute.xlu0 %2525 }
 0x13e   : > { %v2790_v1 = vsel %vm2770_vm15, %v2757_v20, %v2526_v60 }
 0x13f   : > { %3853 = vmatmul.mubr.msk.bf16.vlgmr.msra.gmra.mrb[0].mxu1 %vm2823_vm5, %v2790_v1  ;;  %v1377_v15 = vpop.permute.xlu1 %1376 }
 0x140   : > { %v2563_v57 = vsel %vm2539_vm8, %v4908_v16, %v1377_v15 }
 0x141   : > { %v1504_v38 = vpop.permute.xlu0 %1503 }
 0x142   : > { %v2594_v11 = vsel %vm2572_vm9, %v2561_v6, %v1504_v38 }
 0x143   : > { %v1506_v9 = vpop.permute.xlu1 %1505 }
 0x144   : > { %v2596_v28 = vsel %vm2572_vm9, %v2563_v57, %v1506_v9 }
 0x145   : > { %v1616_v39 = vpop.permute.xlu0 %1615 }
 0x146   : > { %v2627_v0 = vsel %vm2605_vm10, %v2594_v11, %v1616_v39 }
 0x147   : > { %v1618_v50 = vpop.permute.xlu1 %1617 }
 0x148   : > { %v2629_v18 = vsel %vm2605_vm10, %v2596_v28, %v1618_v50 }
 0x149   : > { %v1888_v2 = vpop.permute.xlu0 %1887 }
 0x14a   : > { %v2660_v25 = vsel %vm2638_vm11, %v2627_v0, %v1888_v2 }
 0x14b   : > { %v1890_v55 = vpop.permute.xlu1 %1889 }
 0x14c   : > { %v2662_v30 = vsel %vm2638_vm11, %v2629_v18, %v1890_v55 }
 0x14d   : > { %v2016_v45 = vpop.permute.xlu0 %2015 }
 0x14e   : > { %v2693_v51 = vsel %vm2671_vm12, %v2660_v25, %v2016_v45 }
 0x14f   : > { %v2018_v46 = vpop.permute.xlu1 %2017 }
 0x150   : > { %v2695_v22 = vsel %vm2671_vm12, %v2662_v30, %v2018_v46 }
 0x151   : > { %v2128_v53 = vpop.permute.xlu0 %2127 }
 0x152   : > { %v2726_v58 = vsel %vm2704_vm13, %v2693_v51, %v2128_v53 }
 0x153   : > { %v2130_v34 = vpop.permute.xlu1 %2129 }
 0x154   : > { %v2728_v16 = vsel %vm2704_vm13, %v2695_v22, %v2130_v34 }
 0x155   : > { %v2400_v27 = vpop.permute.xlu0 %2399 }
 0x156   : > { %v2759_v4 = vsel %vm2737_vm14, %v2726_v58, %v2400_v27 }
 0x157   : > { %v2402_v59 = vpop.permute.xlu1 %2401 }
 0x158   : > { %v2761_v49 = vsel %vm2737_vm14, %v2728_v16, %v2402_v59 }
 0x159   : > { %v2528_v56 = vpop.permute.xlu0 %2527 }
 0x15a   : > { %v2792_v5 = vsel %vm2770_vm15, %v2759_v4, %v2528_v56 }
 0x15b   : > { %3856 = vmatprep.mubr.msk.bf16.mxu1 %vm2823_vm5, %v2792_v5  ;;  %v1379_v29 = vpop.permute.xlu1 %1378 }
 0x15c   : > { %v2565_v40 = vsel %vm2539_vm8, %v5076_v7, %v1379_v29 }
 0x15d   : > { %v2530_v23 = vpop.permute.xlu0 %2529 }
 0x15e   : > { %v2794_v62 = vsel %vm2770_vm15, %v2761_v49, %v2530_v23 }
 0x15f   : > { %3857 = vmatmul.mubr.msk.bf16.gmra.mrb[4].mxu1 %vm2823_vm5, %v2794_v62  ;;  %v1381_v17 = vpop.permute.xlu1 %1380 }
 0x160   : > { %v2567_v24 = vsel %vm2539_vm8, %v5108_v35, %v1381_v17 }
 0x161   : > { %v1508_v8 = vpop.permute.xlu0 %1507 }
 0x162   : > { %v2598_v37 = vsel %vm2572_vm9, %v2565_v40, %v1508_v8 }
 0x163   : > { %v1510_v52 = vpop.permute.xlu1 %1509 }
 0x164   : > { %v2600_v26 = vsel %vm2572_vm9, %v2567_v24, %v1510_v52 }
 0x165   : > { %v1620_v48 = vpop.permute.xlu0 %1619 }
 0x166   : > { %v2631_v19 = vsel %vm2605_vm10, %v2598_v37, %v1620_v48 }
 0x167   : > { %v1622_v14 = vpop.permute.xlu1 %1621 }
 0x168   : > { %v2633_v44 = vsel %vm2605_vm10, %v2600_v26, %v1622_v14 }
 0x169   : > { %v1892_v41 = vpop.permute.xlu0 %1891 }
 0x16a   : > { %v2664_v32 = vsel %vm2638_vm11, %v2631_v19, %v1892_v41 }
 0x16b   : > { %v1894_v61 = vpop.permute.xlu1 %1893 }
 0x16c   : > { %v2666_v3 = vsel %vm2638_vm11, %v2633_v44, %v1894_v61 }
 0x16d   : > { %v2020_v42 = vpop.permute.xlu0 %2019 }
 0x16e   : > { %v2697_v36 = vsel %vm2671_vm12, %v2664_v32, %v2020_v42 }
 0x16f   : > { %v2022_v63 = vpop.permute.xlu1 %2021 }
 0x170   : > { %v2699_v10 = vsel %vm2671_vm12, %v2666_v3, %v2022_v63 }
 0x171   : > { %v2132_v12 = vpop.permute.xlu0 %2131 }
 0x172   : > { %v2730_v21 = vsel %vm2704_vm13, %v2697_v36, %v2132_v12 }
 0x173   : > { %v2134_v47 = vpop.permute.xlu1 %2133 }
 0x174   : > { %v2732_v35 = vsel %vm2704_vm13, %v2699_v10, %v2134_v47 }
 0x175   : > { %v2404_v54 = vpop.permute.xlu0 %2403 }
 0x176   : > { %v2763_v13 = vsel %vm2737_vm14, %v2730_v21, %v2404_v54 }
 0x177   : > { %v2406_v7 = vpop.permute.xlu1 %2405 }
 0x178   : > { %v2765_v60 = vsel %vm2737_vm14, %v2732_v35, %v2406_v7 }
 0x179   : > { %v2532_v31 = vpop.permute.xlu0 %2531 }
 0x17a   : > { %v2796_v20 = vsel %vm2770_vm15, %v2763_v13, %v2532_v31 }
 0x17b   : > { %3860 = vmatprep.mubr.msk.bf16.mxu1 %vm2823_vm5, %v2796_v20  ;;  %v1383_v1 = vpop.permute.xlu1 %1382 }
 0x17c   : > { %v2569_v0 = vsel %vm2539_vm8, %v5237_v43, %v1383_v1 }
 0x17d   : > { %v2534_v15 = vpop.permute.xlu0 %2533 }
 0x17e   : > { %v2798_v38 = vsel %vm2770_vm15, %v2765_v60, %v2534_v15 }
 0x17f   : > { %3861 = vmatmul.mubr.msk.bf16.gmra.mrb[8].mxu1 %vm2823_vm5, %v2798_v38  ;;  %v1385_v9 = vpop.permute.xlu1 %1384 }
 0x180   : > { %v2571_v28 = vsel %vm2539_vm8, %v5265_v33, %v1385_v9 }
 0x181   : > { %v1512_v39 = vpop.permute.xlu0 %1511 }
 0x182   : > { %v2602_v34 = vsel %vm2572_vm9, %v2569_v0, %v1512_v39 }
 0x183   : > { %v1514_v50 = vpop.permute.xlu1 %1513 }
 0x184   : > { %v2604_v18 = vsel %vm2572_vm9, %v2571_v28, %v1514_v50 }
 0x185   : > { %v1624_v2 = vpop.permute.xlu0 %1623 }
 0x186   : > { %v2635_v27 = vsel %vm2605_vm10, %v2602_v34, %v1624_v2 }
 0x187   : > { %v1626_v55 = vpop.permute.xlu1 %1625 }
 0x188   : > { %v2637_v43 = vsel %vm2605_vm10, %v2604_v18, %v1626_v55 }
 0x189   : > { %v1896_v45 = vpop.permute.xlu0 %1895 }
 0x18a   : > { %v2668_v51 = vsel %vm2638_vm11, %v2635_v27, %v1896_v45 }
 0x18b   : > { %v1898_v46 = vpop.permute.xlu1 %1897 }
 0x18c   : > { %v2670_v5 = vsel %vm2638_vm11, %v2637_v43, %v1898_v46 }
 0x18d   : > { %v2024_v53 = vpop.permute.xlu0 %2023 }
 0x18e   : > { %v2701_v58 = vsel %vm2671_vm12, %v2668_v51, %v2024_v53 }
 0x18f   : > { %v2026_v6 = vpop.permute.xlu1 %2025 }
 0x190   : > { %v2703_v16 = vsel %vm2671_vm12, %v2670_v5, %v2026_v6 }
 0x191   : > { %v2136_v11 = vpop.permute.xlu0 %2135 }
 0x192   : > { %v2734_v59 = vsel %vm2704_vm13, %v2701_v58, %v2136_v11 }
 0x193   : > { %v2138_v25 = vpop.permute.xlu1 %2137 }
 0x194   : > { %v2736_v33 = vsel %vm2704_vm13, %v2703_v16, %v2138_v25 }
 0x195   : > { %v2408_v57 = vpop.permute.xlu0 %2407 }
 0x196   : > { %v2767_v56 = vsel %vm2737_vm14, %v2734_v59, %v2408_v57 }
 0x197   : > { %v2410_v4 = vpop.permute.xlu1 %2409 }
 0x198   : > { %v2769_v29 = vsel %vm2737_vm14, %v2736_v33, %v2410_v4 }
 0x199   : > { %v2536_v30 = vpop.permute.xlu0 %2535 }
 0x19a   : > { %v2800_v22 = vsel %vm2770_vm15, %v2767_v56, %v2536_v30 }
 0x19b   : > { %3864 = vmatprep.mubr.msk.bf16.mxu1 %vm2823_vm5, %v2800_v22  ;;  %v2538_v23 = vpop.permute.xlu1 %2537 }
 0x19c   : > { %v3838_v49 = vpop.f32.mrb[0].mxu0  ;;  %v2802_v8 = vsel %vm2770_vm15, %v2769_v29, %v2538_v23 }
 0x19d   : > { %v3702_v62 = vpack.c.bf16 %v3838_v49, %v3838_v49  ;;  %v2894_v17 = vpop.f32.mrb[1].mxu0  ;;  %v3252_v41 = vmul.f32 %v3838_v49, %v3838_v49  ;;  %3865 = vmatmul.mubr.msk.bf16.gmra.mrb[12].mxu1 %vm2823_vm5, %v2802_v8  ;;  %v3184_v47 = vsel %vm2539_vm8, %v3838_v49, 0.0 }
 0x19e   : > { %v3700_v52 = vpack.c.bf16 %v2894_v17, %v2894_v17  ;;  %v3250_v48 = vmul.f32 %v2894_v17, %v2894_v17  ;;  %v3839_v14 = vpop.f32.mrb[2].mxu0  ;;  %v3181_v63 = vsel %vm2539_vm8, %v2894_v17, 0.0 }
 0x19f   : > { %3151 = vst.msk [vmem:[%s5470_s26 + $0x8] sm:$0xf] %vm427_vm0, %v3702_v62  ;;  %v3703_v61 = vpack.c.bf16 %v3839_v14, %v3839_v14  ;;  %v2897_v42 = vpop.f32.mrb[3].mxu0  ;;  %v3253_v32 = vmul.f32 %v3839_v14, %v3839_v14  ;;  %v3285_v21 = vsel %vm2539_vm8, %v3252_v41, 0.0  ;;  %v3186_v44 = vsel %vm2539_vm8, %v3839_v14, 0.0 }
 0x1a0   : > { %3149 = vst.msk [vmem:[%s5470_s26] sm:$0xf] %vm427_vm0, %v3700_v52  ;;  %v3701_v12 = vpack.c.bf16 %v2897_v42, %v2897_v42  ;;  %v3182_v40 = vsel %vm2539_vm8, %v2897_v42, 0.0  ;;  %v3251_v37 = vmul.f32 %v2897_v42, %v2897_v42  ;;  %v3282_v54 = vsel %vm2539_vm8, %v3250_v48, 0.0 }
 0x1a1   : > { %3152 = vst.msk [vmem:[%s5470_s26 + $0xc] sm:$0xf] %vm427_vm0, %v3703_v61  ;;  %v3183_v19 = vadd.f32 %v3182_v40, %v3181_v63  ;;  %v3287_v31 = vsel %vm2539_vm8, %v3253_v32, 0.0 }
 0x1a2   : > { %3150 = vst.msk [vmem:[%s5470_s26 + $0x4] sm:$0xf] %vm427_vm0, %v3701_v12  ;;  %v3283_v24 = vsel %vm2539_vm8, %v3251_v37, 0.0 }
 0x1a3   : > { %v3185_v36 = vadd.f32 %v3184_v47, %v3183_v19  ;;  %v3284_v26 = vadd.f32 %v3283_v24, %v3282_v54 }
 0x1a5   : > { %v3286_v7 = vadd.f32 %v3285_v21, %v3284_v26  ;;  %v3187_v13 = vadd.f32 %v3186_v44, %v3185_v36 }
 0x1a7   : > { %v3288_v3 = vadd.f32 %v3287_v31, %v3286_v7 }
 0x1b2   : > { %v3842_v20 = vpop.f32.mrb[4].mxu0 }
 0x1b3   : > { %v3706_v10 = vpack.c.bf16 %v3842_v20, %v3842_v20  ;;  %v2910_v35 = vpop.f32.mrb[5].mxu0  ;;  %v3256_v46 = vmul.f32 %v3842_v20, %v3842_v20  ;;  %v3192_v0 = vsel %vm2539_vm8, %v3842_v20, 0.0 }
 0x1b4   : > { %v3704_v60 = vpack.c.bf16 %v2910_v35, %v2910_v35  ;;  %v3188_v1 = vsel %vm2539_vm8, %v2910_v35, 0.0  ;;  %v3254_v15 = vmul.f32 %v2910_v35, %v2910_v35  ;;  %v3843_v38 = vpop.f32.mrb[6].mxu0 }
 0x1b5   : > { %3155 = vst.msk [vmem:[%s5470_s26 + $0x18] sm:$0xf] %vm427_vm0, %v3706_v10  ;;  %v3189_v9 = vadd.f32 %v3188_v1, %v3187_v13  ;;  %v3707_v39 = vpack.c.bf16 %v3843_v38, %v3843_v38  ;;  %v2913_v50 = vpop.f32.mrb[7].mxu0  ;;  %v3257_v34 = vmul.f32 %v3843_v38, %v3843_v38  ;;  %v3194_v57 = vsel %vm2539_vm8, %v3843_v38, 0.0 }
 0x1b6   : > { %3153 = vst.msk [vmem:[%s5470_s26 + $0x10] sm:$0xf] %vm427_vm0, %v3704_v60  ;;  %v3289_v2 = vsel %vm2539_vm8, %v3254_v15, 0.0  ;;  %v3705_v55 = vpack.c.bf16 %v2913_v50, %v2913_v50  ;;  %v3190_v45 = vsel %vm2539_vm8, %v2913_v50, 0.0  ;;  %v3255_v11 = vmul.f32 %v2913_v50, %v2913_v50 }
 0x1b7   : > { %v3290_v53 = vadd.f32 %v3289_v2, %v3288_v3  ;;  %3156 = vst.msk [vmem:[%s5470_s26 + $0x1c] sm:$0xf] %vm427_vm0, %v3707_v39  ;;  %v3191_v6 = vadd.f32 %v3190_v45, %v3189_v9  ;;  %v3293_v28 = vsel %vm2539_vm8, %v3256_v46, 0.0  ;;  %v3295_v59 = vsel %vm2539_vm8, %v3257_v34, 0.0 }
 0x1b8   : > { %3154 = vst.msk [vmem:[%s5470_s26 + $0x14] sm:$0xf] %vm427_vm0, %v3705_v55  ;;  %v3291_v25 = vsel %vm2539_vm8, %v3255_v11, 0.0 }
 0x1b9   : > { %v3193_v27 = vadd.f32 %v3192_v0, %v3191_v6  ;;  %v3292_v51 = vadd.f32 %v3291_v25, %v3290_v53 }
 0x1bb   : > { %v3195_v58 = vadd.f32 %v3194_v57, %v3193_v27  ;;  %v3294_v18 = vadd.f32 %v3293_v28, %v3292_v51 }
 0x1bd   : > { %v3296_v43 = vadd.f32 %v3295_v59, %v3294_v18 }
 0x1d2   : > { %v3846_v4 = vpop.f32.mrb[8].mxu0 }
 0x1d3   : > { %v3710_v56 = vpack.c.bf16 %v3846_v4, %v3846_v4  ;;  %v2926_v30 = vpop.f32.mrb[9].mxu0  ;;  %v3260_v52 = vmul.f32 %v3846_v4, %v3846_v4  ;;  %v3200_v61 = vsel %vm2539_vm8, %v3846_v4, 0.0 }
 0x1d4   : > { %v3708_v5 = vpack.c.bf16 %v2926_v30, %v2926_v30  ;;  %v3196_v22 = vsel %vm2539_vm8, %v2926_v30, 0.0  ;;  %v3258_v16 = vmul.f32 %v2926_v30, %v2926_v30  ;;  %v3847_v33 = vpop.f32.mrb[10].mxu0 }
 0x1d5   : > { %3159 = vst.msk [vmem:[%s5470_s26 + $0x28] sm:$0xf] %vm427_vm0, %v3710_v56  ;;  %v3197_v49 = vadd.f32 %v3196_v22, %v3195_v58  ;;  %v3711_v29 = vpack.c.bf16 %v3847_v33, %v3847_v33  ;;  %v2929_v23 = vpop.f32.mrb[11].mxu0  ;;  %v3261_v42 = vmul.f32 %v3847_v33, %v3847_v33  ;;  %v3202_v40 = vsel %vm2539_vm8, %v3847_v33, 0.0 }
 0x1d6   : > { %3157 = vst.msk [vmem:[%s5470_s26 + $0x20] sm:$0xf] %vm427_vm0, %v3708_v5  ;;  %v3297_v62 = vsel %vm2539_vm8, %v3258_v16, 0.0  ;;  %v3709_v17 = vpack.c.bf16 %v2929_v23, %v2929_v23  ;;  %v3198_v8 = vsel %vm2539_vm8, %v2929_v23, 0.0  ;;  %v3259_v41 = vmul.f32 %v2929_v23, %v2929_v23 }
 0x1d7   : > { %v3298_v48 = vadd.f32 %v3297_v62, %v3296_v43  ;;  %3160 = vst.msk [vmem:[%s5470_s26 + $0x2c] sm:$0xf] %vm427_vm0, %v3711_v29  ;;  %v3199_v14 = vadd.f32 %v3198_v8, %v3197_v49  ;;  %v3301_v19 = vsel %vm2539_vm8, %v3260_v52, 0.0  ;;  %v3303_v32 = vsel %vm2539_vm8, %v3261_v42, 0.0 }
 0x1d8   : > { %3158 = vst.msk [vmem:[%s5470_s26 + $0x24] sm:$0xf] %vm427_vm0, %v3709_v17  ;;  %v3299_v12 = vsel %vm2539_vm8, %v3259_v41, 0.0 }
 0x1d9   : > { %v3201_v63 = vadd.f32 %v3200_v61, %v3199_v14  ;;  %v3300_v37 = vadd.f32 %v3299_v12, %v3298_v48 }
 0x1db   : > { %v3203_v47 = vadd.f32 %v3202_v40, %v3201_v63  ;;  %v3302_v54 = vadd.f32 %v3301_v19, %v3300_v37 }
 0x1dd   : > { %v3304_v24 = vadd.f32 %v3303_v32, %v3302_v54 }
 0x1f2   : > { %v3850_v36 = vpop.f32.mrb[12].mxu0 }
 0x1f3   : > { %v3714_v26 = vpack.c.bf16 %v3850_v36, %v3850_v36  ;;  %v2942_v21 = vpop.f32.mrb[13].mxu0  ;;  %v3264_v15 = vmul.f32 %v3850_v36, %v3850_v36  ;;  %v3208_v50 = vsel %vm2539_vm8, %v3850_v36, 0.0 }
 0x1f4   : > { %v3712_v44 = vpack.c.bf16 %v2942_v21, %v2942_v21  ;;  %v3204_v7 = vsel %vm2539_vm8, %v2942_v21, 0.0  ;;  %v3262_v13 = vmul.f32 %v2942_v21, %v2942_v21  ;;  %v3851_v31 = vpop.f32.mrb[14].mxu0 }
 0x1f5   : > { %3163 = vst.msk [vmem:[%s5470_s26 + $0x38] sm:$0xf] %vm427_vm0, %v3714_v26  ;;  %v3205_v3 = vadd.f32 %v3204_v7, %v3203_v47  ;;  %v3715_v20 = vpack.c.bf16 %v3851_v31, %v3851_v31  ;;  %v2945_v10 = vpop.f32.mrb[15].mxu0  ;;  %v3265_v2 = vmul.f32 %v3851_v31, %v3851_v31  ;;  %v3210_v46 = vsel %vm2539_vm8, %v3851_v31, 0.0 }
 0x1f6   : > { %3161 = vst.msk [vmem:[%s5470_s26 + $0x30] sm:$0xf] %vm427_vm0, %v3712_v44  ;;  %v3305_v35 = vsel %vm2539_vm8, %v3262_v13, 0.0  ;;  %v3713_v60 = vpack.c.bf16 %v2945_v10, %v2945_v10  ;;  %v3206_v1 = vsel %vm2539_vm8, %v2945_v10, 0.0  ;;  %v3263_v39 = vmul.f32 %v2945_v10, %v2945_v10 }
 0x1f7   : > { %v3306_v38 = vadd.f32 %v3305_v35, %v3304_v24  ;;  %3164 = vst.msk [vmem:[%s5470_s26 + $0x3c] sm:$0xf] %vm427_vm0, %v3715_v20  ;;  %v3207_v9 = vadd.f32 %v3206_v1, %v3205_v3  ;;  %v3309_v6 = vsel %vm2539_vm8, %v3264_v15, 0.0  ;;  %v3311_v34 = vsel %vm2539_vm8, %v3265_v2, 0.0 }
 0x1f8   : > { %3162 = vst.msk [vmem:[%s5470_s26 + $0x34] sm:$0xf] %vm427_vm0, %v3713_v60  ;;  %v3307_v45 = vsel %vm2539_vm8, %v3263_v39, 0.0 }
 0x1f9   : > { %v3209_v55 = vadd.f32 %v3208_v50, %v3207_v9  ;;  %v3308_v53 = vadd.f32 %v3307_v45, %v3306_v38 }
 0x1fb   : > { %v3211_v11 = vadd.f32 %v3210_v46, %v3209_v55  ;;  %v3310_v0 = vadd.f32 %v3309_v6, %v3308_v53 }
 0x1fd   : > { %v3312_v27 = vadd.f32 %v3311_v34, %v3310_v0 }
 0x212   : > { %v3854_v25 = vpop.f32.mrb[0].mxu1 }
 0x213   : > { %v3718_v57 = vpack.c.bf16 %v3854_v25, %v3854_v25  ;;  %v2958_v51 = vpop.f32.mrb[1].mxu1  ;;  %v3268_v16 = vmul.f32 %v3854_v25, %v3854_v25  ;;  %v3216_v23 = vsel %vm2539_vm8, %v3854_v25, 0.0 }
 0x214   : > { %v3716_v28 = vpack.c.bf16 %v2958_v51, %v2958_v51  ;;  %v3212_v58 = vsel %vm2539_vm8, %v2958_v51, 0.0  ;;  %v3266_v18 = vmul.f32 %v2958_v51, %v2958_v51  ;;  %v3855_v59 = vpop.f32.mrb[2].mxu1 }
 0x215   : > { %3167 = vst.msk [vmem:[%s5470_s26 + $0x48] sm:$0xf] %vm427_vm0, %v3718_v57  ;;  %v3213_v43 = vadd.f32 %v3212_v58, %v3211_v11  ;;  %v3719_v4 = vpack.c.bf16 %v3855_v59, %v3855_v59  ;;  %v2961_v56 = vpop.f32.mrb[3].mxu1  ;;  %v3269_v62 = vmul.f32 %v3855_v59, %v3855_v59  ;;  %v3218_v52 = vsel %vm2539_vm8, %v3855_v59, 0.0 }
 0x216   : > { %3165 = vst.msk [vmem:[%s5470_s26 + $0x40] sm:$0xf] %vm427_vm0, %v3716_v28  ;;  %v3313_v30 = vsel %vm2539_vm8, %v3266_v18, 0.0  ;;  %v3717_v5 = vpack.c.bf16 %v2961_v56, %v2961_v56  ;;  %v3214_v22 = vsel %vm2539_vm8, %v2961_v56, 0.0  ;;  %v3267_v29 = vmul.f32 %v2961_v56, %v2961_v56 }
 0x217   : > { %v3314_v33 = vadd.f32 %v3313_v30, %v3312_v27  ;;  %3168 = vst.msk [vmem:[%s5470_s26 + $0x4c] sm:$0xf] %vm427_vm0, %v3719_v4  ;;  %v3215_v49 = vadd.f32 %v3214_v22, %v3213_v43  ;;  %v3317_v14 = vsel %vm2539_vm8, %v3268_v16, 0.0  ;;  %v3319_v42 = vsel %vm2539_vm8, %v3269_v62, 0.0 }
 0x218   : > { %3166 = vst.msk [vmem:[%s5470_s26 + $0x44] sm:$0xf] %vm427_vm0, %v3717_v5  ;;  %v3315_v8 = vsel %vm2539_vm8, %v3267_v29, 0.0 }
 0x219   : > { %v3217_v17 = vadd.f32 %v3216_v23, %v3215_v49  ;;  %v3316_v48 = vadd.f32 %v3315_v8, %v3314_v33 }
 0x21b   : > { %v3219_v41 = vadd.f32 %v3218_v52, %v3217_v17  ;;  %v3318_v61 = vadd.f32 %v3317_v14, %v3316_v48 }
 0x21d   : > { %v3320_v63 = vadd.f32 %v3319_v42, %v3318_v61 }
 0x232   : > { %v3858_v12 = vpop.f32.mrb[4].mxu1 }
 0x233   : > { %v3722_v40 = vpack.c.bf16 %v3858_v12, %v3858_v12  ;;  %v2974_v37 = vpop.f32.mrb[5].mxu1  ;;  %v3272_v13 = vmul.f32 %v3858_v12, %v3858_v12  ;;  %v3224_v10 = vsel %vm2539_vm8, %v3858_v12, 0.0 }
 0x234   : > { %v3720_v19 = vpack.c.bf16 %v2974_v37, %v2974_v37  ;;  %v3220_v47 = vsel %vm2539_vm8, %v2974_v37, 0.0  ;;  %v3270_v54 = vmul.f32 %v2974_v37, %v2974_v37  ;;  %v3859_v32 = vpop.f32.mrb[6].mxu1 }
 0x235   : > { %3171 = vst.msk [vmem:[%s5470_s26 + $0x58] sm:$0xf] %vm427_vm0, %v3722_v40  ;;  %v3221_v24 = vadd.f32 %v3220_v47, %v3219_v41  ;;  %v3723_v36 = vpack.c.bf16 %v3859_v32, %v3859_v32  ;;  %v2977_v26 = vpop.f32.mrb[7].mxu1  ;;  %v3273_v35 = vmul.f32 %v3859_v32, %v3859_v32  ;;  %v3226_v15 = vsel %vm2539_vm8, %v3859_v32, 0.0 }
 0x236   : > { %3169 = vst.msk [vmem:[%s5470_s26 + $0x50] sm:$0xf] %vm427_vm0, %v3720_v19  ;;  %v3321_v21 = vsel %vm2539_vm8, %v3270_v54, 0.0  ;;  %v3721_v44 = vpack.c.bf16 %v2977_v26, %v2977_v26  ;;  %v3222_v7 = vsel %vm2539_vm8, %v2977_v26, 0.0  ;;  %v3271_v20 = vmul.f32 %v2977_v26, %v2977_v26 }
 0x237   : > { %v3322_v31 = vadd.f32 %v3321_v21, %v3320_v63  ;;  %3172 = vst.msk [vmem:[%s5470_s26 + $0x5c] sm:$0xf] %vm427_vm0, %v3723_v36  ;;  %v3223_v3 = vadd.f32 %v3222_v7, %v3221_v24  ;;  %v3325_v9 = vsel %vm2539_vm8, %v3272_v13, 0.0  ;;  %v3327_v2 = vsel %vm2539_vm8, %v3273_v35, 0.0 }
 0x238   : > { %3170 = vst.msk [vmem:[%s5470_s26 + $0x54] sm:$0xf] %vm427_vm0, %v3721_v44  ;;  %v3323_v1 = vsel %vm2539_vm8, %v3271_v20, 0.0 }
 0x239   : > { %v3225_v60 = vadd.f32 %v3224_v10, %v3223_v3  ;;  %v3324_v38 = vadd.f32 %v3323_v1, %v3322_v31 }
 0x23b   : > { %v3227_v39 = vadd.f32 %v3226_v15, %v3225_v60  ;;  %v3326_v50 = vadd.f32 %v3325_v9, %v3324_v38 }
 0x23d   : > { %v3328_v55 = vadd.f32 %v3327_v2, %v3326_v50 }
 0x252   : > { %v3862_v45 = vpop.f32.mrb[8].mxu1 }
 0x253   : > { %v3726_v46 = vpack.c.bf16 %v3862_v45, %v3862_v45  ;;  %v2990_v53 = vpop.f32.mrb[9].mxu1  ;;  %v3276_v18 = vmul.f32 %v3862_v45, %v3862_v45  ;;  %v3232_v56 = vsel %vm2539_vm8, %v3862_v45, 0.0 }
 0x254   : > { %v3724_v6 = vpack.c.bf16 %v2990_v53, %v2990_v53  ;;  %v3228_v11 = vsel %vm2539_vm8, %v2990_v53, 0.0  ;;  %v3274_v0 = vmul.f32 %v2990_v53, %v2990_v53  ;;  %v3863_v34 = vpop.f32.mrb[10].mxu1 }
 0x255   : > { %3175 = vst.msk [vmem:[%s5470_s26 + $0x68] sm:$0xf] %vm427_vm0, %v3726_v46  ;;  %v3229_v27 = vadd.f32 %v3228_v11, %v3227_v39  ;;  %v3727_v25 = vpack.c.bf16 %v3863_v34, %v3863_v34  ;;  %v2993_v57 = vpop.f32.mrb[11].mxu1  ;;  %v3277_v30 = vmul.f32 %v3863_v34, %v3863_v34  ;;  %v3234_v16 = vsel %vm2539_vm8, %v3863_v34, 0.0 }
 0x256   : > { %3173 = vst.msk [vmem:[%s5470_s26 + $0x60] sm:$0xf] %vm427_vm0, %v3724_v6  ;;  %v3329_v51 = vsel %vm2539_vm8, %v3274_v0, 0.0  ;;  %v3725_v28 = vpack.c.bf16 %v2993_v57, %v2993_v57  ;;  %v3230_v58 = vsel %vm2539_vm8, %v2993_v57, 0.0  ;;  %v3275_v4 = vmul.f32 %v2993_v57, %v2993_v57 }
 0x257   : > { %v3330_v59 = vadd.f32 %v3329_v51, %v3328_v55  ;;  %3176 = vst.msk [vmem:[%s5470_s26 + $0x6c] sm:$0xf] %vm427_vm0, %v3727_v25  ;;  %v3231_v43 = vadd.f32 %v3230_v58, %v3229_v27  ;;  %v3333_v49 = vsel %vm2539_vm8, %v3276_v18, 0.0  ;;  %v3335_v62 = vsel %vm2539_vm8, %v3277_v30, 0.0 }
 0x258   : > { %3174 = vst.msk [vmem:[%s5470_s26 + $0x64] sm:$0xf] %vm427_vm0, %v3725_v28  ;;  %v3331_v22 = vsel %vm2539_vm8, %v3275_v4, 0.0 }
 0x259   : > { %v3233_v5 = vadd.f32 %v3232_v56, %v3231_v43  ;;  %v3332_v33 = vadd.f32 %v3331_v22, %v3330_v59 }
 0x25b   : > { %v3235_v29 = vadd.f32 %v3234_v16, %v3233_v5  ;;  %v3334_v23 = vadd.f32 %v3333_v49, %v3332_v33 }
 0x25d   : > { %v3336_v17 = vadd.f32 %v3335_v62, %v3334_v23 }
 0x270   : > { %v3866_v8 = vpop.f32.mrb[12].mxu1 }
 0x271   : > { %v3730_v52 = vpack.c.bf16 %v3866_v8, %v3866_v8  ;;  %v3006_v48 = vpop.f32.mrb[13].mxu1  ;;  %v3280_v54 = vmul.f32 %v3866_v8, %v3866_v8  ;;  %v3240_v26 = vsel %vm2539_vm8, %v3866_v8, 0.0 }
 0x272   : > { %v3728_v14 = vpack.c.bf16 %v3006_v48, %v3006_v48  ;;  %v3236_v41 = vsel %vm2539_vm8, %v3006_v48, 0.0  ;;  %v3278_v61 = vmul.f32 %v3006_v48, %v3006_v48  ;;  %v3867_v42 = vpop.f32.mrb[14].mxu1 }
 0x273   : > { %3179 = vst.msk [vmem:[%s5470_s26 + $0x78] sm:$0xf] %vm427_vm0, %v3730_v52  ;;  %v3237_v63 = vadd.f32 %v3236_v41, %v3235_v29  ;;  %v3731_v12 = vpack.c.bf16 %v3867_v42, %v3867_v42  ;;  %v3009_v40 = vpop.f32.mrb[15].mxu1  ;;  %v3281_v21 = vmul.f32 %v3867_v42, %v3867_v42  ;;  %v3242_v13 = vsel %vm2539_vm8, %v3867_v42, 0.0 }
 0x274   : > { %3177 = vst.msk [vmem:[%s5470_s26 + $0x70] sm:$0xf] %vm427_vm0, %v3728_v14  ;;  %v3337_v37 = vsel %vm2539_vm8, %v3278_v61, 0.0  ;;  %v3729_v19 = vpack.c.bf16 %v3009_v40, %v3009_v40  ;;  %v3238_v47 = vsel %vm2539_vm8, %v3009_v40, 0.0  ;;  %v3279_v36 = vmul.f32 %v3009_v40, %v3009_v40 }
 0x275   : > { %v3338_v32 = vadd.f32 %v3337_v37, %v3336_v17  ;;  %3180 = vst.msk [vmem:[%s5470_s26 + $0x7c] sm:$0xf] %vm427_vm0, %v3731_v12  ;;  %v3239_v24 = vadd.f32 %v3238_v47, %v3237_v63  ;;  %v3341_v3 = vsel %vm2539_vm8, %v3280_v54, 0.0  ;;  %v3343_v35 = vsel %vm2539_vm8, %v3281_v21, 0.0 }
 0x276   : > { %3178 = vst.msk [vmem:[%s5470_s26 + $0x74] sm:$0xf] %vm427_vm0, %v3729_v19  ;;  %v3339_v7 = vsel %vm2539_vm8, %v3279_v36, 0.0  ;;  %vm3353_vm0 = vcmask 25600  }
 0x277   : > { %v3241_v44 = vadd.f32 %v3240_v26, %v3239_v24  ;;  %v3340_v31 = vadd.f32 %v3339_v7, %v3338_v32 }
 0x279   : > { %v3243_v20 = vadd.f32 %v3242_v13, %v3241_v44  ;;  %v3342_v10 = vadd.f32 %v3341_v3, %v3340_v31 }
 0x27b   : > { %v3244_v60 = vrot.slane %v3243_v20, 4  ;;  %v3344_v1 = vadd.f32 %v3343_v35, %v3342_v10 }
 0x27d   : > { %v3245_v15 = vadd.f32 %v3244_v60, %v3243_v20  ;;  %v3345_v38 = vrot.slane %v3344_v1, 4 }
 0x27f   : > { %v3246_v9 = vrot.slane %v3245_v15, 2  ;;  %v3346_v39 = vadd.f32 %v3345_v38, %v3344_v1 }
 0x281   : > { %v3247_v50 = vadd.f32 %v3246_v9, %v3245_v15  ;;  %v3347_v2 = vrot.slane %v3346_v39, 2 }
 0x283   : > { %v3248_v55 = vrot.slane %v3247_v50, 1  ;;  %v3348_v45 = vadd.f32 %v3347_v2, %v3346_v39 }
 0x285   : > { %v3349_v46 = vrot.slane %v3348_v45, 1  ;;  %v3249_v53 = vadd.f32 %v3248_v55, %v3247_v50 }
 0x287   : > { %v3350_v6 = vadd.f32 %v3349_v46, %v3348_v45 }
 0x289   : > { %v3352_v11 = vsel %vm580_vm4, %v3249_v53, %v3350_v6 }
 0x28a   : > { %3354 = vst.msk [vmem:[%s235_s29] sm:$0x3] %vm3353_vm0, %v3352_v11 }
 0x28b PF: > { %s16_s18 = sadd.s32 1, %s4042_s18  }
 0x28c   : > { %p13_p4 = scmp.ge.s32.totalorder %s16_s18, 4  }
 0x28e   :  { %15 = sbr.rel (!%p13_p4) target bundleno = 1 (0x1), region = 81 }

</bundles_post_ra>
